<compile_context>
chip_gen: v7x
topology: tpu7x:2x2x1
jax: 0.10.0
libtpu: 0.0.40
codegen_flags: <defaults>
</compile_context>

<pallas_src>
import jax
import jax.numpy as jnp
from jax.experimental import pallas as pl
from jax.experimental.pallas import tpu as pltpu

# ----------------------------- configuration ------------------------------
IMG = 16
PATCH = 4
IN_CH = 3
EMBED = 32
DEPTH = 2
HEADS = 4
HEAD_DIM = EMBED // HEADS
MLP_HID = int(EMBED * 4.0)
NUM_CLASSES = 10
NUM_PATCHES = (IMG // PATCH) ** 2          # 16
N_TOK = NUM_PATCHES + 1                    # 17 (cls + patches)
N_PAD = 24                                 # token dim padded to a multiple of 8
PATCH_DIM = IN_CH * PATCH * PATCH          # 48
LN_EPS = 1e-5
N_BLK_PARAMS = 13                          # refs per transformer block

_FULL_VMEM = pl.BlockSpec(memory_space=pltpu.MemorySpace.VMEM)


# ------------------------------ math helpers -------------------------------
def _layernorm(x, w, b):
    # torch.nn.LayerNorm: biased variance, eps inside rsqrt.
    mu = jnp.mean(x, axis=-1, keepdims=True)
    var = jnp.mean((x - mu) ** 2, axis=-1, keepdims=True)
    return (x - mu) * jax.lax.rsqrt(var + LN_EPS) * w + b


def _gelu_exact(x):
    # torch.nn.GELU default (erf-based).
    return 0.5 * x * (1.0 + jax.lax.erf(x * jnp.float32(0.7071067811865476)))


def _softmax_lastdim(s):
    m = jnp.max(s, axis=-1, keepdims=True)
    e = jnp.exp(s - m)
    return e * pl.reciprocal(jnp.sum(e, axis=-1, keepdims=True), approx=True)


# ------------------------------ fused kernel --------------------------------
def vit_fused_kernel(*refs):
    n_blk = DEPTH * N_BLK_PARAMS
    xp_ref, patchw_ref, base_ref, bias_ref, sel_ref = refs[0:5]
    blk_refs = refs[5:5 + n_blk]
    normw_ref, normb_ref, headw_ref, headb_ref = refs[5 + n_blk:5 + n_blk + 4]
    o_ref = refs[5 + n_blk + 4]

    bn = xp_ref.shape[0]                    # B * N_PAD (static at trace time)

    # ---- patch embedding (conv-as-matmul); cls token, pos embed and conv
    #      bias are pre-folded into `base` (pad / cls rows of xp are zero). ----
    x = jnp.dot(xp_ref[...], patchw_ref[...], preferred_element_type=jnp.float32)
    x = x + base_ref[...]                                    # (BN, D)

    bias = bias_ref[...]                                     # (H*BN, BN)
    lane = jax.lax.broadcasted_iota(jnp.int32, (1, EMBED), 1)
    head_masks = [
        jnp.where((lane >= h * HEAD_DIM) & (lane < (h + 1) * HEAD_DIM),
                  jnp.float32(1.0), jnp.float32(0.0))
        for h in range(HEADS)
    ]

    for d in range(DEPTH):
        (ln1w, ln1b, wq, wk, wv, projw, projb,
         ln2w, ln2b, w1, b1, w2, b2) = (
            r[...] for r in blk_refs[d * N_BLK_PARAMS:(d + 1) * N_BLK_PARAMS])

        # ---- multi-head self-attention (pre-LN) ----
        # wq already carries the 1/sqrt(HEAD_DIM) attention scale (host-folded).
        h_in = _layernorm(x, ln1w, ln1b)
        q = jnp.dot(h_in, wq, preferred_element_type=jnp.float32)
        k = jnp.dot(h_in, wk, preferred_element_type=jnp.float32)
        v = jnp.dot(h_in, wv, preferred_element_type=jnp.float32)

        # Stack all heads along rows: q_exp[h*BN + n, :] = q[n, :] masked to
        # head h's lanes.  One matmul then yields every (head, query, key)
        # score; `bias` kills padded keys and cross-batch pairs.
        q_exp = jnp.concatenate([q * m for m in head_masks], axis=0)  # (H*BN, D)
        s = jnp.einsum("nd,md->nm", q_exp, k,
                       preferred_element_type=jnp.float32) + bias      # (H*BN, BN)
        p = _softmax_lastdim(s)

        # Per-head PV with lane-masked V; the sum over heads reassembles the
        # (BN, D) multi-head output without any lane concatenation.
        attn = jnp.zeros_like(x)
        for hh in range(HEADS):
            p_h = p[hh * bn:(hh + 1) * bn, :]                          # (BN, BN)
            attn = attn + jnp.dot(p_h, v * head_masks[hh],
                                  preferred_element_type=jnp.float32)
        attn = jnp.dot(attn, projw, preferred_element_type=jnp.float32) + projb
        x = x + attn

        # ---- MLP (pre-LN) ----
        h2 = _layernorm(x, ln2w, ln2b)
        mlp = jnp.dot(h2, w1, preferred_element_type=jnp.float32) + b1
        mlp = _gelu_exact(mlp)
        mlp = jnp.dot(mlp, w2, preferred_element_type=jnp.float32) + b2
        x = x + mlp

    # ---- final LayerNorm on cls rows + classification head ----
    # sel is a (B, BN) one-hot matrix picking row i*N_PAD (the cls token of
    # batch i); one tiny MXU matmul instead of in-kernel sublane gather.
    cls = jnp.dot(sel_ref[...], x, preferred_element_type=jnp.float32)  # (B, D)
    cls = _layernorm(cls, normw_ref[...], normb_ref[...])
    o_ref[...] = (jnp.dot(cls, headw_ref[...], preferred_element_type=jnp.float32)
                  + headb_ref[...])


# ------------------------------ wrapper --------------------------------------
@jax.jit
def vit_forward(x_nchw, params):
    B, C, H, W = x_nchw.shape
    gh, gw = H // PATCH, W // PATCH

    # im2col for Conv2d(kernel=stride=PATCH): one host-side XLA op.
    xp = (x_nchw.reshape(B, C, gh, PATCH, gw, PATCH)
          .transpose(0, 2, 4, 1, 3, 5)
          .reshape(B, gh * gw, PATCH_DIM))
    # Token slot 0 (cls) and slots N_TOK..N_PAD-1 (padding) are zero rows.
    xp_pad = jnp.pad(xp, ((0, 0), (1, N_PAD - 1 - NUM_PATCHES), (0, 0)))
    xp_pad = xp_pad.reshape(B * N_PAD, PATCH_DIM)

    patch_w = params["conv_w"].reshape(EMBED, PATCH_DIM).T          # (P, D)
    pos = params["pos_embed"][0]                                     # (N_TOK, D)
    base_one = jnp.concatenate([
        params["cls_token"][0] + pos[0:1],                           # cls slot
        pos[1:] + params["conv_b"][None, :],                         # patch slots
        jnp.zeros((N_PAD - N_TOK, EMBED), jnp.float32),              # pad slots
    ], axis=0)                                                       # (N_PAD, D)
    base = jnp.tile(base_one, (B, 1))                                # (B*N_PAD, D)

    # Additive attention bias: 0 where (same batch) & (key is a real token),
    # -1e30 otherwise; tiled once per head to match the stacked score matrix.
    tok = jnp.arange(B * N_PAD)
    same_batch = (tok[:, None] // N_PAD) == (tok[None, :] // N_PAD)
    key_valid = (tok % N_PAD) < N_TOK
    bias = jnp.where(same_batch & key_valid[None, :], 0.0, -1e30)
    bias = jnp.tile(bias.astype(jnp.float32), (HEADS, 1))            # (H*BN, BN)

    # One-hot selection of each batch's cls row (row i*N_PAD).
    sel = (tok[None, :] == (jnp.arange(B) * N_PAD)[:, None]).astype(jnp.float32)

    scale = jnp.float32(HEAD_DIM ** -0.5)
    flat = [xp_pad, patch_w, base, bias, sel]
    for p in params["blocks"]:
        qkv_w = p["qkv_w"]                                           # (D, 3D)
        flat += [p["ln1_w"], p["ln1_b"],
                 qkv_w[:, 0:EMBED] * scale,                          # scale folded into Wq
                 qkv_w[:, EMBED:2 * EMBED], qkv_w[:, 2 * EMBED:],
                 p["proj_w"], p["proj_b"], p["ln2_w"], p["ln2_b"],
                 p["fc1_w"], p["fc1_b"], p["fc2_w"], p["fc2_b"]]
    flat += [params["norm_w"], params["norm_b"], params["head_w"], params["head_b"]]

    # TODO(synk): register_hook / save_cls_gradients / save_input_gradients are
    #             backward-only hooks with no forward-pass effect; not modeled.
    return pl.pallas_call(
        vit_fused_kernel,
        out_shape=jax.ShapeDtypeStruct((B, NUM_CLASSES), jnp.float32),
        in_specs=[_FULL_VMEM] * len(flat),
        out_specs=_FULL_VMEM,
    )(*flat)


# ------------------------------ parameters ----------------------------------
def trunc_normal(key, shape, std=0.02):
    return std * jax.random.truncated_normal(key, -2.0, 2.0, shape, jnp.float32)


def init_params(key):
    keys = jax.random.split(key, 4 + DEPTH)
    params = {
        "conv_w": trunc_normal(keys[0], (EMBED, IN_CH, PATCH, PATCH)),
        "conv_b": jnp.zeros((EMBED,), jnp.float32),
        "cls_token": trunc_normal(keys[1], (1, 1, EMBED)),
        "pos_embed": trunc_normal(keys[2], (1, N_TOK, EMBED)),
        "norm_w": jnp.ones((1, EMBED), jnp.float32),
        "norm_b": jnp.zeros((1, EMBED), jnp.float32),
        "head_w": trunc_normal(keys[3], (EMBED, NUM_CLASSES)),
        "head_b": jnp.zeros((1, NUM_CLASSES), jnp.float32),
        "blocks": [],
    }
    for d in range(DEPTH):
        bk = jax.random.split(keys[4 + d], 4)
        params["blocks"].append({
            "ln1_w": jnp.ones((1, EMBED), jnp.float32),
            "ln1_b": jnp.zeros((1, EMBED), jnp.float32),
            "qkv_w": trunc_normal(bk[0], (EMBED, 3 * EMBED)),   # qkv_bias=False
            "proj_w": trunc_normal(bk[1], (EMBED, EMBED)),
            "proj_b": jnp.zeros((1, EMBED), jnp.float32),
            "ln2_w": jnp.ones((1, EMBED), jnp.float32),
            "ln2_b": jnp.zeros((1, EMBED), jnp.float32),
            "fc1_w": trunc_normal(bk[2], (EMBED, MLP_HID)),
            "fc1_b": jnp.zeros((1, MLP_HID), jnp.float32),
            "fc2_w": trunc_normal(bk[3], (MLP_HID, EMBED)),
            "fc2_b": jnp.zeros((1, EMBED), jnp.float32),
        })
    return params


# ------------------------- pure-JAX reference (self-check) -------------------
def _vit_reference(x_nchw, params):
    B = x_nchw.shape[0]
    xp = (x_nchw.reshape(B, IN_CH, IMG // PATCH, PATCH, IMG // PATCH, PATCH)
          .transpose(0, 2, 4, 1, 3, 5)
          .reshape(B, NUM_PATCHES, PATCH_DIM))
    w = params["conv_w"].reshape(EMBED, PATCH_DIM).T
    x = xp @ w + params["conv_b"]
    cls = jnp.broadcast_to(params["cls_token"], (B, 1, EMBED))
    x = jnp.concatenate([cls, x], axis=1) + params["pos_embed"]
    for p in params["blocks"]:
        h = _layernorm(x, p["ln1_w"], p["ln1_b"])
        qkv = h @ p["qkv_w"]
        q, k, v = (qkv[..., :EMBED], qkv[..., EMBED:2 * EMBED], qkv[..., 2 * EMBED:])
        q = q.reshape(B, N_TOK, HEADS, HEAD_DIM).transpose(0, 2, 1, 3)
        k = k.reshape(B, N_TOK, HEADS, HEAD_DIM).transpose(0, 2, 1, 3)
        v = v.reshape(B, N_TOK, HEADS, HEAD_DIM).transpose(0, 2, 1, 3)
        s = jnp.einsum("bhnd,bhmd->bhnm", q, k) * (HEAD_DIM ** -0.5)
        a = jax.nn.softmax(s, axis=-1)
        o = jnp.einsum("bhnm,bhmd->bhnd", a, v)
        o = o.transpose(0, 2, 1, 3).reshape(B, N_TOK, EMBED)
        x = x + o @ p["proj_w"] + p["proj_b"]
        h2 = _layernorm(x, p["ln2_w"], p["ln2_b"])
        m = jax.nn.gelu(h2 @ p["fc1_w"] + p["fc1_b"], approximate=False)
        x = x + m @ p["fc2_w"] + p["fc2_b"]
    x = _layernorm(x, params["norm_w"], params["norm_b"])
    return x[:, 0] @ params["head_w"] + params["head_b"]


# ------------------------------ main ------------------------------------------
if __name__ == "__main__":
    key = jax.random.PRNGKey(0)
    k_x, k_p = jax.random.split(key)
    x = jax.random.normal(k_x, (2, IN_CH, IMG, IMG), jnp.float32)     # NCHW
    params = init_params(k_p)

    out = vit_forward(x, params)
    out = jax.block_until_ready(out)
    assert out.shape == (2, NUM_CLASSES), out.shape
    assert bool(jnp.all(jnp.isfinite(out)))

    ref = _vit_reference(x, params)
    assert bool(jnp.allclose(out, ref, rtol=5e-3, atol=5e-3)), (out, ref)

    print("KERNEL_OK")
</pallas_src>

<mosaic_0001>
module attributes {stable_mosaic.version = 11 : i64} {
  func.func @vit_fused_kernel(%arg0: memref<48x48xf32, #tpu.memory_space<vmem>>, %arg1: memref<48x32xf32, #tpu.memory_space<vmem>>, %arg2: memref<48x32xf32, #tpu.memory_space<vmem>>, %arg3: memref<192x48xf32, #tpu.memory_space<vmem>>, %arg4: memref<2x48xf32, #tpu.memory_space<vmem>>, %arg5: memref<1x32xf32, #tpu.memory_space<vmem>>, %arg6: memref<1x32xf32, #tpu.memory_space<vmem>>, %arg7: memref<32x32xf32, #tpu.memory_space<vmem>>, %arg8: memref<32x32xf32, #tpu.memory_space<vmem>>, %arg9: memref<32x32xf32, #tpu.memory_space<vmem>>, %arg10: memref<32x32xf32, #tpu.memory_space<vmem>>, %arg11: memref<1x32xf32, #tpu.memory_space<vmem>>, %arg12: memref<1x32xf32, #tpu.memory_space<vmem>>, %arg13: memref<1x32xf32, #tpu.memory_space<vmem>>, %arg14: memref<32x128xf32, #tpu.memory_space<vmem>>, %arg15: memref<1x128xf32, #tpu.memory_space<vmem>>, %arg16: memref<128x32xf32, #tpu.memory_space<vmem>>, %arg17: memref<1x32xf32, #tpu.memory_space<vmem>>, %arg18: memref<1x32xf32, #tpu.memory_space<vmem>>, %arg19: memref<1x32xf32, #tpu.memory_space<vmem>>, %arg20: memref<32x32xf32, #tpu.memory_space<vmem>>, %arg21: memref<32x32xf32, #tpu.memory_space<vmem>>, %arg22: memref<32x32xf32, #tpu.memory_space<vmem>>, %arg23: memref<32x32xf32, #tpu.memory_space<vmem>>, %arg24: memref<1x32xf32, #tpu.memory_space<vmem>>, %arg25: memref<1x32xf32, #tpu.memory_space<vmem>>, %arg26: memref<1x32xf32, #tpu.memory_space<vmem>>, %arg27: memref<32x128xf32, #tpu.memory_space<vmem>>, %arg28: memref<1x128xf32, #tpu.memory_space<vmem>>, %arg29: memref<128x32xf32, #tpu.memory_space<vmem>>, %arg30: memref<1x32xf32, #tpu.memory_space<vmem>>, %arg31: memref<1x32xf32, #tpu.memory_space<vmem>>, %arg32: memref<1x32xf32, #tpu.memory_space<vmem>>, %arg33: memref<32x10xf32, #tpu.memory_space<vmem>>, %arg34: memref<1x10xf32, #tpu.memory_space<vmem>>, %arg35: memref<2x10xf32, #tpu.memory_space<vmem>>) attributes {dimension_semantics = [], scalar_prefetch = 0 : i64, scratch_operands = 0 : i64, tpu.core_type = #tpu.core_type<tc>} {
    %c0 = arith.constant 0 : index
    %c0_0 = arith.constant 0 : index
    %0 = vector.load %arg0[%c0, %c0_0] : memref<48x48xf32, #tpu.memory_space<vmem>>, vector<48x48xf32>
    %c0_1 = arith.constant 0 : index
    %c0_2 = arith.constant 0 : index
    %1 = vector.load %arg1[%c0_1, %c0_2] : memref<48x32xf32, #tpu.memory_space<vmem>>, vector<48x32xf32>
    %cst = arith.constant dense<0.000000e+00> : vector<48x32xf32>
    %2 = tpu.matmul %0, %1, %cst {dimension_numbers = #tpu.dot_dimension_numbers<[1], [0], [0], [1], [0, 0, 1, 1], [], []>} : vector<48x48xf32>, vector<48x32xf32>, vector<48x32xf32> -> vector<48x32xf32>
    %c0_3 = arith.constant 0 : index
    %c0_4 = arith.constant 0 : index
    %3 = vector.load %arg2[%c0_3, %c0_4] : memref<48x32xf32, #tpu.memory_space<vmem>>, vector<48x32xf32>
    %4 = arith.addf %2, %3 : vector<48x32xf32>
    %c0_5 = arith.constant 0 : index
    %c0_6 = arith.constant 0 : index
    %5 = vector.load %arg3[%c0_5, %c0_6] : memref<192x48xf32, #tpu.memory_space<vmem>>, vector<192x48xf32>
    %6 = tpu.iota {dimensions = array<i32: 1>} : vector<1x32xi32>
    %c0_i32 = arith.constant 0 : i32
    %7 = vector.broadcast %c0_i32 : i32 to vector<1x32xi32>
    %8 = arith.cmpi sge, %6, %7 : vector<1x32xi32>
    %c8_i32 = arith.constant 8 : i32
    %9 = vector.broadcast %c8_i32 : i32 to vector<1x32xi32>
    %10 = arith.cmpi slt, %6, %9 : vector<1x32xi32>
    %11 = arith.andi %8, %10 : vector<1x32xi1>
    %cst_7 = arith.constant 1.000000e+00 : f32
    %cst_8 = arith.constant 0.000000e+00 : f32
    %12 = vector.broadcast %cst_7 : f32 to vector<1x32xf32>
    %13 = vector.broadcast %cst_8 : f32 to vector<1x32xf32>
    %14 = arith.select %11, %12, %13 : vector<1x32xi1>, vector<1x32xf32>
    %c8_i32_9 = arith.constant 8 : i32
    %15 = vector.broadcast %c8_i32_9 : i32 to vector<1x32xi32>
    %16 = arith.cmpi sge, %6, %15 : vector<1x32xi32>
    %c16_i32 = arith.constant 16 : i32
    %17 = vector.broadcast %c16_i32 : i32 to vector<1x32xi32>
    %18 = arith.cmpi slt, %6, %17 : vector<1x32xi32>
    %19 = arith.andi %16, %18 : vector<1x32xi1>
    %cst_10 = arith.constant 1.000000e+00 : f32
    %cst_11 = arith.constant 0.000000e+00 : f32
    %20 = vector.broadcast %cst_10 : f32 to vector<1x32xf32>
    %21 = vector.broadcast %cst_11 : f32 to vector<1x32xf32>
    %22 = arith.select %19, %20, %21 : vector<1x32xi1>, vector<1x32xf32>
    %c16_i32_12 = arith.constant 16 : i32
    %23 = vector.broadcast %c16_i32_12 : i32 to vector<1x32xi32>
    %24 = arith.cmpi sge, %6, %23 : vector<1x32xi32>
    %c24_i32 = arith.constant 24 : i32
    %25 = vector.broadcast %c24_i32 : i32 to vector<1x32xi32>
    %26 = arith.cmpi slt, %6, %25 : vector<1x32xi32>
    %27 = arith.andi %24, %26 : vector<1x32xi1>
    %cst_13 = arith.constant 1.000000e+00 : f32
    %cst_14 = arith.constant 0.000000e+00 : f32
    %28 = vector.broadcast %cst_13 : f32 to vector<1x32xf32>
    %29 = vector.broadcast %cst_14 : f32 to vector<1x32xf32>
    %30 = arith.select %27, %28, %29 : vector<1x32xi1>, vector<1x32xf32>
    %c24_i32_15 = arith.constant 24 : i32
    %31 = vector.broadcast %c24_i32_15 : i32 to vector<1x32xi32>
    %32 = arith.cmpi sge, %6, %31 : vector<1x32xi32>
    %c32_i32 = arith.constant 32 : i32
    %33 = vector.broadcast %c32_i32 : i32 to vector<1x32xi32>
    %34 = arith.cmpi slt, %6, %33 : vector<1x32xi32>
    %35 = arith.andi %32, %34 : vector<1x32xi1>
    %cst_16 = arith.constant 1.000000e+00 : f32
    %cst_17 = arith.constant 0.000000e+00 : f32
    %36 = vector.broadcast %cst_16 : f32 to vector<1x32xf32>
    %37 = vector.broadcast %cst_17 : f32 to vector<1x32xf32>
    %38 = arith.select %35, %36, %37 : vector<1x32xi1>, vector<1x32xf32>
    %c0_18 = arith.constant 0 : index
    %c0_19 = arith.constant 0 : index
    %39 = vector.load %arg5[%c0_18, %c0_19] : memref<1x32xf32, #tpu.memory_space<vmem>>, vector<1x32xf32>
    %c0_20 = arith.constant 0 : index
    %c0_21 = arith.constant 0 : index
    %40 = vector.load %arg6[%c0_20, %c0_21] : memref<1x32xf32, #tpu.memory_space<vmem>>, vector<1x32xf32>
    %c0_22 = arith.constant 0 : index
    %c0_23 = arith.constant 0 : index
    %41 = vector.load %arg7[%c0_22, %c0_23] : memref<32x32xf32, #tpu.memory_space<vmem>>, vector<32x32xf32>
    %c0_24 = arith.constant 0 : index
    %c0_25 = arith.constant 0 : index
    %42 = vector.load %arg8[%c0_24, %c0_25] : memref<32x32xf32, #tpu.memory_space<vmem>>, vector<32x32xf32>
    %c0_26 = arith.constant 0 : index
    %c0_27 = arith.constant 0 : index
    %43 = vector.load %arg9[%c0_26, %c0_27] : memref<32x32xf32, #tpu.memory_space<vmem>>, vector<32x32xf32>
    %c0_28 = arith.constant 0 : index
    %c0_29 = arith.constant 0 : index
    %44 = vector.load %arg10[%c0_28, %c0_29] : memref<32x32xf32, #tpu.memory_space<vmem>>, vector<32x32xf32>
    %c0_30 = arith.constant 0 : index
    %c0_31 = arith.constant 0 : index
    %45 = vector.load %arg11[%c0_30, %c0_31] : memref<1x32xf32, #tpu.memory_space<vmem>>, vector<1x32xf32>
    %c0_32 = arith.constant 0 : index
    %c0_33 = arith.constant 0 : index
    %46 = vector.load %arg12[%c0_32, %c0_33] : memref<1x32xf32, #tpu.memory_space<vmem>>, vector<1x32xf32>
    %c0_34 = arith.constant 0 : index
    %c0_35 = arith.constant 0 : index
    %47 = vector.load %arg13[%c0_34, %c0_35] : memref<1x32xf32, #tpu.memory_space<vmem>>, vector<1x32xf32>
    %c0_36 = arith.constant 0 : index
    %c0_37 = arith.constant 0 : index
    %48 = vector.load %arg14[%c0_36, %c0_37] : memref<32x128xf32, #tpu.memory_space<vmem>>, vector<32x128xf32>
    %c0_38 = arith.constant 0 : index
    %c0_39 = arith.constant 0 : index
    %49 = vector.load %arg15[%c0_38, %c0_39] : memref<1x128xf32, #tpu.memory_space<vmem>>, vector<1x128xf32>
    %c0_40 = arith.constant 0 : index
    %c0_41 = arith.constant 0 : index
    %50 = vector.load %arg16[%c0_40, %c0_41] : memref<128x32xf32, #tpu.memory_space<vmem>>, vector<128x32xf32>
    %c0_42 = arith.constant 0 : index
    %c0_43 = arith.constant 0 : index
    %51 = vector.load %arg17[%c0_42, %c0_43] : memref<1x32xf32, #tpu.memory_space<vmem>>, vector<1x32xf32>
    %cst_44 = arith.constant dense<0.000000e+00> : vector<48xf32>
    %52 = vector.multi_reduction <add>, %4, %cst_44 [1] : vector<48x32xf32> to vector<48xf32>
    %53 = vector.shape_cast %52 : vector<48xf32> to vector<48x1xf32>
    %cst_45 = arith.constant 3.200000e+01 : f32
    %54 = vector.broadcast %cst_45 : f32 to vector<48x1xf32>
    %55 = arith.divf %53, %54 : vector<48x1xf32>
    %56 = vector.broadcast %55 : vector<48x1xf32> to vector<48x32xf32>
    %57 = arith.subf %4, %56 : vector<48x32xf32>
    %58 = arith.mulf %57, %57 : vector<48x32xf32>
    %cst_46 = arith.constant dense<0.000000e+00> : vector<48xf32>
    %59 = vector.multi_reduction <add>, %58, %cst_46 [1] : vector<48x32xf32> to vector<48xf32>
    %60 = vector.shape_cast %59 : vector<48xf32> to vector<48x1xf32>
    %cst_47 = arith.constant 3.200000e+01 : f32
    %61 = vector.broadcast %cst_47 : f32 to vector<48x1xf32>
    %62 = arith.divf %60, %61 : vector<48x1xf32>
    %63 = vector.broadcast %55 : vector<48x1xf32> to vector<48x32xf32>
    %64 = arith.subf %4, %63 : vector<48x32xf32>
    %cst_48 = arith.constant 9.99999974E-6 : f32
    %65 = vector.broadcast %cst_48 : f32 to vector<48x1xf32>
    %66 = arith.addf %62, %65 : vector<48x1xf32>
    %67 = math.rsqrt %66 : vector<48x1xf32>
    %68 = vector.broadcast %67 : vector<48x1xf32> to vector<48x32xf32>
    %69 = arith.mulf %64, %68 : vector<48x32xf32>
    %70 = vector.broadcast %39 : vector<1x32xf32> to vector<48x32xf32>
    %71 = arith.mulf %69, %70 : vector<48x32xf32>
    %72 = vector.broadcast %40 : vector<1x32xf32> to vector<48x32xf32>
    %73 = arith.addf %71, %72 : vector<48x32xf32>
    %cst_49 = arith.constant dense<0.000000e+00> : vector<48x32xf32>
    %74 = tpu.matmul %73, %41, %cst_49 {dimension_numbers = #tpu.dot_dimension_numbers<[1], [0], [0], [1], [0, 0, 1, 1], [], []>} : vector<48x32xf32>, vector<32x32xf32>, vector<48x32xf32> -> vector<48x32xf32>
    %cst_50 = arith.constant dense<0.000000e+00> : vector<48x32xf32>
    %75 = tpu.matmul %73, %42, %cst_50 {dimension_numbers = #tpu.dot_dimension_numbers<[1], [0], [0], [1], [0, 0, 1, 1], [], []>} : vector<48x32xf32>, vector<32x32xf32>, vector<48x32xf32> -> vector<48x32xf32>
    %cst_51 = arith.constant dense<0.000000e+00> : vector<48x32xf32>
    %76 = tpu.matmul %73, %43, %cst_51 {dimension_numbers = #tpu.dot_dimension_numbers<[1], [0], [0], [1], [0, 0, 1, 1], [], []>} : vector<48x32xf32>, vector<32x32xf32>, vector<48x32xf32> -> vector<48x32xf32>
    %77 = vector.broadcast %14 : vector<1x32xf32> to vector<48x32xf32>
    %78 = arith.mulf %74, %77 : vector<48x32xf32>
    %79 = vector.broadcast %22 : vector<1x32xf32> to vector<48x32xf32>
    %80 = arith.mulf %74, %79 : vector<48x32xf32>
    %81 = vector.broadcast %30 : vector<1x32xf32> to vector<48x32xf32>
    %82 = arith.mulf %74, %81 : vector<48x32xf32>
    %83 = vector.broadcast %38 : vector<1x32xf32> to vector<48x32xf32>
    %84 = arith.mulf %74, %83 : vector<48x32xf32>
    %85 = tpu.concatenate %78, %80, %82, %84 in 0 : vector<48x32xf32>, vector<48x32xf32>, vector<48x32xf32>, vector<48x32xf32> -> vector<192x32xf32>
    "tpu.trace_start"() <{level = 10 : i32, message = "nd,md->nm"}> : () -> ()
    %cst_52 = arith.constant dense<0.000000e+00> : vector<192x48xf32>
    %86 = tpu.matmul %85, %75, %cst_52 {dimension_numbers = #tpu.dot_dimension_numbers<[1], [1], [0], [0], [0, 0, 1, 0], [], []>} : vector<192x32xf32>, vector<48x32xf32>, vector<192x48xf32> -> vector<192x48xf32>
    "tpu.trace_stop"() : () -> ()
    %87 = arith.addf %86, %5 : vector<192x48xf32>
    %cst_53 = arith.constant dense<0xFF800000> : vector<192xf32>
    %88 = vector.multi_reduction <maximumf>, %87, %cst_53 [1] : vector<192x48xf32> to vector<192xf32>
    %89 = vector.shape_cast %88 : vector<192xf32> to vector<192x1xf32>
    %90 = vector.broadcast %89 : vector<192x1xf32> to vector<192x48xf32>
    %91 = arith.subf %87, %90 : vector<192x48xf32>
    %92 = math.exp %91 : vector<192x48xf32>
    %cst_54 = arith.constant dense<0.000000e+00> : vector<192xf32>
    %93 = vector.multi_reduction <add>, %92, %cst_54 [1] : vector<192x48xf32> to vector<192xf32>
    %94 = vector.shape_cast %93 : vector<192xf32> to vector<192x1xf32>
    %95 = tpu.reciprocal %94 {approx = true} : vector<192x1xf32> -> vector<192x1xf32>
    %96 = vector.broadcast %95 : vector<192x1xf32> to vector<192x48xf32>
    %97 = arith.mulf %92, %96 : vector<192x48xf32>
    %cst_55 = arith.constant 0.000000e+00 : f32
    %98 = vector.broadcast %cst_55 : f32 to vector<48x32xf32>
    %99 = vector.extract_strided_slice %97 {offsets = [0, 0], sizes = [48, 48], strides = [1, 1]} : vector<192x48xf32> to vector<48x48xf32>
    %100 = vector.broadcast %14 : vector<1x32xf32> to vector<48x32xf32>
    %101 = arith.mulf %76, %100 : vector<48x32xf32>
    %cst_56 = arith.constant dense<0.000000e+00> : vector<48x32xf32>
    %102 = tpu.matmul %99, %101, %cst_56 {dimension_numbers = #tpu.dot_dimension_numbers<[1], [0], [0], [1], [0, 0, 1, 1], [], []>} : vector<48x48xf32>, vector<48x32xf32>, vector<48x32xf32> -> vector<48x32xf32>
    %103 = arith.addf %98, %102 : vector<48x32xf32>
    %104 = vector.extract_strided_slice %97 {offsets = [48, 0], sizes = [48, 48], strides = [1, 1]} : vector<192x48xf32> to vector<48x48xf32>
    %105 = vector.broadcast %22 : vector<1x32xf32> to vector<48x32xf32>
    %106 = arith.mulf %76, %105 : vector<48x32xf32>
    %cst_57 = arith.constant dense<0.000000e+00> : vector<48x32xf32>
    %107 = tpu.matmul %104, %106, %cst_57 {dimension_numbers = #tpu.dot_dimension_numbers<[1], [0], [0], [1], [0, 0, 1, 1], [], []>} : vector<48x48xf32>, vector<48x32xf32>, vector<48x32xf32> -> vector<48x32xf32>
    %108 = arith.addf %103, %107 : vector<48x32xf32>
    %109 = vector.extract_strided_slice %97 {offsets = [96, 0], sizes = [48, 48], strides = [1, 1]} : vector<192x48xf32> to vector<48x48xf32>
    %110 = vector.broadcast %30 : vector<1x32xf32> to vector<48x32xf32>
    %111 = arith.mulf %76, %110 : vector<48x32xf32>
    %cst_58 = arith.constant dense<0.000000e+00> : vector<48x32xf32>
    %112 = tpu.matmul %109, %111, %cst_58 {dimension_numbers = #tpu.dot_dimension_numbers<[1], [0], [0], [1], [0, 0, 1, 1], [], []>} : vector<48x48xf32>, vector<48x32xf32>, vector<48x32xf32> -> vector<48x32xf32>
    %113 = arith.addf %108, %112 : vector<48x32xf32>
    %114 = vector.extract_strided_slice %97 {offsets = [144, 0], sizes = [48, 48], strides = [1, 1]} : vector<192x48xf32> to vector<48x48xf32>
    %115 = vector.broadcast %38 : vector<1x32xf32> to vector<48x32xf32>
    %116 = arith.mulf %76, %115 : vector<48x32xf32>
    %cst_59 = arith.constant dense<0.000000e+00> : vector<48x32xf32>
    %117 = tpu.matmul %114, %116, %cst_59 {dimension_numbers = #tpu.dot_dimension_numbers<[1], [0], [0], [1], [0, 0, 1, 1], [], []>} : vector<48x48xf32>, vector<48x32xf32>, vector<48x32xf32> -> vector<48x32xf32>
    %118 = arith.addf %113, %117 : vector<48x32xf32>
    %cst_60 = arith.constant dense<0.000000e+00> : vector<48x32xf32>
    %119 = tpu.matmul %118, %44, %cst_60 {dimension_numbers = #tpu.dot_dimension_numbers<[1], [0], [0], [1], [0, 0, 1, 1], [], []>} : vector<48x32xf32>, vector<32x32xf32>, vector<48x32xf32> -> vector<48x32xf32>
    %120 = vector.broadcast %45 : vector<1x32xf32> to vector<48x32xf32>
    %121 = arith.addf %119, %120 : vector<48x32xf32>
    %122 = arith.addf %4, %121 : vector<48x32xf32>
    %cst_61 = arith.constant dense<0.000000e+00> : vector<48xf32>
    %123 = vector.multi_reduction <add>, %122, %cst_61 [1] : vector<48x32xf32> to vector<48xf32>
    %124 = vector.shape_cast %123 : vector<48xf32> to vector<48x1xf32>
    %cst_62 = arith.constant 3.200000e+01 : f32
    %125 = vector.broadcast %cst_62 : f32 to vector<48x1xf32>
    %126 = arith.divf %124, %125 : vector<48x1xf32>
    %127 = vector.broadcast %126 : vector<48x1xf32> to vector<48x32xf32>
    %128 = arith.subf %122, %127 : vector<48x32xf32>
    %129 = arith.mulf %128, %128 : vector<48x32xf32>
    %cst_63 = arith.constant dense<0.000000e+00> : vector<48xf32>
    %130 = vector.multi_reduction <add>, %129, %cst_63 [1] : vector<48x32xf32> to vector<48xf32>
    %131 = vector.shape_cast %130 : vector<48xf32> to vector<48x1xf32>
    %cst_64 = arith.constant 3.200000e+01 : f32
    %132 = vector.broadcast %cst_64 : f32 to vector<48x1xf32>
    %133 = arith.divf %131, %132 : vector<48x1xf32>
    %134 = vector.broadcast %126 : vector<48x1xf32> to vector<48x32xf32>
    %135 = arith.subf %122, %134 : vector<48x32xf32>
    %cst_65 = arith.constant 9.99999974E-6 : f32
    %136 = vector.broadcast %cst_65 : f32 to vector<48x1xf32>
    %137 = arith.addf %133, %136 : vector<48x1xf32>
    %138 = math.rsqrt %137 : vector<48x1xf32>
    %139 = vector.broadcast %138 : vector<48x1xf32> to vector<48x32xf32>
    %140 = arith.mulf %135, %139 : vector<48x32xf32>
    %141 = vector.broadcast %46 : vector<1x32xf32> to vector<48x32xf32>
    %142 = arith.mulf %140, %141 : vector<48x32xf32>
    %143 = vector.broadcast %47 : vector<1x32xf32> to vector<48x32xf32>
    %144 = arith.addf %142, %143 : vector<48x32xf32>
    %cst_66 = arith.constant dense<0.000000e+00> : vector<48x128xf32>
    %145 = tpu.matmul %144, %48, %cst_66 {dimension_numbers = #tpu.dot_dimension_numbers<[1], [0], [0], [1], [0, 0, 1, 1], [], []>} : vector<48x32xf32>, vector<32x128xf32>, vector<48x128xf32> -> vector<48x128xf32>
    %146 = vector.broadcast %49 : vector<1x128xf32> to vector<48x128xf32>
    %147 = arith.addf %145, %146 : vector<48x128xf32>
    %cst_67 = arith.constant 5.000000e-01 : f32
    %148 = vector.broadcast %cst_67 : f32 to vector<48x128xf32>
    %149 = arith.mulf %148, %147 : vector<48x128xf32>
    %cst_68 = arith.constant 0.707106769 : f32
    %150 = vector.broadcast %cst_68 : f32 to vector<48x128xf32>
    %151 = arith.mulf %147, %150 : vector<48x128xf32>
    %152 = math.erf %151 : vector<48x128xf32>
    %cst_69 = arith.constant 1.000000e+00 : f32
    %153 = vector.broadcast %cst_69 : f32 to vector<48x128xf32>
    %154 = arith.addf %153, %152 : vector<48x128xf32>
    %155 = arith.mulf %149, %154 : vector<48x128xf32>
    %cst_70 = arith.constant dense<0.000000e+00> : vector<48x32xf32>
    %156 = tpu.matmul %155, %50, %cst_70 {dimension_numbers = #tpu.dot_dimension_numbers<[1], [0], [0], [1], [0, 0, 1, 1], [], []>} : vector<48x128xf32>, vector<128x32xf32>, vector<48x32xf32> -> vector<48x32xf32>
    %157 = vector.broadcast %51 : vector<1x32xf32> to vector<48x32xf32>
    %158 = arith.addf %156, %157 : vector<48x32xf32>
    %159 = arith.addf %122, %158 : vector<48x32xf32>
    %c0_71 = arith.constant 0 : index
    %c0_72 = arith.constant 0 : index
    %160 = vector.load %arg18[%c0_71, %c0_72] : memref<1x32xf32, #tpu.memory_space<vmem>>, vector<1x32xf32>
    %c0_73 = arith.constant 0 : index
    %c0_74 = arith.constant 0 : index
    %161 = vector.load %arg19[%c0_73, %c0_74] : memref<1x32xf32, #tpu.memory_space<vmem>>, vector<1x32xf32>
    %c0_75 = arith.constant 0 : index
    %c0_76 = arith.constant 0 : index
    %162 = vector.load %arg20[%c0_75, %c0_76] : memref<32x32xf32, #tpu.memory_space<vmem>>, vector<32x32xf32>
    %c0_77 = arith.constant 0 : index
    %c0_78 = arith.constant 0 : index
    %163 = vector.load %arg21[%c0_77, %c0_78] : memref<32x32xf32, #tpu.memory_space<vmem>>, vector<32x32xf32>
    %c0_79 = arith.constant 0 : index
    %c0_80 = arith.constant 0 : index
    %164 = vector.load %arg22[%c0_79, %c0_80] : memref<32x32xf32, #tpu.memory_space<vmem>>, vector<32x32xf32>
    %c0_81 = arith.constant 0 : index
    %c0_82 = arith.constant 0 : index
    %165 = vector.load %arg23[%c0_81, %c0_82] : memref<32x32xf32, #tpu.memory_space<vmem>>, vector<32x32xf32>
    %c0_83 = arith.constant 0 : index
    %c0_84 = arith.constant 0 : index
    %166 = vector.load %arg24[%c0_83, %c0_84] : memref<1x32xf32, #tpu.memory_space<vmem>>, vector<1x32xf32>
    %c0_85 = arith.constant 0 : index
    %c0_86 = arith.constant 0 : index
    %167 = vector.load %arg25[%c0_85, %c0_86] : memref<1x32xf32, #tpu.memory_space<vmem>>, vector<1x32xf32>
    %c0_87 = arith.constant 0 : index
    %c0_88 = arith.constant 0 : index
    %168 = vector.load %arg26[%c0_87, %c0_88] : memref<1x32xf32, #tpu.memory_space<vmem>>, vector<1x32xf32>
    %c0_89 = arith.constant 0 : index
    %c0_90 = arith.constant 0 : index
    %169 = vector.load %arg27[%c0_89, %c0_90] : memref<32x128xf32, #tpu.memory_space<vmem>>, vector<32x128xf32>
    %c0_91 = arith.constant 0 : index
    %c0_92 = arith.constant 0 : index
    %170 = vector.load %arg28[%c0_91, %c0_92] : memref<1x128xf32, #tpu.memory_space<vmem>>, vector<1x128xf32>
    %c0_93 = arith.constant 0 : index
    %c0_94 = arith.constant 0 : index
    %171 = vector.load %arg29[%c0_93, %c0_94] : memref<128x32xf32, #tpu.memory_space<vmem>>, vector<128x32xf32>
    %c0_95 = arith.constant 0 : index
    %c0_96 = arith.constant 0 : index
    %172 = vector.load %arg30[%c0_95, %c0_96] : memref<1x32xf32, #tpu.memory_space<vmem>>, vector<1x32xf32>
    %cst_97 = arith.constant dense<0.000000e+00> : vector<48xf32>
    %173 = vector.multi_reduction <add>, %159, %cst_97 [1] : vector<48x32xf32> to vector<48xf32>
    %174 = vector.shape_cast %173 : vector<48xf32> to vector<48x1xf32>
    %cst_98 = arith.constant 3.200000e+01 : f32
    %175 = vector.broadcast %cst_98 : f32 to vector<48x1xf32>
    %176 = arith.divf %174, %175 : vector<48x1xf32>
    %177 = vector.broadcast %176 : vector<48x1xf32> to vector<48x32xf32>
    %178 = arith.subf %159, %177 : vector<48x32xf32>
    %179 = arith.mulf %178, %178 : vector<48x32xf32>
    %cst_99 = arith.constant dense<0.000000e+00> : vector<48xf32>
    %180 = vector.multi_reduction <add>, %179, %cst_99 [1] : vector<48x32xf32> to vector<48xf32>
    %181 = vector.shape_cast %180 : vector<48xf32> to vector<48x1xf32>
    %cst_100 = arith.constant 3.200000e+01 : f32
    %182 = vector.broadcast %cst_100 : f32 to vector<48x1xf32>
    %183 = arith.divf %181, %182 : vector<48x1xf32>
    %184 = vector.broadcast %176 : vector<48x1xf32> to vector<48x32xf32>
    %185 = arith.subf %159, %184 : vector<48x32xf32>
    %cst_101 = arith.constant 9.99999974E-6 : f32
    %186 = vector.broadcast %cst_101 : f32 to vector<48x1xf32>
    %187 = arith.addf %183, %186 : vector<48x1xf32>
    %188 = math.rsqrt %187 : vector<48x1xf32>
    %189 = vector.broadcast %188 : vector<48x1xf32> to vector<48x32xf32>
    %190 = arith.mulf %185, %189 : vector<48x32xf32>
    %191 = vector.broadcast %160 : vector<1x32xf32> to vector<48x32xf32>
    %192 = arith.mulf %190, %191 : vector<48x32xf32>
    %193 = vector.broadcast %161 : vector<1x32xf32> to vector<48x32xf32>
    %194 = arith.addf %192, %193 : vector<48x32xf32>
    %cst_102 = arith.constant dense<0.000000e+00> : vector<48x32xf32>
    %195 = tpu.matmul %194, %162, %cst_102 {dimension_numbers = #tpu.dot_dimension_numbers<[1], [0], [0], [1], [0, 0, 1, 1], [], []>} : vector<48x32xf32>, vector<32x32xf32>, vector<48x32xf32> -> vector<48x32xf32>
    %cst_103 = arith.constant dense<0.000000e+00> : vector<48x32xf32>
    %196 = tpu.matmul %194, %163, %cst_103 {dimension_numbers = #tpu.dot_dimension_numbers<[1], [0], [0], [1], [0, 0, 1, 1], [], []>} : vector<48x32xf32>, vector<32x32xf32>, vector<48x32xf32> -> vector<48x32xf32>
    %cst_104 = arith.constant dense<0.000000e+00> : vector<48x32xf32>
    %197 = tpu.matmul %194, %164, %cst_104 {dimension_numbers = #tpu.dot_dimension_numbers<[1], [0], [0], [1], [0, 0, 1, 1], [], []>} : vector<48x32xf32>, vector<32x32xf32>, vector<48x32xf32> -> vector<48x32xf32>
    %198 = vector.broadcast %14 : vector<1x32xf32> to vector<48x32xf32>
    %199 = arith.mulf %195, %198 : vector<48x32xf32>
    %200 = vector.broadcast %22 : vector<1x32xf32> to vector<48x32xf32>
    %201 = arith.mulf %195, %200 : vector<48x32xf32>
    %202 = vector.broadcast %30 : vector<1x32xf32> to vector<48x32xf32>
    %203 = arith.mulf %195, %202 : vector<48x32xf32>
    %204 = vector.broadcast %38 : vector<1x32xf32> to vector<48x32xf32>
    %205 = arith.mulf %195, %204 : vector<48x32xf32>
    %206 = tpu.concatenate %199, %201, %203, %205 in 0 : vector<48x32xf32>, vector<48x32xf32>, vector<48x32xf32>, vector<48x32xf32> -> vector<192x32xf32>
    "tpu.trace_start"() <{level = 10 : i32, message = "nd,md->nm"}> : () -> ()
    %cst_105 = arith.constant dense<0.000000e+00> : vector<192x48xf32>
    %207 = tpu.matmul %206, %196, %cst_105 {dimension_numbers = #tpu.dot_dimension_numbers<[1], [1], [0], [0], [0, 0, 1, 0], [], []>} : vector<192x32xf32>, vector<48x32xf32>, vector<192x48xf32> -> vector<192x48xf32>
    "tpu.trace_stop"() : () -> ()
    %208 = arith.addf %207, %5 : vector<192x48xf32>
    %cst_106 = arith.constant dense<0xFF800000> : vector<192xf32>
    %209 = vector.multi_reduction <maximumf>, %208, %cst_106 [1] : vector<192x48xf32> to vector<192xf32>
    %210 = vector.shape_cast %209 : vector<192xf32> to vector<192x1xf32>
    %211 = vector.broadcast %210 : vector<192x1xf32> to vector<192x48xf32>
    %212 = arith.subf %208, %211 : vector<192x48xf32>
    %213 = math.exp %212 : vector<192x48xf32>
    %cst_107 = arith.constant dense<0.000000e+00> : vector<192xf32>
    %214 = vector.multi_reduction <add>, %213, %cst_107 [1] : vector<192x48xf32> to vector<192xf32>
    %215 = vector.shape_cast %214 : vector<192xf32> to vector<192x1xf32>
    %216 = tpu.reciprocal %215 {approx = true} : vector<192x1xf32> -> vector<192x1xf32>
    %217 = vector.broadcast %216 : vector<192x1xf32> to vector<192x48xf32>
    %218 = arith.mulf %213, %217 : vector<192x48xf32>
    %cst_108 = arith.constant 0.000000e+00 : f32
    %219 = vector.broadcast %cst_108 : f32 to vector<48x32xf32>
    %220 = vector.extract_strided_slice %218 {offsets = [0, 0], sizes = [48, 48], strides = [1, 1]} : vector<192x48xf32> to vector<48x48xf32>
    %221 = vector.broadcast %14 : vector<1x32xf32> to vector<48x32xf32>
    %222 = arith.mulf %197, %221 : vector<48x32xf32>
    %cst_109 = arith.constant dense<0.000000e+00> : vector<48x32xf32>
    %223 = tpu.matmul %220, %222, %cst_109 {dimension_numbers = #tpu.dot_dimension_numbers<[1], [0], [0], [1], [0, 0, 1, 1], [], []>} : vector<48x48xf32>, vector<48x32xf32>, vector<48x32xf32> -> vector<48x32xf32>
    %224 = arith.addf %219, %223 : vector<48x32xf32>
    %225 = vector.extract_strided_slice %218 {offsets = [48, 0], sizes = [48, 48], strides = [1, 1]} : vector<192x48xf32> to vector<48x48xf32>
    %226 = vector.broadcast %22 : vector<1x32xf32> to vector<48x32xf32>
    %227 = arith.mulf %197, %226 : vector<48x32xf32>
    %cst_110 = arith.constant dense<0.000000e+00> : vector<48x32xf32>
    %228 = tpu.matmul %225, %227, %cst_110 {dimension_numbers = #tpu.dot_dimension_numbers<[1], [0], [0], [1], [0, 0, 1, 1], [], []>} : vector<48x48xf32>, vector<48x32xf32>, vector<48x32xf32> -> vector<48x32xf32>
    %229 = arith.addf %224, %228 : vector<48x32xf32>
    %230 = vector.extract_strided_slice %218 {offsets = [96, 0], sizes = [48, 48], strides = [1, 1]} : vector<192x48xf32> to vector<48x48xf32>
    %231 = vector.broadcast %30 : vector<1x32xf32> to vector<48x32xf32>
    %232 = arith.mulf %197, %231 : vector<48x32xf32>
    %cst_111 = arith.constant dense<0.000000e+00> : vector<48x32xf32>
    %233 = tpu.matmul %230, %232, %cst_111 {dimension_numbers = #tpu.dot_dimension_numbers<[1], [0], [0], [1], [0, 0, 1, 1], [], []>} : vector<48x48xf32>, vector<48x32xf32>, vector<48x32xf32> -> vector<48x32xf32>
    %234 = arith.addf %229, %233 : vector<48x32xf32>
    %235 = vector.extract_strided_slice %218 {offsets = [144, 0], sizes = [48, 48], strides = [1, 1]} : vector<192x48xf32> to vector<48x48xf32>
    %236 = vector.broadcast %38 : vector<1x32xf32> to vector<48x32xf32>
    %237 = arith.mulf %197, %236 : vector<48x32xf32>
    %cst_112 = arith.constant dense<0.000000e+00> : vector<48x32xf32>
    %238 = tpu.matmul %235, %237, %cst_112 {dimension_numbers = #tpu.dot_dimension_numbers<[1], [0], [0], [1], [0, 0, 1, 1], [], []>} : vector<48x48xf32>, vector<48x32xf32>, vector<48x32xf32> -> vector<48x32xf32>
    %239 = arith.addf %234, %238 : vector<48x32xf32>
    %cst_113 = arith.constant dense<0.000000e+00> : vector<48x32xf32>
    %240 = tpu.matmul %239, %165, %cst_113 {dimension_numbers = #tpu.dot_dimension_numbers<[1], [0], [0], [1], [0, 0, 1, 1], [], []>} : vector<48x32xf32>, vector<32x32xf32>, vector<48x32xf32> -> vector<48x32xf32>
    %241 = vector.broadcast %166 : vector<1x32xf32> to vector<48x32xf32>
    %242 = arith.addf %240, %241 : vector<48x32xf32>
    %243 = arith.addf %159, %242 : vector<48x32xf32>
    %cst_114 = arith.constant dense<0.000000e+00> : vector<48xf32>
    %244 = vector.multi_reduction <add>, %243, %cst_114 [1] : vector<48x32xf32> to vector<48xf32>
    %245 = vector.shape_cast %244 : vector<48xf32> to vector<48x1xf32>
    %cst_115 = arith.constant 3.200000e+01 : f32
    %246 = vector.broadcast %cst_115 : f32 to vector<48x1xf32>
    %247 = arith.divf %245, %246 : vector<48x1xf32>
    %248 = vector.broadcast %247 : vector<48x1xf32> to vector<48x32xf32>
    %249 = arith.subf %243, %248 : vector<48x32xf32>
    %250 = arith.mulf %249, %249 : vector<48x32xf32>
    %cst_116 = arith.constant dense<0.000000e+00> : vector<48xf32>
    %251 = vector.multi_reduction <add>, %250, %cst_116 [1] : vector<48x32xf32> to vector<48xf32>
    %252 = vector.shape_cast %251 : vector<48xf32> to vector<48x1xf32>
    %cst_117 = arith.constant 3.200000e+01 : f32
    %253 = vector.broadcast %cst_117 : f32 to vector<48x1xf32>
    %254 = arith.divf %252, %253 : vector<48x1xf32>
    %255 = vector.broadcast %247 : vector<48x1xf32> to vector<48x32xf32>
    %256 = arith.subf %243, %255 : vector<48x32xf32>
    %cst_118 = arith.constant 9.99999974E-6 : f32
    %257 = vector.broadcast %cst_118 : f32 to vector<48x1xf32>
    %258 = arith.addf %254, %257 : vector<48x1xf32>
    %259 = math.rsqrt %258 : vector<48x1xf32>
    %260 = vector.broadcast %259 : vector<48x1xf32> to vector<48x32xf32>
    %261 = arith.mulf %256, %260 : vector<48x32xf32>
    %262 = vector.broadcast %167 : vector<1x32xf32> to vector<48x32xf32>
    %263 = arith.mulf %261, %262 : vector<48x32xf32>
    %264 = vector.broadcast %168 : vector<1x32xf32> to vector<48x32xf32>
    %265 = arith.addf %263, %264 : vector<48x32xf32>
    %cst_119 = arith.constant dense<0.000000e+00> : vector<48x128xf32>
    %266 = tpu.matmul %265, %169, %cst_119 {dimension_numbers = #tpu.dot_dimension_numbers<[1], [0], [0], [1], [0, 0, 1, 1], [], []>} : vector<48x32xf32>, vector<32x128xf32>, vector<48x128xf32> -> vector<48x128xf32>
    %267 = vector.broadcast %170 : vector<1x128xf32> to vector<48x128xf32>
    %268 = arith.addf %266, %267 : vector<48x128xf32>
    %cst_120 = arith.constant 5.000000e-01 : f32
    %269 = vector.broadcast %cst_120 : f32 to vector<48x128xf32>
    %270 = arith.mulf %269, %268 : vector<48x128xf32>
    %cst_121 = arith.constant 0.707106769 : f32
    %271 = vector.broadcast %cst_121 : f32 to vector<48x128xf32>
    %272 = arith.mulf %268, %271 : vector<48x128xf32>
    %273 = math.erf %272 : vector<48x128xf32>
    %cst_122 = arith.constant 1.000000e+00 : f32
    %274 = vector.broadcast %cst_122 : f32 to vector<48x128xf32>
    %275 = arith.addf %274, %273 : vector<48x128xf32>
    %276 = arith.mulf %270, %275 : vector<48x128xf32>
    %cst_123 = arith.constant dense<0.000000e+00> : vector<48x32xf32>
    %277 = tpu.matmul %276, %171, %cst_123 {dimension_numbers = #tpu.dot_dimension_numbers<[1], [0], [0], [1], [0, 0, 1, 1], [], []>} : vector<48x128xf32>, vector<128x32xf32>, vector<48x32xf32> -> vector<48x32xf32>
    %278 = vector.broadcast %172 : vector<1x32xf32> to vector<48x32xf32>
    %279 = arith.addf %277, %278 : vector<48x32xf32>
    %280 = arith.addf %243, %279 : vector<48x32xf32>
    %c0_124 = arith.constant 0 : index
    %c0_125 = arith.constant 0 : index
    %281 = vector.load %arg4[%c0_124, %c0_125] : memref<2x48xf32, #tpu.memory_space<vmem>>, vector<2x48xf32>
    %cst_126 = arith.constant dense<0.000000e+00> : vector<2x32xf32>
    %282 = tpu.matmul %281, %280, %cst_126 {dimension_numbers = #tpu.dot_dimension_numbers<[1], [0], [0], [1], [0, 0, 1, 1], [], []>} : vector<2x48xf32>, vector<48x32xf32>, vector<2x32xf32> -> vector<2x32xf32>
    %c0_127 = arith.constant 0 : index
    %c0_128 = arith.constant 0 : index
    %283 = vector.load %arg31[%c0_127, %c0_128] : memref<1x32xf32, #tpu.memory_space<vmem>>, vector<1x32xf32>
    %c0_129 = arith.constant 0 : index
    %c0_130 = arith.constant 0 : index
    %284 = vector.load %arg32[%c0_129, %c0_130] : memref<1x32xf32, #tpu.memory_space<vmem>>, vector<1x32xf32>
    %cst_131 = arith.constant dense<0.000000e+00> : vector<2xf32>
    %285 = vector.multi_reduction <add>, %282, %cst_131 [1] : vector<2x32xf32> to vector<2xf32>
    %286 = vector.shape_cast %285 : vector<2xf32> to vector<2x1xf32>
    %cst_132 = arith.constant 3.200000e+01 : f32
    %287 = vector.broadcast %cst_132 : f32 to vector<2x1xf32>
    %288 = arith.divf %286, %287 : vector<2x1xf32>
    %289 = vector.broadcast %288 : vector<2x1xf32> to vector<2x32xf32>
    %290 = arith.subf %282, %289 : vector<2x32xf32>
    %291 = arith.mulf %290, %290 : vector<2x32xf32>
    %cst_133 = arith.constant dense<0.000000e+00> : vector<2xf32>
    %292 = vector.multi_reduction <add>, %291, %cst_133 [1] : vector<2x32xf32> to vector<2xf32>
    %293 = vector.shape_cast %292 : vector<2xf32> to vector<2x1xf32>
    %cst_134 = arith.constant 3.200000e+01 : f32
    %294 = vector.broadcast %cst_134 : f32 to vector<2x1xf32>
    %295 = arith.divf %293, %294 : vector<2x1xf32>
    %296 = vector.broadcast %288 : vector<2x1xf32> to vector<2x32xf32>
    %297 = arith.subf %282, %296 : vector<2x32xf32>
    %cst_135 = arith.constant 9.99999974E-6 : f32
    %298 = vector.broadcast %cst_135 : f32 to vector<2x1xf32>
    %299 = arith.addf %295, %298 : vector<2x1xf32>
    %300 = math.rsqrt %299 : vector<2x1xf32>
    %301 = vector.broadcast %300 : vector<2x1xf32> to vector<2x32xf32>
    %302 = arith.mulf %297, %301 : vector<2x32xf32>
    %303 = vector.broadcast %283 : vector<1x32xf32> to vector<2x32xf32>
    %304 = arith.mulf %302, %303 : vector<2x32xf32>
    %305 = vector.broadcast %284 : vector<1x32xf32> to vector<2x32xf32>
    %306 = arith.addf %304, %305 : vector<2x32xf32>
    %c0_136 = arith.constant 0 : index
    %c0_137 = arith.constant 0 : index
    %307 = vector.load %arg33[%c0_136, %c0_137] : memref<32x10xf32, #tpu.memory_space<vmem>>, vector<32x10xf32>
    %cst_138 = arith.constant dense<0.000000e+00> : vector<2x10xf32>
    %308 = tpu.matmul %306, %307, %cst_138 {dimension_numbers = #tpu.dot_dimension_numbers<[1], [0], [0], [1], [0, 0, 1, 1], [], []>} : vector<2x32xf32>, vector<32x10xf32>, vector<2x10xf32> -> vector<2x10xf32>
    %c0_139 = arith.constant 0 : index
    %c0_140 = arith.constant 0 : index
    %309 = vector.load %arg34[%c0_139, %c0_140] : memref<1x10xf32, #tpu.memory_space<vmem>>, vector<1x10xf32>
    %310 = vector.broadcast %309 : vector<1x10xf32> to vector<2x10xf32>
    %311 = arith.addf %308, %310 : vector<2x10xf32>
    %c0_141 = arith.constant 0 : index
    %c0_142 = arith.constant 0 : index
    %312 = vector.load %arg35[%c0_141, %c0_142] : memref<2x10xf32, #tpu.memory_space<vmem>>, vector<2x10xf32>
    tpu.vector_store %arg35[%c0_141, %c0_142], %311 {strides = array<i32>} : memref<2x10xf32, #tpu.memory_space<vmem>>, vector<2x10xf32>,
    return
  }
}

</mosaic_0001>

<bundles_post_ra>
// kernel: vit_forward.1
= control target key start
LH: loop header
LB: loop body
LE: loop exit
PB: predicated region body
PF: predicated region fallthrough
CT: control target
= control target key end

     0   :  { %s6298_s6 = smov 1   ;;  %s6299_s10 = smov 2   ;;  %s7904_s0 = inlined_call_operand.smem [shape: u32[36], index: -1, kind: input, shape index: {}] }
   0x1   :  { %s6345_s5 = sld [smem:[%s7904_s0]]   ;;  %s6300_s14 = smov 3  }
   0x2   :  { %s6350_s9 = sld [smem:[%s7904_s0 + %s6298_s6]]   ;;  %s6301_s18 = smov 4  }
   0x3   :  { %s6355_s13 = sld [smem:[%s7904_s0 + %s6299_s10]]   ;;  %s6302_s22 = smov 5  }
   0x4   :  { %s6360_s17 = sld [smem:[%s7904_s0 + %s6300_s14]]   ;;  %s6303_s26 = smov 6  }
   0x5   :  { %s6365_s21 = sld [smem:[%s7904_s0 + %s6301_s18]]   ;;  %s6304_s30 = smov 7  }
   0x6   :  { %s6370_s25 = sld [smem:[%s7904_s0 + %s6302_s22]]   ;;  %s6305_s4 = smov 8  }
   0x7   :  { %s6375_s29 = sld [smem:[%s7904_s0 + %s6303_s26]]   ;;  %s6306_s10 = smov 9  }
   0x8   :  { %s6380_s3 = sld [smem:[%s7904_s0 + %s6304_s30]]   ;;  %s6307_s15 = smov 10  }
   0x9   :  { %s6385_s8 = sld [smem:[%s7904_s0 + %s6305_s4]]   ;;  %s6308_s20 = smov 11  }
   0xa   :  { %s6390_s14 = sld [smem:[%s7904_s0 + %s6306_s10]]   ;;  %s6309_s26 = smov 12  }
   0xb   :  { %7911 = sst [smem:[#allocation5_spill]] %s6365_s21  ;;  %s6310_s1 = smov 13  }
   0xc   :  { %s6395_s19 = sld [smem:[%s7904_s0 + %s6307_s15]]   ;;  %s6311_s7 = smov 14  }
   0xd   :  { %s6400_s24 = sld [smem:[%s7904_s0 + %s6308_s20]]   ;;  %s6312_s15 = smov 15  }
   0xe   :  { %s6405_s30 = sld [smem:[%s7904_s0 + %s6309_s26]]   ;;  %s6313_s22 = smov 16  }
   0xf   :  { %s6410_s6 = sld [smem:[%s7904_s0 + %s6310_s1]]   ;;  %s6314_s28 = smov 17  }
  0x10   :  { %s6415_s12 = sld [smem:[%s7904_s0 + %s6311_s7]]   ;;  %s6315_s7 = smov 18  }
  0x11   :  { %s6420_s20 = sld [smem:[%s7904_s0 + %s6312_s15]]   ;;  %s6316_s15 = smov 19  }
  0x12   :  { %s6425_s27 = sld [smem:[%s7904_s0 + %s6313_s22]]   ;;  %s6317_s22 = smov 20  }
  0x13   :  { %s6430_s4 = sld [smem:[%s7904_s0 + %s6314_s28]]   ;;  %s6318_s28 = smov 21  }
  0x14   :  { %s6435_s21 = sld [smem:[%s7904_s0 + %s6315_s7]]   ;;  %s6319_s7 = smov 22  }
  0x15   :  { %7912 = sst [smem:[#allocation6_spill]] %s6410_s6 }
  0x16   :  { %s6445_s6 = sld [smem:[%s7904_s0 + %s6317_s22]]   ;;  %s6321_s22 = smov 24  }
  0x17   :  { %7913 = sst [smem:[#allocation7_spill]] %s6420_s20 }
  0x18   :  { %s6440_s20 = sld [smem:[%s7904_s0 + %s6316_s15]]   ;;  %s6320_s15 = smov 23  }
  0x19   :  { %7914 = sst [smem:[#allocation8_spill]] %s6430_s4 }
  0x1a   :  { %7915 = sst [smem:[#allocation9_spill]] %s6435_s21 }
  0x1b   :  { %s6450_s4 = sld [smem:[%s7904_s0 + %s6318_s28]]   ;;  %s6322_s28 = smov 25  }
  0x1c   :  { %7917 = sst [smem:[#allocation11_spill]] %s6445_s6 }
  0x1d   :  { %s6455_s21 = sld [smem:[%s7904_s0 + %s6319_s7]]   ;;  %s6323_s7 = smov 26  }
  0x1e   :  { %7916 = sst [smem:[#allocation10_spill]] %s6440_s20 }
  0x1f   :  { %s6460_s20 = sld [smem:[%s7904_s0 + %s6320_s15]]   ;;  %s6324_s15 = smov 27  }
  0x20   :  { %s6465_s6 = sld [smem:[%s7904_s0 + %s6321_s22]]   ;;  %s6325_s22 = smov 28  }
  0x21   :  { %7918 = sst [smem:[#allocation12_spill]] %s6450_s4 }
  0x22   :  { %s6470_s4 = sld [smem:[%s7904_s0 + %s6322_s28]]   ;;  %s6326_s28 = smov 29  }
  0x23   :  { %7919 = sst [smem:[#allocation13_spill]] %s6455_s21 }
  0x24   :  { %s6475_s21 = sld [smem:[%s7904_s0 + %s6323_s7]]   ;;  %s6327_s7 = smov 30  }
  0x25   :  { %7920 = sst [smem:[#allocation14_spill]] %s6460_s20 }
  0x26   :  { %7921 = sst [smem:[#allocation15_spill]] %s6465_s6 }
  0x27   :  { %s6480_s20 = sld [smem:[%s7904_s0 + %s6324_s15]]   ;;  %s6328_s15 = smov 31  }
  0x28   :  { %7922 = sst [smem:[#allocation16_spill]] %s6470_s4 }
  0x29   :  { %s6485_s6 = sld [smem:[%s7904_s0 + %s6325_s22]]   ;;  %s6329_s22 = smov 32  }
  0x2a   :  { %7923 = sst [smem:[#allocation17_spill]] %s6475_s21 }
  0x2b   :  { %s6490_s4 = sld [smem:[%s7904_s0 + %s6326_s28]]   ;;  %s6330_s28 = smov 33  }
  0x2c   :  { %s6495_s21 = sld [smem:[%s7904_s0 + %s6327_s7]]   ;;  %s6331_s7 = smov 34  }
  0x2d   :  { %7924 = sst [smem:[#allocation18_spill]] %s6480_s20 }
  0x2e   :  { %s6500_s20 = sld [smem:[%s7904_s0 + %s6328_s15]]   ;;  %s6332_s15 = smov 35  }
  0x2f   :  { %7925 = sst [smem:[#allocation19_spill]] %s6485_s6 }
  0x30   :  { %s6505_s6 = sld [smem:[%s7904_s0 + %s6329_s22]]  }
  0x31   :  { %7926 = sst [smem:[#allocation20_spill]] %s6490_s4 }
  0x32   :  { %7927 = sst [smem:[#allocation21_spill]] %s6495_s21 }
  0x33   :  { %s6510_s4 = sld [smem:[%s7904_s0 + %s6330_s28]]  }
  0x34   :  { %7928 = sst [smem:[#allocation22_spill]] %s6500_s20 }
  0x35   :  { %s6515_s21 = sld [smem:[%s7904_s0 + %s6331_s7]]  }
  0x36   :  { %s6520_s20 = sld [smem:[%s7904_s0 + %s6332_s15]]  }
  0x37   :  { %v153_v0 = vld [vmem:[%s6350_s9] sm:$0xff]  ;;  %v154_v1 = vld [vmem:[%s6350_s9 + $0x8] sm:$0xff]  ;;  %v155_v2 = vld [vmem:[%s6350_s9 + $0x10] sm:$0xff]  ;;  %vm165_vm0 = vcmask 392192  }
  0x38   :  { %v5606_v3 = vpack.c.bf16 %v154_v1, %v153_v0  ;;  %v156_v4 = vld [vmem:[%s6350_s9 + $0x18] sm:$0xff]  ;;  %v157_v6 = vld [vmem:[%s6350_s9 + $0x20] sm:$0xff]  ;;  %v158_v7 = vld [vmem:[%s6350_s9 + $0x28] sm:$0xff] }
  0x39   :  { %v5610_v5 = vpack.c.bf16 %v156_v4, %v155_v2  ;;  %v147_v8 = vld [vmem:[%s6345_s5] sm:$0xff] }
  0x3a   :  { %5607 = vmatprep.subr.bf16.mxu0 %v5606_v3  ;;  %5055 = vmatprep.mubr.msk.f32.mxu0 %vm165_vm0, %v147_v8 }
  0x3b   :  { %5609 = vmatpush3.bf16.msra.mxu0 %v5606_v3 }
  0x3c   :  { %76 = vsyncpa [#allocation3], 0  ;;  %5611 = vmatprep.subr.bf16.mxu0 %v5610_v5  ;;  %v5614_v9 = vpack.c.bf16 %v158_v7, %v157_v6  ;;  %v148_v10 = vld [vmem:[%s6345_s5 + $0x8] sm:$0xff]  ;;  %v149_v11 = vld [vmem:[%s6345_s5 + $0x10] sm:$0xff]  ;;  %vm364_vm1 = vcmask 261120   ;;  %s7931_s0 = sld [smem:[#allocation6_spill]] }
  0x3d   :  { %v150_v12 = vld [vmem:[%s6345_s5 + $0x18] sm:$0xff]  ;;  %v151_v13 = vld [vmem:[%s6345_s5 + $0x20] sm:$0xff]  ;;  %v152_v14 = vld [vmem:[%s6345_s5 + $0x28] sm:$0xff]  ;;  %s7932_s5 = sld [smem:[#allocation7_spill]]  ;;  %s7933_s9 = sld [smem:[#allocation8_spill]]  ;;  %vm6335_vm13 = vmmov 0  }
  0x3e   :  { %v159_v15 = vld [vmem:[%s6355_s13] sm:$0xff]  ;;  %v160_v17 = vld [vmem:[%s6355_s13 + $0x8] sm:$0xff]  ;;  %v161_v20 = vld [vmem:[%s6355_s13 + $0x10] sm:$0xff]  ;;  %s7946_s22 = sld [smem:[#allocation21_spill]]  ;;  %vm4363_vm14 = vcmask 254976   ;;  %s7948_s26 = sld [smem:[#allocation22_spill]] }
  0x3f   :  { %5613 = vmatpush3.bf16.msra.mxu0 %v5610_v5  ;;  %v162_v24 = vld [vmem:[%s6355_s13 + $0x18] sm:$0xff]  ;;  %v163_v27 = vld [vmem:[%s6355_s13 + $0x20] sm:$0xff]  ;;  %v164_v32 = vld [vmem:[%s6355_s13 + $0x28] sm:$0xff]  ;;  %s7934_s13 = sld [smem:[#allocation11_spill]]  ;;  %s7947_s23 = sld [smem:[#allocation5_spill]]  ;;  %vm4475_vm15 = vcmask 74752  }
  0x40   :  { %5615 = vmatprep.subr.bf16.mxu0 %v5614_v9  ;;  %v323_v5 = vld [vmem:[%s6380_s3] sm:$0xff]  ;;  %v324_v6 = vld [vmem:[%s6380_s3 + $0x8] sm:$0xff]  ;;  %v325_v8 = vld [vmem:[%s6380_s3 + $0x10] sm:$0xff]  ;;  %s6336_s28 = smov [#allocation2]  }
  0x41   :  { %v5618_v7 = vpack.c.bf16 %v324_v6, %v323_v5  ;;  %vm6664_vm3 = vmpackc.low %vm364_vm1, %vm364_vm1 }
  0x43   :  { %5617 = vmatpush3.bf16.msra.mxu0 %v5614_v9  ;;  %v326_v9 = vld [vmem:[%s6380_s3 + $0x18] sm:$0xff]  ;;  %5619 = vmatprep.subr.bf16.mxu1 %v5618_v7  ;;  %s7937_s3 = sld [smem:[#allocation9_spill]] }
  0x44   :  { %5621 = vmatpush3.bf16.msra.mxu1 %v5618_v7  ;;  %v333_v7 = vld [vmem:[%s6390_s14 + $0x10] sm:$0xff] }
  0x46   :  { %5056 = vmatmul.mubr.msk.f32.vlgmr.msra.gmra.mrb[0].mxu0 %vm165_vm0, %v148_v10  ;;  %v5622_v10 = vpack.c.bf16 %v326_v9, %v325_v8  ;;  %v334_v8 = vld [vmem:[%s6390_s14 + $0x18] sm:$0xff] }
  0x47   :  { %5058 = vmatprep.mubr.msk.f32.mxu0 %vm165_vm0, %v149_v11  ;;  %v327_v11 = vld [vmem:[%s6385_s8] sm:$0xff]  ;;  %v5638_v9 = vpack.c.bf16 %v334_v8, %v333_v7 }
  0x48   :  { %5623 = vmatprep.subr.bf16.mxu1 %v5622_v10 }
  0x49   :  { %5625 = vmatpush3.bf16.msra.mxu1 %v5622_v10 }
  0x4a   :  { %5059 = vmatmul.mubr.msk.f32.gmra.mrb[2].mxu0 %vm165_vm0, %v150_v12  ;;  %v328_v12 = vld [vmem:[%s6385_s8 + $0x8] sm:$0xff] }
  0x4b   :  { %5061 = vmatprep.mubr.msk.f32.mxu0 %vm165_vm0, %v151_v13  ;;  %v5626_v13 = vpack.c.bf16 %v328_v12, %v327_v11  ;;  %v6333_v11 = vmov 0.0  }
  0x4d   :  { %5627 = vmatprep.subr.bf16.mxu1 %v5626_v13 }
  0x4e   :  { %5062 = vmatmul.mubr.msk.f32.gmra.mrb[4].mxu0 %vm165_vm0, %v152_v14 }
 0x119   :  { %v5057_v16 = vpop.f32.mrb[0].mxu0 }
 0x11a   :  { %v250_v18 = vpop.f32.mrb[1].mxu0  ;;  %v6545_v21 = vadd.f32 %v5057_v16, %v160_v17 }
 0x11b   :  { %v6542_v19 = vadd.f32 %v250_v18, %v159_v15 }
 0x11c   :  { %v368_v31 = vsel %vm364_vm1, %v6545_v21, 0.0 }
 0x11d   :  { %v5060_v22 = vpop.f32.mrb[2].mxu0  ;;  %v365_v23 = vsel %vm364_vm1, %v6542_v19, 0.0 }
 0x11e   :  { %v260_v25 = vpop.f32.mrb[3].mxu0  ;;  %366 = vadd.xlane.f32.xlu0 %v365_v23  ;;  %v6553_v28 = vadd.f32 %v5060_v22, %v162_v24 }
 0x11f   :  { %v6550_v26 = vadd.f32 %v260_v25, %v161_v20 }
 0x120   :  { %v374_v36 = vsel %vm364_vm1, %v6553_v28, 0.0 }
 0x121   :  { %v5063_v29 = vpop.f32.mrb[4].mxu0  ;;  %v371_v30 = vsel %vm364_vm1, %v6550_v26, 0.0 }
 0x122   :  { %v270_v33 = vpop.f32.mrb[5].mxu0  ;;  %372 = vadd.xlane.f32.xlu1 %v371_v30  ;;  %369 = vadd.xlane.f32.xlu0 %v368_v31  ;;  %v6562_v35 = vadd.f32 %v5063_v29, %v164_v32 }
 0x123   :  { %v6560_v34 = vadd.f32 %v270_v33, %v163_v27 }
 0x124   :  { %v380_v38 = vsel %vm364_vm1, %v6562_v35, 0.0 }
 0x125   :  { %v377_v37 = vsel %vm364_vm1, %v6560_v34, 0.0 }
 0x126   :  { %375 = vadd.xlane.f32.xlu1 %v374_v36  ;;  %378 = vadd.xlane.f32.xlu0 %v377_v37 }
 0x12a   :  { %381 = vadd.xlane.f32.xlu1 %v380_v38 }
 0x1ab   :  { %v367_v39 = vpop.xlane.xlu0 %366 }
 0x1ac   :  { %v384_v40 = vmul.f32 0.03125, %v367_v39  ;;  %v4532_v39 = vld [vmem:[%s6370_s25] ss:$0 sm:$0xff]  ;;  %s7935_s25 = sld [smem:[#allocation13_spill]] }
 0x1ae   :  { %v6571_v41 = vsub.f32 %v6542_v19, %v384_v40 }
 0x1af   :  { %v373_v42 = vpop.xlane.xlu1 %372  ;;  %v370_v43 = vpop.xlane.xlu0 %369 }
 0x1b0   :  { %v386_v44 = vmul.f32 0.03125, %v373_v42  ;;  %v385_v45 = vmul.f32 0.03125, %v370_v43  ;;  %v396_v46 = vmul.f32 %v6571_v41, %v6571_v41  ;;  %v4533_v42 = vld [vmem:[%s6375_s29] ss:$0 sm:$0xff]  ;;  %s7936_s29 = sld [smem:[#allocation12_spill]] }
 0x1b2   :  { %v6576_v47 = vsub.f32 %v6550_v26, %v386_v44  ;;  %v6579_v48 = vsub.f32 %v6545_v21, %v385_v45  ;;  %v402_v49 = vsel %vm364_vm1, %v396_v46, 0.0 }
 0x1b3   :  { %v376_v50 = vpop.xlane.xlu1 %375  ;;  %403 = vadd.xlane.f32.xlu0 %v402_v49  ;;  %v379_v51 = vpop.xlane.xlu0 %378 }
 0x1b4   :  { %v387_v52 = vmul.f32 0.03125, %v376_v50  ;;  %v388_v53 = vmul.f32 0.03125, %v379_v51  ;;  %v398_v54 = vmul.f32 %v6576_v47, %v6576_v47  ;;  %v397_v55 = vmul.f32 %v6579_v48, %v6579_v48  ;;  %v329_v51 = vld [vmem:[%s6385_s8 + $0x10] sm:$0xff] }
 0x1b6   :  { %v6587_v56 = vsub.f32 %v6553_v28, %v387_v52  ;;  %v6590_v57 = vsub.f32 %v6560_v34, %v388_v53  ;;  %v408_v58 = vsel %vm364_vm1, %v398_v54, 0.0  ;;  %v405_v59 = vsel %vm364_vm1, %v397_v55, 0.0  ;;  %v330_v52 = vld [vmem:[%s6385_s8 + $0x18] sm:$0xff]  ;;  %s7938_s8 = sld [smem:[#allocation10_spill]] }
 0x1b7   :  { %v382_v60 = vpop.xlane.xlu1 %381  ;;  %409 = vadd.xlane.f32.xlu0 %v408_v58  ;;  %406 = vadd.xlane.f32.xlu1 %v405_v59 }
 0x1b8   :  { %v389_v61 = vmul.f32 0.03125, %v382_v60  ;;  %v399_v62 = vmul.f32 %v6587_v56, %v6587_v56  ;;  %v400_v63 = vmul.f32 %v6590_v57, %v6590_v57  ;;  %v5630_v60 = vpack.c.bf16 %v330_v52, %v329_v51 }
 0x1ba   :  { %v6599_v0 = vsub.f32 %v6562_v35, %v389_v61  ;;  %v411_v1 = vsel %vm364_vm1, %v399_v62, 0.0  ;;  %v414_v2 = vsel %vm364_vm1, %v400_v63, 0.0  ;;  %v331_v63 = vld [vmem:[%s6390_s14] sm:$0xff] }
 0x1bb   :  { %412 = vadd.xlane.f32.xlu1 %v411_v1  ;;  %415 = vadd.xlane.f32.xlu0 %v414_v2  ;;  %v332_v1 = vld [vmem:[%s6390_s14 + $0x8] sm:$0xff]  ;;  %s7940_s14 = sld [smem:[#allocation15_spill]] }
 0x1bc   :  { %v401_v3 = vmul.f32 %v6599_v0, %v6599_v0 }
 0x1be   :  { %v417_v4 = vsel %vm364_vm1, %v401_v3, 0.0 }
 0x1bf   :  { %418 = vadd.xlane.f32.xlu1 %v417_v4  ;;  %v5634_v4 = vpack.c.bf16 %v332_v1, %v331_v63 }
 0x240   :  { %v404_v14 = vpop.xlane.xlu0 %403 }
 0x241   :  { %v420_v15 = vmul.f32 0.03125, %v404_v14 }
 0x243   :  { %v426_v16 = vadd.f32 1e-05, %v420_v15 }
 0x244   :  { %v407_v17 = vpop.xlane.xlu1 %406  ;;  %v410_v18 = vpop.xlane.xlu0 %409 }
 0x245   :  { %5984 = vrsqrt.f32 %v426_v16  ;;  %v421_v20 = vmul.f32 0.03125, %v407_v17  ;;  %v422_v22 = vmul.f32 0.03125, %v410_v18 }
 0x247   :  { %v427_v23 = vadd.f32 1e-05, %v421_v20  ;;  %v428_v24 = vadd.f32 1e-05, %v422_v22 }
 0x248   :  { %v413_v25 = vpop.xlane.xlu1 %412  ;;  %v416_v27 = vpop.xlane.xlu0 %415 }
 0x249   :  { %5986 = vrsqrt.f32 %v427_v23  ;;  %v423_v29 = vmul.f32 0.03125, %v413_v25  ;;  %v424_v30 = vmul.f32 0.03125, %v416_v27 }
 0x24a   :  { %5988 = vrsqrt.f32 %v428_v24 }
 0x24b   :  { %v429_v31 = vadd.f32 1e-05, %v423_v29  ;;  %v430_v32 = vadd.f32 1e-05, %v424_v30 }
 0x24c   :  { %v419_v33 = vpop.xlane.xlu1 %418 }
 0x24d   :  { %5990 = vrsqrt.f32 %v429_v31  ;;  %v425_v36 = vmul.f32 0.03125, %v419_v33 }
 0x24e   :  { %5992 = vrsqrt.f32 %v430_v32 }
 0x24f   :  { %v5985_v37 = vpop.eup %5984  ;;  %v431_v38 = vadd.f32 1e-05, %v425_v36 }
 0x250   :  { %v438_v40 = vmul.f32 %v5985_v37, %v6571_v41 }
 0x251   :  { %5994 = vrsqrt.f32 %v431_v38 }
 0x252   :  { %v450_v43 = vmul.f32 %v4532_v39, %v438_v40 }
 0x253   :  { %v5987_v44 = vpop.eup %5986 }
 0x254   :  { %v5989_v45 = vpop.eup %5988  ;;  %v462_v46 = vadd.f32 %v4533_v42, %v450_v43  ;;  %v439_v49 = vmul.f32 %v5987_v44, %v6579_v48 }
 0x255   :  { %v440_v50 = vmul.f32 %v5989_v45, %v6576_v47 }
 0x256   :  { %5072 = vmatprep.mubr.msk.f32.mxu1 %vm364_vm1, %v462_v46  ;;  %v451_v53 = vmul.f32 %v4532_v39, %v439_v49 }
 0x257   :  { %v5991_v54 = vpop.eup %5990  ;;  %v452_v55 = vmul.f32 %v4532_v39, %v440_v50 }
 0x258   :  { %v5993_v41 = vpop.eup %5992  ;;  %v463_v58 = vadd.f32 %v4533_v42, %v451_v53  ;;  %v441_v59 = vmul.f32 %v5991_v54, %v6587_v56 }
 0x259   :  { %v464_v61 = vadd.f32 %v4533_v42, %v452_v55  ;;  %v442_v62 = vmul.f32 %v5993_v41, %v6590_v57 }
 0x25a   :  { %5073 = vmatmul.mubr.msk.f32.vlgmr.msra.gmra.mrb[0].mxu1 %vm364_vm1, %v463_v58  ;;  %v453_v47 = vmul.f32 %v4532_v39, %v441_v59 }
 0x25b   :  { %v5995_v48 = vpop.eup %5994  ;;  %5075 = vmatprep.mubr.msk.f32.mxu1 %vm364_vm1, %v464_v61  ;;  %5629 = vmatpush3.bf16.msra.mxu1 %v5626_v13  ;;  %v454_v2 = vmul.f32 %v4532_v39, %v442_v62 }
 0x25c   :  { %v465_v3 = vadd.f32 %v4533_v42, %v453_v47  ;;  %5631 = vmatprep.subr.bf16.mxu1 %v5630_v60  ;;  %v443_v56 = vmul.f32 %v5995_v48, %v6599_v0  ;;  %v303_v0 = vlaneseq }
 0x25d   :  { %v466_v5 = vadd.f32 %v4533_v42, %v454_v2 }
 0x25e   :  { %5076 = vmatmul.mubr.msk.f32.gmra.mrb[2].mxu1 %vm364_vm1, %v465_v3  ;;  %v455_v57 = vmul.f32 %v4532_v39, %v443_v56  ;;  %v304_v10 = vand.u32 127, %v303_v0 }
 0x25f   :  { %5078 = vmatprep.mubr.msk.f32.mxu1 %vm364_vm1, %v466_v5  ;;  %5633 = vmatpush3.bf16.msra.mxu1 %v5630_v60 }
 0x260   :  { %v467_v6 = vadd.f32 %v4533_v42, %v455_v57  ;;  %5635 = vmatprep.subr.bf16.mxu1 %v5634_v4  ;;  %vm306_vm2 = vcmp.lt.s32.totalorder %v304_v10, 8  ;;  %vm309_vm4 = vcmp.ge.s32.totalorder %v304_v10, 8  ;;  %vm310_vm5 = vcmp.lt.s32.totalorder %v304_v10, 16 }
 0x261   :  { %v6645_v12 = vsel %vm306_vm2, 1.0, %v6333_v11  ;;  %vm313_vm6 = vcmp.ge.s32.totalorder %v304_v10, 16  ;;  %vm314_vm7 = vcmp.lt.s32.totalorder %v304_v10, 24  ;;  %vm317_vm8 = vcmp.ge.s32.totalorder %v304_v10, 24  ;;  %vm311_vm10 = vmand %vm309_vm4, %vm310_vm5 }
 0x262   :  { %5079 = vmatmul.mubr.msk.f32.gmra.mrb[4].mxu1 %vm364_vm1, %v467_v6  ;;  %vm318_vm9 = vcmp.lt.s32.totalorder %v304_v10, 32  ;;  %vm315_vm11 = vmand %vm313_vm6, %vm314_vm7  ;;  %v6675_v36 = vsel %vm311_vm10, 1.0, %v6333_v11 }
 0x263   :  { %5089 = vmatprep.mubr.msk.f32.mxu1 %vm364_vm1, %v462_v46  ;;  %vm319_vm12 = vmand %vm317_vm8, %vm318_vm9  ;;  %v6678_v37 = vsel %vm315_vm11, 1.0, %v6333_v11 }
 0x264   :  { %v6681_v38 = vsel %vm319_vm12, 1.0, %v6333_v11 }
 0x266   :  { %5090 = vmatmul.mubr.msk.f32.vlgmr.msra.gmra.mrb[6].mxu1 %vm364_vm1, %v463_v58 }
 0x267   :  { %5092 = vmatprep.mubr.msk.f32.mxu1 %vm364_vm1, %v464_v61  ;;  %5637 = vmatpush3.bf16.msra.mxu1 %v5634_v4 }
 0x268   :  { %5639 = vmatprep.subr.bf16.mxu1 %v5638_v9 }
 0x26a   :  { %5093 = vmatmul.mubr.msk.f32.gmra.mrb[8].mxu1 %vm364_vm1, %v465_v3 }
 0x26b   :  { %5095 = vmatprep.mubr.msk.f32.mxu1 %vm364_vm1, %v466_v5  ;;  %5641 = vmatpush3.bf16.msra.mxu1 %v5638_v9 }
 0x26e   :  { %5096 = vmatmul.mubr.msk.f32.gmra.mrb[10].mxu1 %vm364_vm1, %v467_v6 }
 0x26f   :  { %5106 = vmatprep.mubr.msk.f32.mxu1 %vm364_vm1, %v462_v46 }
 0x272   :  { %5107 = vmatmul.mubr.msk.f32.vlgmr.msra.gmra.mrb[12].mxu1 %vm364_vm1, %v463_v58 }
 0x273   :  { %5109 = vmatprep.mubr.msk.f32.mxu1 %vm364_vm1, %v464_v61 }
 0x276   :  { %5110 = vmatmul.mubr.msk.f32.gmra.mrb[14].mxu1 %vm364_vm1, %v465_v3 }
 0x277   :  { %5112 = vmatprep.mubr.msk.f32.mxu1 %vm364_vm1, %v466_v5 }
 0x27a   :  { %5113 = vmatmul.mubr.msk.f32.gmra.mrb[16].mxu1 %vm364_vm1, %v467_v6 }
 0x32d   :  { %v6647_v13 = vpop.f32.mrb[0].mxu1 }
 0x32e   :  { %v6649_v14 = vpop.f32.mrb[1].mxu1 }
 0x32f   :  { %v771_v15 = vmul.f32 %v6649_v14, %v6645_v12 }
 0x331   :  { %v6653_v16 = vpop.f32.mrb[2].mxu1  ;;  %5127 = vmatprep.mubr.msk.f32.mxu1 %vm364_vm1, %v771_v15 }
 0x332   :  { %v6656_v17 = vpop.f32.mrb[3].mxu1 }
 0x335   :  { %v6658_v18 = vpop.f32.mrb[4].mxu1 }
 0x336   :  { %v6660_v20 = vpop.f32.mrb[5].mxu1 }
 0x339   :  { %v5091_v22 = vpop.f32.mrb[6].mxu1 }
 0x33a   :  { %v647_v23 = vpop.f32.mrb[7].mxu1 }
 0x33b   :  { %v5642_v25 = vpack.c.bf16 %v5091_v22, %v647_v23 }
 0x33d   :  { %v5094_v27 = vpop.f32.mrb[8].mxu1  ;;  %5644 = vmatprep.subr.msk.bf16.mxu1 %vm6664_vm3, %v5642_v25 }
 0x33e   :  { %v657_v29 = vpop.f32.mrb[9].mxu1  ;;  %5647 = vmatpush3.bf16.xpose.msk.msra.mxu1 %vm6664_vm3, %v5642_v25 }
 0x33f   :  { %v5648_v30 = vpack.c.bf16 %v5094_v27, %v657_v29 }
 0x341   :  { %v5097_v31 = vpop.f32.mrb[10].mxu1  ;;  %5650 = vmatprep.subr.msk.bf16.mxu1 %vm6664_vm3, %v5648_v30 }
 0x342   :  { %v667_v32 = vpop.f32.mrb[11].mxu1 }
 0x343   :  { %v5654_v33 = vpack.c.bf16 %v5097_v31, %v667_v32  ;;  %v773_v31 = vmul.f32 %v6656_v17, %v6645_v12  ;;  %v774_v32 = vmul.f32 %v6653_v16, %v6645_v12 }
 0x345   :  { %v5108_v39 = vpop.f32.mrb[12].mxu1 }
 0x346   :  { %v1335_v40 = vmul.f32 %v5108_v39, %v6645_v12  ;;  %v1341_v42 = vmul.f32 %v5108_v39, %v6675_v36  ;;  %v1573_v43 = vmul.f32 %v5108_v39, %v6678_v37  ;;  %v1698_v44 = vmul.f32 %v5108_v39, %v6681_v38  ;;  %v742_v45 = vpop.f32.mrb[13].mxu1  ;;  %5653 = vmatpush3.bf16.xpose.msk.msra.mxu1 %vm6664_vm3, %v5648_v30 }
 0x347   :  { %v1334_v46 = vmul.f32 %v742_v45, %v6645_v12  ;;  %v1340_v49 = vmul.f32 %v742_v45, %v6675_v36  ;;  %v1572_v50 = vmul.f32 %v742_v45, %v6678_v37  ;;  %v1697_v51 = vmul.f32 %v742_v45, %v6681_v38  ;;  %5656 = vmatprep.subr.msk.bf16.mxu1 %vm6664_vm3, %v5654_v33 }
 0x348   :  { %v772_v30 = vmul.f32 %v6647_v13, %v6645_v12  ;;  %v776_v39 = vmul.f32 %v6658_v18, %v6645_v12  ;;  %v781_v45 = vmul.f32 %v6660_v20, %v6675_v36 }
 0x349   :  { %v5111_v52 = vpop.f32.mrb[14].mxu1  ;;  %v5660_v53 = vpack.c.bf16 %v1341_v42, %v1340_v49  ;;  %v6695_v54 = vpack.c.bf16 %v1335_v40, %v1334_v46  ;;  %v6697_v55 = vpack.c.bf16 %v1573_v43, %v1572_v50  ;;  %v6699_v41 = vpack.c.bf16 %v1698_v44, %v1697_v51 }
 0x34a   :  { %v1337_v58 = vmul.f32 %v5111_v52, %v6645_v12  ;;  %v1343_v59 = vmul.f32 %v5111_v52, %v6675_v36  ;;  %v1575_v60 = vmul.f32 %v5111_v52, %v6678_v37  ;;  %v1700_v61 = vmul.f32 %v5111_v52, %v6681_v38  ;;  %v752_v62 = vpop.f32.mrb[15].mxu1 }
 0x34b   :  { %v1336_v63 = vmul.f32 %v752_v62, %v6645_v12  ;;  %v1342_v1 = vmul.f32 %v752_v62, %v6675_v36  ;;  %v1574_v47 = vmul.f32 %v752_v62, %v6678_v37  ;;  %v1699_v48 = vmul.f32 %v752_v62, %v6681_v38  ;;  %5661 = vmatprep.subr.bf16.mxu0 %v5660_v53 }
 0x34c   :  { %5663 = vmatpush3.bf16.msra.mxu0 %v5660_v53  ;;  %v777_v40 = vmul.f32 %v6649_v14, %v6675_v36  ;;  %v778_v42 = vmul.f32 %v6647_v13, %v6675_v36  ;;  %v779_v43 = vmul.f32 %v6656_v17, %v6675_v36  ;;  %v780_v44 = vmul.f32 %v6653_v16, %v6675_v36 }
 0x34d   :  { %v5114_v2 = vpop.f32.mrb[16].mxu1  ;;  %v5664_v3 = vpack.c.bf16 %v1343_v59, %v1342_v1  ;;  %v6709_v56 = vpack.c.bf16 %v1337_v58, %v1336_v63  ;;  %v6711_v4 = vpack.c.bf16 %v1575_v60, %v1574_v47  ;;  %v6713_v5 = vpack.c.bf16 %v1700_v61, %v1699_v48 }
 0x34e   :  { %v1339_v57 = vmul.f32 %v5114_v2, %v6645_v12  ;;  %v1345_v6 = vmul.f32 %v5114_v2, %v6675_v36  ;;  %v1577_v7 = vmul.f32 %v5114_v2, %v6678_v37  ;;  %v1702_v8 = vmul.f32 %v5114_v2, %v6681_v38  ;;  %v762_v9 = vpop.f32.mrb[17].mxu1  ;;  %5659 = vmatpush3.bf16.xpose.msk.msra.mxu1 %vm6664_vm3, %v5654_v33  ;;  %v286_v2 = vld [vmem:[%s6360_s17 + $0x38] sm:$0xff] }
 0x34f   :  { %v1338_v0 = vmul.f32 %v762_v9, %v6645_v12  ;;  %v1344_v10 = vmul.f32 %v762_v9, %v6675_v36  ;;  %v1576_v15 = vmul.f32 %v762_v9, %v6678_v37  ;;  %v1701_v22 = vmul.f32 %v762_v9, %v6681_v38  ;;  %5665 = vmatprep.subr.bf16.mxu0 %v5664_v3  ;;  %v287_v9 = vld [vmem:[%s6360_s17 + $0x40] sm:$0xff] }
 0x350   :  { %5667 = vmatpush3.bf16.msra.mxu0 %v5664_v3  ;;  %v775_v33 = vmul.f32 %v6660_v20, %v6645_v12  ;;  %v782_v46 = vmul.f32 %v6658_v18, %v6675_v36  ;;  %v783_v49 = vmul.f32 %v6649_v14, %v6678_v37  ;;  %v784_v50 = vmul.f32 %v6647_v13, %v6678_v37 }
 0x351   :  { %v5668_v23 = vpack.c.bf16 %v1345_v6, %v1344_v10  ;;  %v6725_v25 = vpack.c.bf16 %v1339_v57, %v1338_v0  ;;  %v6727_v27 = vpack.c.bf16 %v1577_v7, %v1576_v15  ;;  %v6729_v29 = vpack.c.bf16 %v1702_v8, %v1701_v22 }
 0x352   :  { %v785_v51 = vmul.f32 %v6656_v17, %v6678_v37  ;;  %v786_v52 = vmul.f32 %v6653_v16, %v6678_v37  ;;  %v787_v53 = vmul.f32 %v6660_v20, %v6678_v37  ;;  %v788_v58 = vmul.f32 %v6658_v18, %v6678_v37 }
 0x353   :  { %5669 = vmatprep.subr.bf16.mxu0 %v5668_v23  ;;  %v789_v59 = vmul.f32 %v6649_v14, %v6681_v38  ;;  %v790_v60 = vmul.f32 %v6647_v13, %v6681_v38  ;;  %v791_v61 = vmul.f32 %v6656_v17, %v6681_v38  ;;  %v792_v62 = vmul.f32 %v6653_v16, %v6681_v38 }
 0x354   :  { %5671 = vmatpush3.bf16.msra.mxu0 %v5668_v23  ;;  %v793_v14 = vmul.f32 %v6660_v20, %v6681_v38  ;;  %v794_v13 = vmul.f32 %v6658_v18, %v6681_v38  ;;  %v285_v20 = vld [vmem:[%s6360_s17 + $0x30] sm:$0xff]  ;;  %v288_v18 = vld [vmem:[%s6360_s17 + $0x48] sm:$0xff] }
 0x355   :  { %5128 = vmatmul.mubr.msk.f32.vlgmr.msra.gmra.mrb[18].mxu1 %vm364_vm1, %v772_v30  ;;  %5673 = vmatprep.subr.bf16.mxu0 %v6695_v54  ;;  %v290_v30 = vld [vmem:[%s6360_s17 + $0x58] sm:$0xff] }
 0x356   :  { %5130 = vmatprep.mubr.msk.f32.mxu1 %vm364_vm1, %v773_v31 }
 0x359   :  { %5131 = vmatmul.mubr.msk.f32.gmra.mrb[20].mxu1 %vm364_vm1, %v774_v32  ;;  %v289_v32 = vld [vmem:[%s6360_s17 + $0x50] sm:$0xff] }
 0x35a   :  { %5133 = vmatprep.mubr.msk.f32.mxu1 %vm364_vm1, %v775_v33  ;;  %v280_v33 = vld [vmem:[%s6360_s17 + $0x8] sm:$0xff] }
 0x35d   :  { %5134 = vmatmul.mubr.msk.f32.gmra.mrb[22].mxu1 %vm364_vm1, %v776_v39 }
 0x35e   :  { %5136 = vmatprep.mubr.msk.f32.mxu1 %vm364_vm1, %v777_v40 }
 0x361   :  { %5137 = vmatmul.mubr.msk.f32.gmra.mrb[24].mxu1 %vm364_vm1, %v778_v42  ;;  %v279_v42 = vld [vmem:[%s6360_s17] sm:$0xff] }
 0x362   :  { %5139 = vmatprep.mubr.msk.f32.mxu1 %vm364_vm1, %v779_v43 }
 0x365   :  { %5140 = vmatmul.mubr.msk.f32.gmra.mrb[26].mxu1 %vm364_vm1, %v780_v44 }
 0x366   :  { %5142 = vmatprep.mubr.msk.f32.mxu1 %vm364_vm1, %v781_v45 }
 0x369   :  { %5143 = vmatmul.mubr.msk.f32.gmra.mrb[28].mxu1 %vm364_vm1, %v782_v46 }
 0x36a   :  { %5145 = vmatprep.mubr.msk.f32.mxu1 %vm364_vm1, %v783_v49 }
 0x36d   :  { %5146 = vmatmul.mubr.msk.f32.gmra.mrb[30].mxu1 %vm364_vm1, %v784_v50 }
 0x36e   :  { %5148 = vmatprep.mubr.msk.f32.mxu1 %vm364_vm1, %v785_v51  ;;  %v282_v51 = vld [vmem:[%s6360_s17 + $0x18] sm:$0xff] }
 0x371   :  { %5149 = vmatmul.mubr.msk.f32.gmra.mrb[32].mxu1 %vm364_vm1, %v786_v52 }
 0x372   :  { %5151 = vmatprep.mubr.msk.f32.mxu1 %vm364_vm1, %v787_v53 }
 0x375   :  { %5152 = vmatmul.mubr.msk.f32.gmra.mrb[34].mxu1 %vm364_vm1, %v788_v58  ;;  %v281_v58 = vld [vmem:[%s6360_s17 + $0x10] sm:$0xff] }
 0x376   :  { %5154 = vmatprep.mubr.msk.f32.mxu1 %vm364_vm1, %v789_v59 }
 0x379   :  { %5155 = vmatmul.mubr.msk.f32.gmra.mrb[36].mxu1 %vm364_vm1, %v790_v60 }
 0x37a   :  { %5157 = vmatprep.mubr.msk.f32.mxu1 %vm364_vm1, %v791_v61 }
 0x37d   :  { %5158 = vmatmul.mubr.msk.f32.gmra.mrb[38].mxu1 %vm364_vm1, %v792_v62 }
 0x37e   :  { %5160 = vmatprep.mubr.msk.f32.mxu1 %vm364_vm1, %v793_v14  ;;  %v284_v14 = vld [vmem:[%s6360_s17 + $0x28] sm:$0xff] }
 0x381   :  { %5161 = vmatmul.mubr.msk.f32.gmra.mrb[40].mxu1 %vm364_vm1, %v794_v13 }
 0x428   :  { %v5129_v17 = vpop.f32.mrb[18].mxu1 }
 0x429   :  { %v951_v63 = vpop.f32.mrb[19].mxu1  ;;  %v6829_v46 = vadd.f32 %v5129_v17, %v280_v33 }
 0x42a   :  { %v6833_v50 = vadd.f32 %v951_v63, %v279_v42  ;;  %v283_v63 = vld [vmem:[%s6360_s17 + $0x20] sm:$0xff]  ;;  %v296_v42 = vld [vmem:[%s6360_s17 + $0x88] sm:$0xff] }
 0x42b   :  { %v1073_v61 = vsel %vm165_vm0, %v6829_v46, -inf }
 0x42c   :  { %v5132_v1 = vpop.f32.mrb[20].mxu1  ;;  %v1070_v17 = vsel %vm165_vm0, %v6833_v50, -inf }
 0x42d   :  { %v961_v47 = vpop.f32.mrb[21].mxu1  ;;  %v6839_v60 = vadd.f32 %v5132_v1, %v282_v51  ;;  %v295_v51 = vld [vmem:[%s6360_s17 + $0x80] sm:$0xff] }
 0x42e   :  { %v6843_v62 = vadd.f32 %v961_v47, %v281_v58  ;;  %v292_v47 = vld [vmem:[%s6360_s17 + $0x68] sm:$0xff] }
 0x42f   :  { %v1079_v1 = vsel %vm165_vm0, %v6839_v60, -inf }
 0x430   :  { %v5135_v48 = vpop.f32.mrb[22].mxu1 }
 0x431   :  { %v971_v16 = vpop.f32.mrb[23].mxu1 }
 0x434   :  { %v5138_v3 = vpop.f32.mrb[24].mxu1 }
 0x435   :  { %v6803_v57 = vadd.f32 %v5138_v3, %v286_v2  ;;  %v981_v6 = vpop.f32.mrb[25].mxu1  ;;  %v6853_v3 = vadd.f32 %v971_v16, %v283_v63  ;;  %v294_v16 = vld [vmem:[%s6360_s17 + $0x78] sm:$0xff] }
 0x436   :  { %v6805_v7 = vadd.f32 %v981_v6, %v285_v20  ;;  %v6849_v20 = vadd.f32 %v5135_v48, %v284_v14 }
 0x437   :  { %v1091_v8 = vsel %vm165_vm0, %v6803_v57, -inf }
 0x438   :  { %1092 = vmax.xlane.f32.xlu1 %v1091_v8  ;;  %v5141_v0 = vpop.f32.mrb[26].mxu1  ;;  %v1088_v10 = vsel %vm165_vm0, %v6805_v7, -inf  ;;  %v291_v8 = vld [vmem:[%s6360_s17 + $0x60] sm:$0xff]  ;;  %v1085_v48 = vsel %vm165_vm0, %v6849_v20, -inf }
 0x439   :  { %v6813_v15 = vadd.f32 %v5141_v0, %v288_v18  ;;  %v991_v22 = vpop.f32.mrb[27].mxu1  ;;  %1089 = vmax.xlane.f32.xlu0 %v1088_v10  ;;  %v1076_v18 = vsel %vm165_vm0, %v6843_v62, -inf }
 0x43a   :  { %v6815_v23 = vadd.f32 %v991_v22, %v287_v9 }
 0x43b   :  { %v1097_v31 = vsel %vm165_vm0, %v6813_v15, -inf }
 0x43c   :  { %1098 = vmax.xlane.f32.xlu1 %v1097_v31  ;;  %v5144_v39 = vpop.f32.mrb[28].mxu1  ;;  %v1094_v40 = vsel %vm165_vm0, %v6815_v23, -inf  ;;  %v293_v31 = vld [vmem:[%s6360_s17 + $0x70] sm:$0xff] }
 0x43d   :  { %v6825_v43 = vadd.f32 %v5144_v39, %v290_v30  ;;  %v1001_v44 = vpop.f32.mrb[29].mxu1  ;;  %1095 = vmax.xlane.f32.xlu0 %v1094_v40  ;;  %v1082_v30 = vsel %vm165_vm0, %v6853_v3, -inf }
 0x43e   :  { %v6827_v45 = vadd.f32 %v1001_v44, %v289_v32 }
 0x43f   :  { %v1103_v49 = vsel %vm165_vm0, %v6825_v43, -inf }
 0x440   :  { %1104 = vmax.xlane.f32.xlu1 %v1103_v49  ;;  %v5147_v52 = vpop.f32.mrb[30].mxu1  ;;  %v1100_v53 = vsel %vm165_vm0, %v6827_v45, -inf }
 0x441   :  { %v1011_v59 = vpop.f32.mrb[31].mxu1  ;;  %1101 = vmax.xlane.f32.xlu0 %v1100_v53  ;;  %v6859_v0 = vadd.f32 %v5147_v52, %v292_v47 }
 0x442   :  { %v6863_v10 = vadd.f32 %v1011_v59, %v291_v8  ;;  %v299_v8 = vld [vmem:[%s6360_s17 + $0xa0] sm:$0xff] }
 0x443   :  { %v1109_v39 = vsel %vm165_vm0, %v6859_v0, -inf }
 0x444   :  { %1074 = vmax.xlane.f32.xlu1 %v1073_v61  ;;  %v5150_v13 = vpop.f32.mrb[32].mxu1  ;;  %v1106_v49 = vsel %vm165_vm0, %v6863_v10, -inf  ;;  %v298_v61 = vld [vmem:[%s6360_s17 + $0x98] sm:$0xff] }
 0x445   :  { %v1021_v2 = vpop.f32.mrb[33].mxu1  ;;  %1071 = vmax.xlane.f32.xlu0 %v1070_v17  ;;  %v6869_v33 = vadd.f32 %v5150_v13, %v294_v16  ;;  %v297_v17 = vld [vmem:[%s6360_s17 + $0x90] sm:$0xff] }
 0x446   :  { %v6873_v40 = vadd.f32 %v1021_v2, %v293_v31  ;;  %v301_v31 = vld [vmem:[%s6360_s17 + $0xb0] sm:$0xff] }
 0x447   :  { %v1115_v58 = vsel %vm165_vm0, %v6869_v33, -inf }
 0x448   :  { %1080 = vmax.xlane.f32.xlu1 %v1079_v1  ;;  %v5153_v6 = vpop.f32.mrb[34].mxu1  ;;  %v1112_v13 = vsel %vm165_vm0, %v6873_v40, -inf }
 0x449   :  { %v1031_v9 = vpop.f32.mrb[35].mxu1  ;;  %1077 = vmax.xlane.f32.xlu0 %v1076_v18  ;;  %v6879_v53 = vadd.f32 %v5153_v6, %v296_v42  ;;  %v300_v6 = vld [vmem:[%s6360_s17 + $0xa8] sm:$0xff] }
 0x44a   :  { %v6883_v59 = vadd.f32 %v1031_v9, %v295_v51 }
 0x44b   :  { %v1121_v1 = vsel %vm165_vm0, %v6879_v53, -inf }
 0x44c   :  { %1086 = vmax.xlane.f32.xlu1 %v1085_v48  ;;  %v5156_v22 = vpop.f32.mrb[36].mxu1  ;;  %v1118_v18 = vsel %vm165_vm0, %v6883_v59, -inf }
 0x44d   :  { %v1041_v32 = vpop.f32.mrb[37].mxu1  ;;  %1083 = vmax.xlane.f32.xlu0 %v1082_v30  ;;  %v6889_v2 = vadd.f32 %v5156_v22, %v298_v61  ;;  %v302_v22 = vld [vmem:[%s6360_s17 + $0xb8] sm:$0xff] }
 0x44e   :  { %v6893_v47 = vadd.f32 %v1041_v32, %v297_v17 }
 0x44f   :  { %v1127_v48 = vsel %vm165_vm0, %v6889_v2, -inf }
 0x450   :  { %1110 = vmax.xlane.f32.xlu1 %v1109_v39  ;;  %v5159_v44 = vpop.f32.mrb[38].mxu1  ;;  %v1124_v30 = vsel %vm165_vm0, %v6893_v47, -inf }
 0x451   :  { %v1051_v52 = vpop.f32.mrb[39].mxu1  ;;  %1107 = vmax.xlane.f32.xlu0 %v1106_v49  ;;  %v6899_v9 = vadd.f32 %v5159_v44, %v300_v6 }
 0x452   :  { %v6903_v16 = vadd.f32 %v1051_v52, %v299_v8 }
 0x453   :  { %v1133_v39 = vsel %vm165_vm0, %v6899_v9, -inf }
 0x454   :  { %1116 = vmax.xlane.f32.xlu1 %v1115_v58  ;;  %v5162_v14 = vpop.f32.mrb[40].mxu1  ;;  %v1130_v44 = vsel %vm165_vm0, %v6903_v16, -inf }
 0x455   :  { %v1061_v63 = vpop.f32.mrb[41].mxu1  ;;  %1113 = vmax.xlane.f32.xlu0 %v1112_v13  ;;  %v6909_v32 = vadd.f32 %v5162_v14, %v302_v22 }
 0x456   :  { %v6913_v42 = vadd.f32 %v1061_v63, %v301_v31 }
 0x457   :  { %v1139_v49 = vsel %vm165_vm0, %v6909_v32, -inf }
 0x458   :  { %1122 = vmax.xlane.f32.xlu1 %v1121_v1  ;;  %v1136_v51 = vsel %vm165_vm0, %v6913_v42, -inf }
 0x459   :  { %1119 = vmax.xlane.f32.xlu0 %v1118_v18 }
 0x45c   :  { %1128 = vmax.xlane.f32.xlu1 %v1127_v48 }
 0x45d   :  { %1125 = vmax.xlane.f32.xlu0 %v1124_v30 }
 0x460   :  { %1134 = vmax.xlane.f32.xlu1 %v1133_v39 }
 0x461   :  { %1131 = vmax.xlane.f32.xlu0 %v1130_v44 }
 0x464   :  { %1140 = vmax.xlane.f32.xlu1 %v1139_v49 }
 0x465   :  { %1137 = vmax.xlane.f32.xlu0 %v1136_v51 }
 0x4c5   :  { %v1093_v52 = vpop.xlane.xlu1 %1092 }
 0x4c6   :  { %v1149_v58 = vsub.f32 %v6803_v57, %v1093_v52  ;;  %v1090_v61 = vpop.xlane.xlu0 %1089 }
 0x4c7   :  { %v1148_v14 = vsub.f32 %v6805_v7, %v1090_v61 }
 0x4c8   :  { %v1180_v13 = vmul.f32 1.442695, %v1149_v58 }
 0x4c9   :  { %v1178_v17 = vmul.f32 1.442695, %v1148_v14  ;;  %v1099_v63 = vpop.xlane.xlu1 %1098 }
 0x4ca   :  { %5996 = vpow2.f32 %v1180_v13  ;;  %v1151_v1 = vsub.f32 %v6813_v15, %v1099_v63  ;;  %v1096_v6 = vpop.xlane.xlu0 %1095 }
 0x4cb   :  { %5998 = vpow2.f32 %v1178_v17  ;;  %v1150_v18 = vsub.f32 %v6815_v23, %v1096_v6 }
 0x4cc   :  { %v1184_v8 = vmul.f32 1.442695, %v1151_v1 }
 0x4cd   :  { %v1182_v48 = vmul.f32 1.442695, %v1150_v18  ;;  %v1105_v22 = vpop.xlane.xlu1 %1104 }
 0x4ce   :  { %6000 = vpow2.f32 %v1184_v8  ;;  %v1153_v30 = vsub.f32 %v6825_v43, %v1105_v22  ;;  %v1102_v57 = vpop.xlane.xlu0 %1101 }
 0x4cf   :  { %6002 = vpow2.f32 %v1182_v48  ;;  %v1152_v7 = vsub.f32 %v6827_v45, %v1102_v57 }
 0x4d0   :  { %v1188_v31 = vmul.f32 1.442695, %v1153_v30 }
 0x4d1   :  { %v1186_v39 = vmul.f32 1.442695, %v1152_v7  ;;  %v1075_v44 = vpop.xlane.xlu1 %1074 }
 0x4d2   :  { %6004 = vpow2.f32 %v1188_v31  ;;  %v1143_v15 = vsub.f32 %v6829_v46, %v1075_v44  ;;  %v1072_v49 = vpop.xlane.xlu0 %1071 }
 0x4d3   :  { %6006 = vpow2.f32 %v1186_v39  ;;  %v1142_v23 = vsub.f32 %v6833_v50, %v1072_v49 }
 0x4d4   :  { %v6929_v51 = vpop.eup %5996  ;;  %v1168_v52 = vmul.f32 1.442695, %v1143_v15 }
 0x4d5   :  { %v6931_v58 = vpop.eup %5998  ;;  %v1166_v43 = vmul.f32 1.442695, %v1142_v23  ;;  %v1081_v61 = vpop.xlane.xlu1 %1080  ;;  %v1235_v45 = vsel %vm165_vm0, %v6929_v51, 0.0 }
 0x4d6   :  { %6008 = vpow2.f32 %v1168_v52  ;;  %v1145_v14 = vsub.f32 %v6839_v60, %v1081_v61  ;;  %1236 = vadd.xlane.f32.xlu1 %v1235_v45  ;;  %v1078_v13 = vpop.xlane.xlu0 %1077  ;;  %v1232_v46 = vsel %vm165_vm0, %v6931_v58, 0.0 }
 0x4d7   :  { %6010 = vpow2.f32 %v1166_v43  ;;  %v1144_v50 = vsub.f32 %v6843_v62, %v1078_v13  ;;  %1233 = vadd.xlane.f32.xlu0 %v1232_v46 }
 0x4d8   :  { %v6939_v17 = vpop.eup %6000  ;;  %v1172_v63 = vmul.f32 1.442695, %v1145_v14 }
 0x4d9   :  { %v6941_v1 = vpop.eup %6002  ;;  %v1170_v6 = vmul.f32 1.442695, %v1144_v50  ;;  %v1087_v18 = vpop.xlane.xlu1 %1086  ;;  %v1241_v8 = vsel %vm165_vm0, %v6939_v17, 0.0 }
 0x4da   :  { %6012 = vpow2.f32 %v1172_v63  ;;  %v1147_v60 = vsub.f32 %v6849_v20, %v1087_v18  ;;  %1242 = vadd.xlane.f32.xlu1 %v1241_v8  ;;  %v1084_v48 = vpop.xlane.xlu0 %1083  ;;  %v1238_v22 = vsel %vm165_vm0, %v6941_v1, 0.0 }
 0x4db   :  { %6014 = vpow2.f32 %v1170_v6  ;;  %v1146_v62 = vsub.f32 %v6853_v3, %v1084_v48  ;;  %1239 = vadd.xlane.f32.xlu0 %v1238_v22 }
 0x4dc   :  { %v6949_v30 = vpop.eup %6004  ;;  %v1176_v57 = vmul.f32 1.442695, %v1147_v60 }
 0x4dd   :  { %v6951_v7 = vpop.eup %6006  ;;  %v1174_v31 = vmul.f32 1.442695, %v1146_v62  ;;  %v1111_v39 = vpop.xlane.xlu1 %1110  ;;  %v1247_v44 = vsel %vm165_vm0, %v6949_v30, 0.0 }
 0x4de   :  { %6016 = vpow2.f32 %v1176_v57  ;;  %v1155_v20 = vsub.f32 %v6859_v0, %v1111_v39  ;;  %1248 = vadd.xlane.f32.xlu1 %v1247_v44  ;;  %v1108_v15 = vpop.xlane.xlu0 %1107  ;;  %v1244_v49 = vsel %vm165_vm0, %v6951_v7, 0.0 }
 0x4df   :  { %6018 = vpow2.f32 %v1174_v31  ;;  %v1154_v3 = vsub.f32 %v6863_v10, %v1108_v15  ;;  %1245 = vadd.xlane.f32.xlu0 %v1244_v49 }
 0x4e0   :  { %v6959_v23 = vpop.eup %6008  ;;  %v1192_v52 = vmul.f32 1.442695, %v1155_v20 }
 0x4e1   :  { %v6961_v43 = vpop.eup %6010  ;;  %v1190_v61 = vmul.f32 1.442695, %v1154_v3  ;;  %v1117_v45 = vpop.xlane.xlu1 %1116  ;;  %v1217_v14 = vsel %vm165_vm0, %v6959_v23, 0.0 }
 0x4e2   :  { %6020 = vpow2.f32 %v1192_v52  ;;  %v1157_v0 = vsub.f32 %v6869_v33, %v1117_v45  ;;  %1218 = vadd.xlane.f32.xlu1 %v1217_v14  ;;  %v1114_v13 = vpop.xlane.xlu0 %1113  ;;  %v1214_v46 = vsel %vm165_vm0, %v6961_v43, 0.0 }
 0x4e3   :  { %6022 = vpow2.f32 %v1190_v61  ;;  %v1156_v10 = vsub.f32 %v6873_v40, %v1114_v13  ;;  %1215 = vadd.xlane.f32.xlu0 %v1214_v46 }
 0x4e4   :  { %v6969_v50 = vpop.eup %6012  ;;  %v1196_v63 = vmul.f32 1.442695, %v1157_v0 }
 0x4e5   :  { %v6971_v6 = vpop.eup %6014  ;;  %v1194_v18 = vmul.f32 1.442695, %v1156_v10  ;;  %v1123_v8 = vpop.xlane.xlu1 %1122  ;;  %v1223_v60 = vsel %vm165_vm0, %v6969_v50, 0.0 }
 0x4e6   :  { %6024 = vpow2.f32 %v1196_v63  ;;  %v1159_v33 = vsub.f32 %v6879_v53, %v1123_v8  ;;  %1224 = vadd.xlane.f32.xlu1 %v1223_v60  ;;  %v1120_v48 = vpop.xlane.xlu0 %1119  ;;  %v1220_v22 = vsel %vm165_vm0, %v6971_v6, 0.0 }
 0x4e7   :  { %6026 = vpow2.f32 %v1194_v18  ;;  %v1158_v40 = vsub.f32 %v6883_v59, %v1120_v48  ;;  %1221 = vadd.xlane.f32.xlu0 %v1220_v22 }
 0x4e8   :  { %v6979_v62 = vpop.eup %6016  ;;  %v1200_v57 = vmul.f32 1.442695, %v1159_v33 }
 0x4e9   :  { %v6981_v31 = vpop.eup %6018  ;;  %v1198_v39 = vmul.f32 1.442695, %v1158_v40  ;;  %v1129_v44 = vpop.xlane.xlu1 %1128  ;;  %v1229_v20 = vsel %vm165_vm0, %v6979_v62, 0.0 }
 0x4ea   :  { %6028 = vpow2.f32 %v1200_v57  ;;  %v1161_v53 = vsub.f32 %v6889_v2, %v1129_v44  ;;  %1230 = vadd.xlane.f32.xlu1 %v1229_v20  ;;  %v1126_v15 = vpop.xlane.xlu0 %1125  ;;  %v1226_v49 = vsel %vm165_vm0, %v6981_v31, 0.0 }
 0x4eb   :  { %6030 = vpow2.f32 %v1198_v39  ;;  %v1160_v59 = vsub.f32 %v6893_v47, %v1126_v15  ;;  %1227 = vadd.xlane.f32.xlu0 %v1226_v49 }
 0x4ec   :  { %v6989_v3 = vpop.eup %6020  ;;  %v1204_v52 = vmul.f32 1.442695, %v1161_v53 }
 0x4ed   :  { %v6991_v61 = vpop.eup %6022  ;;  %v1202_v45 = vmul.f32 1.442695, %v1160_v59  ;;  %v1135_v14 = vpop.xlane.xlu1 %1134  ;;  %v1253_v0 = vsel %vm165_vm0, %v6989_v3, 0.0 }
 0x4ee   :  { %6032 = vpow2.f32 %v1204_v52  ;;  %v1163_v2 = vsub.f32 %v6899_v9, %v1135_v14  ;;  %1254 = vadd.xlane.f32.xlu1 %v1253_v0  ;;  %v1132_v13 = vpop.xlane.xlu0 %1131  ;;  %v1250_v46 = vsel %vm165_vm0, %v6991_v61, 0.0 }
 0x4ef   :  { %6034 = vpow2.f32 %v1202_v45  ;;  %v1162_v47 = vsub.f32 %v6903_v16, %v1132_v13  ;;  %1251 = vadd.xlane.f32.xlu0 %v1250_v46 }
 0x4f0   :  { %v6999_v10 = vpop.eup %6024  ;;  %v1208_v63 = vmul.f32 1.442695, %v1163_v2 }
 0x4f1   :  { %v7001_v18 = vpop.eup %6026  ;;  %v1206_v8 = vmul.f32 1.442695, %v1162_v47  ;;  %v1141_v60 = vpop.xlane.xlu1 %1140  ;;  %v1259_v33 = vsel %vm165_vm0, %v6999_v10, 0.0 }
 0x4f2   :  { %6036 = vpow2.f32 %v1208_v63  ;;  %v1165_v9 = vsub.f32 %v6909_v32, %v1141_v60  ;;  %1260 = vadd.xlane.f32.xlu1 %v1259_v33  ;;  %v1138_v48 = vpop.xlane.xlu0 %1137  ;;  %v1256_v22 = vsel %vm165_vm0, %v7001_v18, 0.0 }
 0x4f3   :  { %6038 = vpow2.f32 %v1206_v8  ;;  %v1164_v16 = vsub.f32 %v6913_v42, %v1138_v48  ;;  %1257 = vadd.xlane.f32.xlu0 %v1256_v22 }
 0x4f4   :  { %v7009_v40 = vpop.eup %6028  ;;  %v1212_v57 = vmul.f32 1.442695, %v1165_v9 }
 0x4f5   :  { %v7011_v39 = vpop.eup %6030  ;;  %v1210_v44 = vmul.f32 1.442695, %v1164_v16  ;;  %v1265_v20 = vsel %vm165_vm0, %v7009_v40, 0.0 }
 0x4f6   :  { %6040 = vpow2.f32 %v1212_v57  ;;  %1266 = vadd.xlane.f32.xlu1 %v1265_v20  ;;  %v1262_v32 = vsel %vm165_vm0, %v7011_v39, 0.0 }
 0x4f7   :  { %6042 = vpow2.f32 %v1210_v44  ;;  %1263 = vadd.xlane.f32.xlu0 %v1262_v32 }
 0x4f8   :  { %v7017_v53 = vpop.eup %6032 }
 0x4f9   :  { %v7019_v42 = vpop.eup %6034  ;;  %v1271_v15 = vsel %vm165_vm0, %v7017_v53, 0.0 }
 0x4fa   :  { %1272 = vadd.xlane.f32.xlu1 %v1271_v15  ;;  %v1268_v49 = vsel %vm165_vm0, %v7019_v42, 0.0 }
 0x4fb   :  { %1269 = vadd.xlane.f32.xlu0 %v1268_v49 }
 0x4fc   :  { %v7025_v59 = vpop.eup %6036 }
 0x4fd   :  { %v7027_v52 = vpop.eup %6038  ;;  %v1277_v45 = vsel %vm165_vm0, %v7025_v59, 0.0 }
 0x4fe   :  { %1278 = vadd.xlane.f32.xlu1 %v1277_v45  ;;  %v1274_v14 = vsel %vm165_vm0, %v7027_v52, 0.0 }
 0x4ff   :  { %1275 = vadd.xlane.f32.xlu0 %v1274_v14 }
 0x500   :  { %v7033_v0 = vpop.eup %6040 }
 0x501   :  { %v7035_v2 = vpop.eup %6042  ;;  %v1283_v13 = vsel %vm165_vm0, %v7033_v0, 0.0 }
 0x502   :  { %1284 = vadd.xlane.f32.xlu1 %v1283_v13  ;;  %v1280_v46 = vsel %vm165_vm0, %v7035_v2, 0.0 }
 0x503   :  { %1281 = vadd.xlane.f32.xlu0 %v1280_v46 }
 0x563   :  { %v1237_v47 = vpop.xlane.xlu1 %1236 }
 0x564   :  { %6044 = vrcp.f32 %v1237_v47  ;;  %v1234_v63 = vpop.xlane.xlu0 %1233 }
 0x565   :  { %6046 = vrcp.f32 %v1234_v63 }
 0x567   :  { %v1243_v8 = vpop.xlane.xlu1 %1242 }
 0x568   :  { %6048 = vrcp.f32 %v1243_v8  ;;  %v1240_v60 = vpop.xlane.xlu0 %1239 }
 0x569   :  { %6050 = vrcp.f32 %v1240_v60 }
 0x56b   :  { %v1249_v33 = vpop.xlane.xlu1 %1248 }
 0x56c   :  { %6052 = vrcp.f32 %v1249_v33  ;;  %v1246_v9 = vpop.xlane.xlu0 %1245 }
 0x56d   :  { %6054 = vrcp.f32 %v1246_v9 }
 0x56e   :  { %v6045_v48 = vpop.eup %6044 }
 0x56f   :  { %v6047_v22 = vpop.eup %6046  ;;  %v1219_v16 = vpop.xlane.xlu1 %1218  ;;  %v1317_v20 = vmul.f32 %v6045_v48, %v6929_v51 }
 0x570   :  { %6056 = vrcp.f32 %v1219_v16  ;;  %v1216_v57 = vpop.xlane.xlu0 %1215  ;;  %v1316_v44 = vmul.f32 %v6047_v22, %v6931_v58 }
 0x571   :  { %6058 = vrcp.f32 %v1216_v57 }
 0x572   :  { %v6049_v32 = vpop.eup %6048  ;;  %5175 = vmatprep.mubr.msk.f32.mxu0 %vm165_vm0, %v1316_v44 }
 0x573   :  { %v6051_v15 = vpop.eup %6050  ;;  %v1225_v49 = vpop.xlane.xlu1 %1224  ;;  %5176 = vmatmul.mubr.msk.f32.vlgmr.msra.gmra.mrb[6].mxu0 %vm165_vm0, %v1317_v20  ;;  %v1319_v58 = vmul.f32 %v6049_v32, %v6939_v17 }
 0x574   :  { %6060 = vrcp.f32 %v1225_v49  ;;  %5675 = vmatpush3.bf16.msra.mxu0 %v6695_v54  ;;  %v1222_v45 = vpop.xlane.xlu0 %1221  ;;  %v1318_v14 = vmul.f32 %v6051_v15, %v6941_v1 }
 0x575   :  { %5677 = vmatprep.subr.bf16.mxu0 %v6709_v56  ;;  %6062 = vrcp.f32 %v1222_v45 }
 0x576   :  { %v6053_v51 = vpop.eup %6052  ;;  %5178 = vmatprep.mubr.msk.f32.mxu0 %vm165_vm0, %v1318_v14  ;;  %v335_v14 = vld [vmem:[%s6395_s19] sm:$0xff] }
 0x577   :  { %v6055_v13 = vpop.eup %6054  ;;  %v1231_v46 = vpop.xlane.xlu1 %1230  ;;  %5179 = vmatmul.mubr.msk.f32.gmra.mrb[8].mxu0 %vm165_vm0, %v1319_v58  ;;  %v1321_v1 = vmul.f32 %v6053_v51, %v6949_v30  ;;  %v336_v58 = vld [vmem:[%s6395_s19 + $0x8] sm:$0xff] }
 0x578   :  { %6064 = vrcp.f32 %v1231_v46  ;;  %5679 = vmatpush3.bf16.msra.mxu0 %v6709_v56  ;;  %v1228_v47 = vpop.xlane.xlu0 %1227  ;;  %v1320_v54 = vmul.f32 %v6055_v13, %v6951_v7  ;;  %v5708_v46 = vpack.c.bf16 %v336_v58, %v335_v14  ;;  %v344_v14 = vld [vmem:[%s6415_s12 + $0x10] sm:$0xff] }
 0x579   :  { %5681 = vmatprep.subr.bf16.mxu0 %v6725_v25  ;;  %6066 = vrcp.f32 %v1228_v47 }
 0x57a   :  { %v6057_v63 = vpop.eup %6056  ;;  %5181 = vmatprep.mubr.msk.f32.mxu0 %vm165_vm0, %v1320_v54  ;;  %v337_v54 = vld [vmem:[%s6395_s19 + $0x10] sm:$0xff] }
 0x57b   :  { %v6059_v17 = vpop.eup %6058  ;;  %v1255_v8 = vpop.xlane.xlu1 %1254  ;;  %5182 = vmatmul.mubr.msk.f32.gmra.mrb[10].mxu0 %vm165_vm0, %v1321_v1  ;;  %v1311_v7 = vmul.f32 %v6057_v63, %v6959_v23  ;;  %v338_v1 = vld [vmem:[%s6395_s19 + $0x18] sm:$0xff]  ;;  %s7941_s19 = sld [smem:[#allocation18_spill]] }
 0x57c   :  { %6068 = vrcp.f32 %v1255_v8  ;;  %5683 = vmatpush3.bf16.msra.mxu0 %v6725_v25  ;;  %v1252_v60 = vpop.xlane.xlu0 %1251  ;;  %v1310_v56 = vmul.f32 %v6059_v17, %v6961_v43  ;;  %v5712_v17 = vpack.c.bf16 %v338_v1, %v337_v54 }
 0x57d   :  { %5685 = vmatprep.subr.bf16.mxu0 %v6697_v55  ;;  %6070 = vrcp.f32 %v1252_v60 }
 0x57e   :  { %v6061_v33 = vpop.eup %6060  ;;  %5196 = vmatprep.mubr.msk.f32.mxu0 %vm165_vm0, %v1310_v56 }
 0x57f   :  { %v6063_v30 = vpop.eup %6062  ;;  %v1261_v9 = vpop.xlane.xlu1 %1260  ;;  %5197 = vmatmul.mubr.msk.f32.vlgmr.msra.gmra.mrb[6].mxu0 %vm165_vm0, %v1311_v7  ;;  %v1313_v23 = vmul.f32 %v6061_v33, %v6969_v50 }
 0x580   :  { %6072 = vrcp.f32 %v1261_v9  ;;  %5687 = vmatpush3.bf16.msra.mxu0 %v6697_v55  ;;  %v1258_v48 = vpop.xlane.xlu0 %1257  ;;  %v1312_v25 = vmul.f32 %v6063_v30, %v6971_v6 }
 0x581   :  { %5689 = vmatprep.subr.bf16.mxu0 %v6711_v4  ;;  %6074 = vrcp.f32 %v1258_v48 }
 0x582   :  { %v6065_v43 = vpop.eup %6064  ;;  %5199 = vmatprep.mubr.msk.f32.mxu0 %vm165_vm0, %v1312_v25 }
 0x583   :  { %v6067_v22 = vpop.eup %6066  ;;  %v1267_v16 = vpop.xlane.xlu1 %1266  ;;  %5200 = vmatmul.mubr.msk.f32.gmra.mrb[8].mxu0 %vm165_vm0, %v1313_v23  ;;  %v1315_v6 = vmul.f32 %v6065_v43, %v6979_v62 }
 0x584   :  { %6076 = vrcp.f32 %v1267_v16  ;;  %5691 = vmatpush3.bf16.msra.mxu0 %v6711_v4  ;;  %v1264_v57 = vpop.xlane.xlu0 %1263  ;;  %v1314_v55 = vmul.f32 %v6067_v22, %v6981_v31 }
 0x585   :  { %5693 = vmatprep.subr.bf16.mxu0 %v6727_v27  ;;  %6078 = vrcp.f32 %v1264_v57 }
 0x586   :  { %v6069_v44 = vpop.eup %6068  ;;  %5202 = vmatprep.mubr.msk.f32.mxu0 %vm165_vm0, %v1314_v55 }
 0x587   :  { %v6071_v50 = vpop.eup %6070  ;;  %v1273_v20 = vpop.xlane.xlu1 %1272  ;;  %5203 = vmatmul.mubr.msk.f32.gmra.mrb[10].mxu0 %vm165_vm0, %v1315_v6  ;;  %v1323_v31 = vmul.f32 %v6069_v44, %v6989_v3 }
 0x588   :  { %6080 = vrcp.f32 %v1273_v20  ;;  %5695 = vmatpush3.bf16.msra.mxu0 %v6727_v27  ;;  %v1270_v32 = vpop.xlane.xlu0 %1269  ;;  %v1322_v4 = vmul.f32 %v6071_v50, %v6991_v61 }
 0x589   :  { %5697 = vmatprep.subr.bf16.mxu0 %v6699_v41  ;;  %6082 = vrcp.f32 %v1270_v32 }
 0x58a   :  { %v6073_v62 = vpop.eup %6072  ;;  %5217 = vmatprep.mubr.msk.f32.mxu0 %vm165_vm0, %v1322_v4 }
 0x58b   :  { %v6075_v15 = vpop.eup %6074  ;;  %v1279_v49 = vpop.xlane.xlu1 %1278  ;;  %5218 = vmatmul.mubr.msk.f32.vlgmr.msra.gmra.mrb[6].mxu0 %vm165_vm0, %v1323_v31  ;;  %v1325_v3 = vmul.f32 %v6073_v62, %v6999_v10 }
 0x58c   :  { %6084 = vrcp.f32 %v1279_v49  ;;  %5699 = vmatpush3.bf16.msra.mxu0 %v6699_v41  ;;  %v1276_v27 = vpop.xlane.xlu0 %1275  ;;  %v1324_v61 = vmul.f32 %v6075_v15, %v7001_v18 }
 0x58d   :  { %5701 = vmatprep.subr.bf16.mxu0 %v6713_v5  ;;  %6086 = vrcp.f32 %v1276_v27 }
 0x58e   :  { %v6077_v45 = vpop.eup %6076  ;;  %5220 = vmatprep.mubr.msk.f32.mxu0 %vm165_vm0, %v1324_v61 }
 0x58f   :  { %v6079_v51 = vpop.eup %6078  ;;  %v1285_v13 = vpop.xlane.xlu1 %1284  ;;  %5221 = vmatmul.mubr.msk.f32.gmra.mrb[8].mxu0 %vm165_vm0, %v1325_v3  ;;  %v1327_v10 = vmul.f32 %v6077_v45, %v7009_v40  ;;  %v342_v3 = vld [vmem:[%s6415_s12] sm:$0xff]  ;;  %v343_v45 = vld [vmem:[%s6415_s12 + $0x8] sm:$0xff] }
 0x590   :  { %6088 = vrcp.f32 %v1285_v13  ;;  %5703 = vmatpush3.bf16.msra.mxu0 %v6713_v5  ;;  %v1282_v41 = vpop.xlane.xlu0 %1281  ;;  %v1326_v18 = vmul.f32 %v6079_v51, %v7011_v39  ;;  %v5716_v58 = vpack.c.bf16 %v343_v45, %v342_v3  ;;  %v345_v51 = vld [vmem:[%s6415_s12 + $0x18] sm:$0xff]  ;;  %s7944_s12 = sld [smem:[#allocation17_spill]] }
 0x591   :  { %5705 = vmatprep.subr.bf16.mxu0 %v6729_v29  ;;  %6090 = vrcp.f32 %v1282_v41  ;;  %v5720_v13 = vpack.c.bf16 %v345_v51, %v344_v14 }
 0x592   :  { %v6081_v47 = vpop.eup %6080  ;;  %5223 = vmatprep.mubr.msk.f32.mxu0 %vm165_vm0, %v1326_v18  ;;  %5717 = vmatprep.subr.bf16.mxu1 %v5716_v58 }
 0x593   :  { %v6083_v63 = vpop.eup %6082  ;;  %5224 = vmatmul.mubr.msk.f32.gmra.mrb[10].mxu0 %vm165_vm0, %v1327_v10  ;;  %v1329_v39 = vmul.f32 %v6081_v47, %v7017_v53  ;;  %5719 = vmatpush3.bf16.msra.mxu1 %v5716_v58 }
 0x594   :  { %5707 = vmatpush3.bf16.msra.mxu0 %v6729_v29  ;;  %v1328_v5 = vmul.f32 %v6083_v63, %v7019_v42  ;;  %5721 = vmatprep.subr.bf16.mxu1 %v5720_v13 }
 0x595   :  { %5709 = vmatprep.subr.bf16.mxu0 %v5708_v46 }
 0x596   :  { %v6085_v8 = vpop.eup %6084  ;;  %5238 = vmatprep.mubr.msk.f32.mxu0 %vm165_vm0, %v1328_v5 }
 0x597   :  { %v6087_v40 = vpop.eup %6086  ;;  %5239 = vmatmul.mubr.msk.f32.vlgmr.msra.gmra.mrb[6].mxu0 %vm165_vm0, %v1329_v39  ;;  %v1331_v56 = vmul.f32 %v6085_v8, %v7025_v59  ;;  %5723 = vmatpush3.bf16.msra.mxu1 %v5720_v13 }
 0x598   :  { %v1330_v60 = vmul.f32 %v6087_v40, %v7027_v52  ;;  %5711 = vmatpush3.bf16.msra.mxu0 %v5708_v46 }
 0x599   :  { %5713 = vmatprep.subr.bf16.mxu0 %v5712_v17 }
 0x59a   :  { %v6089_v7 = vpop.eup %6088  ;;  %5241 = vmatprep.mubr.msk.f32.mxu0 %vm165_vm0, %v1330_v60 }
 0x59b   :  { %v6091_v29 = vpop.eup %6090  ;;  %5242 = vmatmul.mubr.msk.f32.gmra.mrb[8].mxu0 %vm165_vm0, %v1331_v56  ;;  %v1333_v42 = vmul.f32 %v6089_v7, %v7033_v0  ;;  %v4606_v0 = vld [vmem:[%s6400_s24] ss:$0 sm:$0xff]  ;;  %s7942_s24 = sld [smem:[#allocation20_spill]] }
 0x59c   :  { %v1332_v53 = vmul.f32 %v6091_v29, %v7035_v2  ;;  %5715 = vmatpush3.bf16.msra.mxu0 %v5712_v17 }
 0x59e   :  { %5244 = vmatprep.mubr.msk.f32.mxu0 %vm165_vm0, %v1332_v53 }
 0x59f   :  { %5245 = vmatmul.mubr.msk.f32.gmra.mrb[10].mxu0 %vm165_vm0, %v1333_v42 }
 0x66a   :  { %v5240_v52 = vpop.f32.mrb[6].mxu0 }
 0x66b   :  { %v1787_v33 = vpop.f32.mrb[7].mxu0 }
 0x66c   :  { %5255 = vmatprep.mubr.msk.f32.mxu0 %vm364_vm1, %v1787_v33 }
 0x66d   :  { %5256 = vmatmul.mubr.msk.f32.vlgmr.msra.gmra.mrb[12].mxu0 %vm364_vm1, %v5240_v52 }
 0x66e   :  { %v5243_v59 = vpop.f32.mrb[8].mxu0 }
 0x66f   :  { %v1797_v30 = vpop.f32.mrb[9].mxu0 }
 0x670   :  { %5258 = vmatprep.mubr.msk.f32.mxu0 %vm364_vm1, %v1797_v30 }
 0x671   :  { %5259 = vmatmul.mubr.msk.f32.gmra.mrb[14].mxu0 %vm364_vm1, %v5243_v59 }
 0x672   :  { %v5246_v2 = vpop.f32.mrb[10].mxu0 }
 0x673   :  { %v1807_v9 = vpop.f32.mrb[11].mxu0 }
 0x674   :  { %5261 = vmatprep.mubr.msk.f32.mxu0 %vm364_vm1, %v1807_v9 }
 0x675   :  { %5262 = vmatmul.mubr.msk.f32.gmra.mrb[16].mxu0 %vm364_vm1, %v5246_v2 }
 0x740   :  { %v5257_v48 = vpop.f32.mrb[12].mxu0 }
 0x741   :  { %v1918_v25 = vadd.f32 %v5257_v48, %v4606_v0  ;;  %v1912_v23 = vpop.f32.mrb[13].mxu0 }
 0x742   :  { %v1913_v43 = vadd.f32 %v4606_v0, %v1912_v23  ;;  %v347_v23 = vld [vmem:[%s6425_s27] sm:$0xff] }
 0x743   :  { %v7118_v22 = vadd.f32 %v1918_v25, %v6545_v21 }
 0x744   :  { %v7121_v16 = vadd.f32 %v1913_v43, %v6542_v19  ;;  %v5260_v57 = vpop.f32.mrb[14].mxu0  ;;  %v348_v43 = vld [vmem:[%s6425_s27 + $0x8] sm:$0xff] }
 0x745   :  { %v1928_v55 = vadd.f32 %v5260_v57, %v4606_v0  ;;  %v1922_v6 = vpop.f32.mrb[15].mxu0  ;;  %v1950_v44 = vsel %vm364_vm1, %v7118_v22, 0.0  ;;  %v349_v57 = vld [vmem:[%s6425_s27 + $0x10] sm:$0xff] }
 0x746   :  { %v1923_v50 = vadd.f32 %v4606_v0, %v1922_v6  ;;  %1951 = vadd.xlane.f32.xlu1 %v1950_v44  ;;  %v1947_v20 = vsel %vm364_vm1, %v7121_v16, 0.0  ;;  %v350_v6 = vld [vmem:[%s6425_s27 + $0x18] sm:$0xff] }
 0x747   :  { %v7128_v32 = vadd.f32 %v1928_v55, %v6553_v28  ;;  %1948 = vadd.xlane.f32.xlu0 %v1947_v20  ;;  %v5724_v55 = vpack.c.bf16 %v348_v43, %v347_v23  ;;  %v5728_v44 = vpack.c.bf16 %v350_v6, %v349_v57  ;;  %v352_v20 = vld [vmem:[%s6425_s27 + $0x28] sm:$0xff]  ;;  %v355_v6 = vld [vmem:[%s6425_s27 + $0x40] sm:$0xff] }
 0x748   :  { %v7131_v21 = vadd.f32 %v1923_v50, %v6550_v26  ;;  %v5263_v19 = vpop.f32.mrb[16].mxu0  ;;  %v351_v50 = vld [vmem:[%s6425_s27 + $0x20] sm:$0xff] }
 0x749   :  { %v1938_v4 = vadd.f32 %v5263_v19, %v4606_v0  ;;  %v1932_v31 = vpop.f32.mrb[17].mxu0  ;;  %v1956_v62 = vsel %vm364_vm1, %v7128_v32, 0.0  ;;  %5725 = vmatprep.subr.bf16.mxu0 %v5724_v55  ;;  %v5732_v19 = vpack.c.bf16 %v352_v20, %v351_v50  ;;  %v357_v20 = vld [vmem:[%s6425_s27 + $0x50] sm:$0xff] }
 0x74a   :  { %v1933_v15 = vadd.f32 %v4606_v0, %v1932_v31  ;;  %1957 = vadd.xlane.f32.xlu1 %v1956_v62  ;;  %v1953_v28 = vsel %vm364_vm1, %v7131_v21, 0.0  ;;  %5727 = vmatpush3.bf16.msra.mxu0 %v5724_v55 }
 0x74b   :  { %v7138_v49 = vadd.f32 %v1938_v4, %v6562_v35  ;;  %1954 = vadd.xlane.f32.xlu0 %v1953_v28  ;;  %5729 = vmatprep.subr.bf16.mxu0 %v5728_v44 }
 0x74c   :  { %v7141_v26 = vadd.f32 %v1933_v15, %v6560_v34 }
 0x74d   :  { %v1962_v27 = vsel %vm364_vm1, %v7138_v49, 0.0 }
 0x74e   :  { %1963 = vadd.xlane.f32.xlu1 %v1962_v27  ;;  %v1959_v61 = vsel %vm364_vm1, %v7141_v26, 0.0  ;;  %5731 = vmatpush3.bf16.msra.mxu0 %v5728_v44  ;;  %v356_v44 = vld [vmem:[%s6425_s27 + $0x48] sm:$0xff] }
 0x74f   :  { %1960 = vadd.xlane.f32.xlu0 %v1959_v61  ;;  %5733 = vmatprep.subr.bf16.mxu0 %v5732_v19  ;;  %v5740_v50 = vpack.c.bf16 %v356_v44, %v355_v6 }
 0x752   :  { %5735 = vmatpush3.bf16.msra.mxu0 %v5732_v19  ;;  %v358_v19 = vld [vmem:[%s6425_s27 + $0x58] sm:$0xff] }
 0x7d3   :  { %v1952_v34 = vpop.xlane.xlu1 %1951 }
 0x7d4   :  { %v1966_v35 = vmul.f32 0.03125, %v1952_v34  ;;  %v1949_v41 = vpop.xlane.xlu0 %1948 }
 0x7d5   :  { %v1965_v18 = vmul.f32 0.03125, %v1949_v41 }
 0x7d6   :  { %v7152_v10 = vsub.f32 %v7118_v22, %v1966_v35 }
 0x7d7   :  { %v7155_v46 = vsub.f32 %v7121_v16, %v1965_v18  ;;  %v1958_v47 = vpop.xlane.xlu1 %1957 }
 0x7d8   :  { %v1968_v54 = vmul.f32 0.03125, %v1958_v47  ;;  %v1955_v1 = vpop.xlane.xlu0 %1954  ;;  %v1978_v63 = vmul.f32 %v7152_v10, %v7152_v10 }
 0x7d9   :  { %v1967_v5 = vmul.f32 0.03125, %v1955_v1  ;;  %v1977_v39 = vmul.f32 %v7155_v46, %v7155_v46  ;;  %v4613_v1 = vld [vmem:[%s6405_s30] ss:$0 sm:$0xff]  ;;  %s7943_s30 = sld [smem:[#allocation16_spill]] }
 0x7da   :  { %v7162_v17 = vsub.f32 %v7128_v32, %v1968_v54  ;;  %v1986_v8 = vsel %vm364_vm1, %v1978_v63, 0.0 }
 0x7db   :  { %v7166_v40 = vsub.f32 %v7131_v21, %v1967_v5  ;;  %1987 = vadd.xlane.f32.xlu1 %v1986_v8  ;;  %v1964_v60 = vpop.xlane.xlu1 %1963  ;;  %v1983_v56 = vsel %vm364_vm1, %v1977_v39, 0.0  ;;  %v4614_v8 = vld [vmem:[%s7931_s0] ss:$0 sm:$0xff] }
 0x7dc   :  { %v1970_v7 = vmul.f32 0.03125, %v1964_v60  ;;  %1984 = vadd.xlane.f32.xlu0 %v1983_v56  ;;  %v1961_v29 = vpop.xlane.xlu0 %1960  ;;  %v1980_v53 = vmul.f32 %v7162_v17, %v7162_v17 }
 0x7dd   :  { %v1969_v42 = vmul.f32 0.03125, %v1961_v29  ;;  %v1979_v52 = vmul.f32 %v7166_v40, %v7166_v40 }
 0x7de   :  { %v7174_v33 = vsub.f32 %v7138_v49, %v1970_v7  ;;  %v1992_v59 = vsel %vm364_vm1, %v1980_v53, 0.0 }
 0x7df   :  { %v7178_v30 = vsub.f32 %v7141_v26, %v1969_v42  ;;  %1993 = vadd.xlane.f32.xlu1 %v1992_v59  ;;  %v1989_v2 = vsel %vm364_vm1, %v1979_v52, 0.0 }
 0x7e0   :  { %1990 = vadd.xlane.f32.xlu0 %v1989_v2  ;;  %v1982_v9 = vmul.f32 %v7174_v33, %v7174_v33 }
 0x7e1   :  { %v1981_v0 = vmul.f32 %v7178_v30, %v7178_v30 }
 0x7e2   :  { %v1998_v48 = vsel %vm364_vm1, %v1982_v9, 0.0 }
 0x7e3   :  { %1999 = vadd.xlane.f32.xlu1 %v1998_v48  ;;  %v1995_v25 = vsel %vm364_vm1, %v1981_v0, 0.0 }
 0x7e4   :  { %1996 = vadd.xlane.f32.xlu0 %v1995_v25 }
 0x868   :  { %v1988_v4 = vpop.xlane.xlu1 %1987 }
 0x869   :  { %v2002_v31 = vmul.f32 0.03125, %v1988_v4  ;;  %v1985_v62 = vpop.xlane.xlu0 %1984  ;;  %v5744_v4 = vpack.c.bf16 %v358_v19, %v357_v20  ;;  %v4622_v20 = vld [vmem:[%s7933_s9] ss:$0 sm:$0xff] }
 0x86a   :  { %v2001_v15 = vmul.f32 0.03125, %v1985_v62  ;;  %v360_v62 = vld [vmem:[%s6425_s27 + $0x68] sm:$0xff] }
 0x86b   :  { %v2008_v28 = vadd.f32 1e-05, %v2002_v31  ;;  %v359_v31 = vld [vmem:[%s6425_s27 + $0x60] sm:$0xff] }
 0x86c   :  { %v2007_v27 = vadd.f32 1e-05, %v2001_v15  ;;  %v1994_v61 = vpop.xlane.xlu1 %1993  ;;  %v5748_v15 = vpack.c.bf16 %v360_v62, %v359_v31 }
 0x86d   :  { %6092 = vrsqrt.f32 %v2008_v28  ;;  %v2004_v3 = vmul.f32 0.03125, %v1994_v61  ;;  %v1991_v45 = vpop.xlane.xlu0 %1990  ;;  %v361_v28 = vld [vmem:[%s6425_s27 + $0x70] sm:$0xff] }
 0x86e   :  { %6094 = vrsqrt.f32 %v2007_v27  ;;  %v2003_v14 = vmul.f32 0.03125, %v1991_v45  ;;  %v362_v27 = vld [vmem:[%s6425_s27 + $0x78] sm:$0xff] }
 0x86f   :  { %v2010_v58 = vadd.f32 1e-05, %v2004_v3  ;;  %v5752_v61 = vpack.c.bf16 %v362_v27, %v361_v28  ;;  %v4615_v3 = vld [vmem:[%s7932_s5] ss:$0 sm:$0xff] }
 0x870   :  { %v2009_v51 = vadd.f32 1e-05, %v2003_v14  ;;  %v2000_v13 = vpop.xlane.xlu1 %1999 }
 0x871   :  { %6096 = vrsqrt.f32 %v2010_v58  ;;  %v2006_v34 = vmul.f32 0.03125, %v2000_v13  ;;  %v1997_v35 = vpop.xlane.xlu0 %1996 }
 0x872   :  { %6098 = vrsqrt.f32 %v2009_v51  ;;  %v2005_v41 = vmul.f32 0.03125, %v1997_v35 }
 0x873   :  { %v2012_v18 = vadd.f32 1e-05, %v2006_v34 }
 0x874   :  { %v2011_v47 = vadd.f32 1e-05, %v2005_v41 }
 0x875   :  { %6100 = vrsqrt.f32 %v2012_v18 }
 0x876   :  { %6102 = vrsqrt.f32 %v2011_v47 }
 0x877   :  { %v6093_v54 = vpop.eup %6092 }
 0x878   :  { %v6095_v63 = vpop.eup %6094  ;;  %v2020_v5 = vmul.f32 %v6093_v54, %v7152_v10 }
 0x879   :  { %v2019_v39 = vmul.f32 %v6095_v63, %v7155_v46 }
 0x87a   :  { %v2032_v60 = vmul.f32 %v4613_v1, %v2020_v5 }
 0x87b   :  { %v6097_v56 = vpop.eup %6096  ;;  %v2031_v7 = vmul.f32 %v4613_v1, %v2019_v39 }
 0x87c   :  { %v6099_v29 = vpop.eup %6098  ;;  %v2022_v53 = vmul.f32 %v6097_v56, %v7162_v17  ;;  %v2044_v59 = vadd.f32 %v4614_v8, %v2032_v60 }
 0x87d   :  { %v2043_v42 = vadd.f32 %v4614_v8, %v2031_v7  ;;  %v2021_v52 = vmul.f32 %v6099_v29, %v7166_v40 }
 0x87e   :  { %v2034_v2 = vmul.f32 %v4613_v1, %v2022_v53 }
 0x87f   :  { %v6101_v9 = vpop.eup %6100  ;;  %5272 = vmatprep.mubr.msk.f32.mxu1 %vm364_vm1, %v2043_v42  ;;  %v2033_v0 = vmul.f32 %v4613_v1, %v2021_v52 }
 0x880   :  { %v6103_v10 = vpop.eup %6102  ;;  %5273 = vmatmul.mubr.msk.f32.vlgmr.msra.gmra.mrb[42].mxu1 %vm364_vm1, %v2044_v59  ;;  %v2024_v46 = vmul.f32 %v6101_v9, %v7174_v33  ;;  %v2046_v25 = vadd.f32 %v4614_v8, %v2034_v2  ;;  %v353_v33 = vld [vmem:[%s6425_s27 + $0x30] sm:$0xff] }
 0x881   :  { %v2045_v48 = vadd.f32 %v4614_v8, %v2033_v0  ;;  %v2023_v17 = vmul.f32 %v6103_v10, %v7178_v30  ;;  %v354_v30 = vld [vmem:[%s6425_s27 + $0x38] sm:$0xff]  ;;  %s7945_s27 = sld [smem:[#allocation19_spill]] }
 0x882   :  { %v2036_v40 = vmul.f32 %v4613_v1, %v2024_v46  ;;  %v5736_v55 = vpack.c.bf16 %v354_v30, %v353_v33 }
 0x883   :  { %5275 = vmatprep.mubr.msk.f32.mxu1 %vm364_vm1, %v2045_v48  ;;  %v2035_v23 = vmul.f32 %v4613_v1, %v2023_v17 }
 0x884   :  { %5276 = vmatmul.mubr.msk.f32.gmra.mrb[44].mxu1 %vm364_vm1, %v2046_v25  ;;  %v2048_v57 = vadd.f32 %v4614_v8, %v2036_v40  ;;  %5737 = vmatprep.subr.bf16.mxu0 %v5736_v55 }
 0x885   :  { %v2047_v43 = vadd.f32 %v4614_v8, %v2035_v23  ;;  %5739 = vmatpush3.bf16.msra.mxu0 %v5736_v55 }
 0x886   :  { %5741 = vmatprep.subr.bf16.mxu0 %v5740_v50 }
 0x887   :  { %5278 = vmatprep.mubr.msk.f32.mxu1 %vm364_vm1, %v2047_v43 }
 0x888   :  { %5279 = vmatmul.mubr.msk.f32.gmra.mrb[46].mxu1 %vm364_vm1, %v2048_v57 }
 0x889   :  { %5743 = vmatpush3.bf16.msra.mxu0 %v5740_v50 }
 0x88a   :  { %5745 = vmatprep.subr.bf16.mxu0 %v5744_v4 }
 0x88d   :  { %5747 = vmatpush3.bf16.msra.mxu0 %v5744_v4 }
 0x88e   :  { %5749 = vmatprep.subr.bf16.mxu0 %v5748_v15 }
 0x891   :  { %5751 = vmatpush3.bf16.msra.mxu0 %v5748_v15 }
 0x892   :  { %5753 = vmatprep.subr.bf16.mxu0 %v5752_v61 }
 0x895   :  { %5755 = vmatpush3.bf16.msra.mxu0 %v5752_v61 }
 0x953   :  { %v5274_v45 = vpop.f32.mrb[42].mxu1 }
 0x954   :  { %v2145_v14 = vadd.f32 %v5274_v45, %v4615_v3  ;;  %v2139_v58 = vpop.f32.mrb[43].mxu1 }
 0x955   :  { %v2140_v51 = vadd.f32 %v4615_v3, %v2139_v58 }
 0x956   :  { %v2175_v13 = vmul.f32 0.70710677, %v2145_v14  ;;  %v2169_v59 = vmul.f32 0.5, %v2145_v14 }
 0x957   :  { %v2174_v34 = vmul.f32 0.70710677, %v2140_v51  ;;  %v5277_v35 = vpop.f32.mrb[44].mxu1  ;;  %v2168_v42 = vmul.f32 0.5, %v2140_v51 }
 0x958   :  { %6104 = verf.f32 %v2175_v13  ;;  %v2155_v41 = vadd.f32 %v5277_v35, %v4615_v3  ;;  %v2149_v18 = vpop.f32.mrb[45].mxu1 }
 0x959   :  { %6106 = verf.f32 %v2174_v34  ;;  %v2150_v47 = vadd.f32 %v4615_v3, %v2149_v18 }
 0x95a   :  { %v2177_v54 = vmul.f32 0.70710677, %v2155_v41  ;;  %v2171_v25 = vmul.f32 0.5, %v2155_v41 }
 0x95b   :  { %v2176_v1 = vmul.f32 0.70710677, %v2150_v47  ;;  %v5280_v63 = vpop.f32.mrb[46].mxu1  ;;  %v2170_v48 = vmul.f32 0.5, %v2150_v47 }
 0x95c   :  { %6108 = verf.f32 %v2177_v54  ;;  %v2165_v5 = vadd.f32 %v5280_v63, %v4615_v3  ;;  %v2159_v39 = vpop.f32.mrb[47].mxu1 }
 0x95d   :  { %6110 = verf.f32 %v2176_v1  ;;  %v2160_v8 = vadd.f32 %v4615_v3, %v2159_v39 }
 0x95e   :  { %v2179_v60 = vmul.f32 0.70710677, %v2165_v5  ;;  %v2173_v6 = vmul.f32 0.5, %v2165_v5 }
 0x95f   :  { %v2178_v56 = vmul.f32 0.70710677, %v2160_v8  ;;  %v2172_v30 = vmul.f32 0.5, %v2160_v8 }
 0x960   :  { %6112 = verf.f32 %v2179_v60 }
 0x961   :  { %6114 = verf.f32 %v2178_v56 }
 0x962   :  { %v6105_v7 = vpop.eup %6104 }
 0x963   :  { %v6107_v29 = vpop.eup %6106  ;;  %v2187_v53 = vadd.f32 1.0, %v6105_v7 }
 0x964   :  { %v2186_v52 = vadd.f32 1.0, %v6107_v29 }
 0x965   :  { %v2193_v10 = vmul.f32 %v2187_v53, %v2169_v59 }
 0x966   :  { %v6109_v2 = vpop.eup %6108  ;;  %v2192_v9 = vmul.f32 %v2186_v52, %v2168_v42 }
 0x967   :  { %v6111_v0 = vpop.eup %6110  ;;  %v2189_v46 = vadd.f32 1.0, %v6109_v2 }
 0x968   :  { %v2188_v17 = vadd.f32 1.0, %v6111_v0  ;;  %5313 = vmatprep.mubr.f32.mxu0 %v2192_v9 }
 0x969   :  { %5314 = vmatmul.mubr.f32.vlgmr.msra.gmra.mrb[18].mxu0 %v2193_v10  ;;  %v2195_v33 = vmul.f32 %v2189_v46, %v2171_v25 }
 0x96a   :  { %v6113_v40 = vpop.eup %6112  ;;  %v2194_v23 = vmul.f32 %v2188_v17, %v2170_v48 }
 0x96b   :  { %v6115_v43 = vpop.eup %6114  ;;  %v2191_v57 = vadd.f32 1.0, %v6113_v40 }
 0x96c   :  { %v2190_v55 = vadd.f32 1.0, %v6115_v43  ;;  %5316 = vmatprep.mubr.f32.mxu0 %v2194_v23 }
 0x96d   :  { %5317 = vmatmul.mubr.f32.gmra.mrb[20].mxu0 %v2195_v33  ;;  %v2197_v50 = vmul.f32 %v2191_v57, %v2173_v6  ;;  %v2307_v6 = vld [vmem:[%s7934_s13] sm:$0xff] }
 0x96e   :  { %v2196_v44 = vmul.f32 %v2190_v55, %v2172_v30 }
 0x970   :  { %5319 = vmatprep.mubr.f32.mxu0 %v2196_v44  ;;  %v2308_v44 = vld [vmem:[%s7934_s13 + $0x8] sm:$0xff] }
 0x971   :  { %5320 = vmatmul.mubr.f32.gmra.mrb[22].mxu0 %v2197_v50  ;;  %v2315_v50 = vld [vmem:[%s7935_s25] sm:$0xff] }
 0xa3c   :  { %v5315_v19 = vpop.f32.mrb[18].mxu0 }
 0xa3d   :  { %v2276_v4 = vadd.f32 %v5315_v19, %v4622_v20  ;;  %v2270_v31 = vpop.f32.mrb[19].mxu0  ;;  %v2316_v19 = vld [vmem:[%s7935_s25 + $0x8] sm:$0xff] }
 0xa3e   :  { %v2271_v62 = vadd.f32 %v4622_v20, %v2270_v31  ;;  %v2309_v31 = vld [vmem:[%s7934_s13 + $0x10] sm:$0xff] }
 0xa3f   :  { %v7220_v15 = vadd.f32 %v2276_v4, %v7118_v22  ;;  %v5772_v4 = vpack.c.bf16 %v2316_v19, %v2315_v50 }
 0xa40   :  { %v7223_v28 = vadd.f32 %v2271_v62, %v7121_v16  ;;  %v5318_v27 = vpop.f32.mrb[20].mxu0  ;;  %v2310_v62 = vld [vmem:[%s7934_s13 + $0x18] sm:$0xff] }
 0xa41   :  { %v2286_v61 = vadd.f32 %v5318_v27, %v4622_v20  ;;  %v2280_v3 = vpop.f32.mrb[21].mxu0  ;;  %v2351_v45 = vsel %vm364_vm1, %v7220_v15, 0.0  ;;  %5773 = vmatprep.subr.bf16.mxu0 %v5772_v4  ;;  %v2317_v27 = vld [vmem:[%s7935_s25 + $0x10] sm:$0xff] }
 0xa42   :  { %v2281_v14 = vadd.f32 %v4622_v20, %v2280_v3  ;;  %2352 = vadd.xlane.f32.xlu1 %v2351_v45  ;;  %v2348_v58 = vsel %vm364_vm1, %v7223_v28, 0.0  ;;  %5775 = vmatpush3.bf16.msra.mxu0 %v5772_v4  ;;  %v2318_v3 = vld [vmem:[%s7935_s25 + $0x18] sm:$0xff] }
 0xa43   :  { %v7230_v51 = vadd.f32 %v2286_v61, %v7128_v32  ;;  %2349 = vadd.xlane.f32.xlu0 %v2348_v58  ;;  %v5760_v61 = vpack.c.bf16 %v2310_v62, %v2309_v31  ;;  %v5776_v45 = vpack.c.bf16 %v2318_v3, %v2317_v27  ;;  %v2312_v58 = vld [vmem:[%s7936_s29 + $0x8] sm:$0xff] }
 0xa44   :  { %v7233_v22 = vadd.f32 %v2281_v14, %v7131_v21  ;;  %v5321_v16 = vpop.f32.mrb[22].mxu0  ;;  %v2311_v14 = vld [vmem:[%s7936_s29] sm:$0xff] }
 0xa45   :  { %v2296_v13 = vadd.f32 %v5321_v16, %v4622_v20  ;;  %v2290_v34 = vpop.f32.mrb[23].mxu0  ;;  %v2357_v35 = vsel %vm364_vm1, %v7230_v51, 0.0  ;;  %5777 = vmatprep.subr.bf16.mxu0 %v5776_v45  ;;  %v5764_v16 = vpack.c.bf16 %v2312_v58, %v2311_v14 }
 0xa46   :  { %v2291_v41 = vadd.f32 %v4622_v20, %v2290_v34  ;;  %2358 = vadd.xlane.f32.xlu1 %v2357_v35  ;;  %v2354_v18 = vsel %vm364_vm1, %v7233_v22, 0.0  ;;  %v5756_v20 = vpack.c.bf16 %v2308_v44, %v2307_v6  ;;  %5779 = vmatpush3.bf16.msra.mxu0 %v5776_v45 }
 0xa47   :  { %v7240_v47 = vadd.f32 %v2296_v13, %v7138_v49  ;;  %2355 = vadd.xlane.f32.xlu0 %v2354_v18 }
 0xa48   :  { %v7243_v32 = vadd.f32 %v2291_v41, %v7141_v26  ;;  %5757 = vmatprep.subr.bf16.mxu1 %v5756_v20 }
 0xa49   :  { %v2363_v21 = vsel %vm364_vm1, %v7240_v47, 0.0  ;;  %5759 = vmatpush3.bf16.msra.mxu1 %v5756_v20 }
 0xa4a   :  { %2364 = vadd.xlane.f32.xlu1 %v2363_v21  ;;  %v2360_v54 = vsel %vm364_vm1, %v7243_v32, 0.0  ;;  %5761 = vmatprep.subr.bf16.mxu1 %v5760_v61 }
 0xa4b   :  { %2361 = vadd.xlane.f32.xlu0 %v2360_v54 }
 0xa4d   :  { %5763 = vmatpush3.bf16.msra.mxu1 %v5760_v61 }
 0xa4e   :  { %5765 = vmatprep.subr.bf16.mxu1 %v5764_v16 }
 0xacf   :  { %v2353_v1 = vpop.xlane.xlu1 %2352 }
 0xad0   :  { %v2367_v63 = vmul.f32 0.03125, %v2353_v1  ;;  %v2350_v5 = vpop.xlane.xlu0 %2349 }
 0xad1   :  { %v2366_v39 = vmul.f32 0.03125, %v2350_v5 }
 0xad2   :  { %v7250_v8 = vsub.f32 %v7220_v15, %v2367_v63 }
 0xad3   :  { %v7253_v49 = vsub.f32 %v7223_v28, %v2366_v39  ;;  %v2359_v26 = vpop.xlane.xlu1 %2358 }
 0xad4   :  { %v2369_v60 = vmul.f32 0.03125, %v2359_v26  ;;  %v2356_v56 = vpop.xlane.xlu0 %2355  ;;  %v2379_v7 = vmul.f32 %v7250_v8, %v7250_v8 }
 0xad5   :  { %v2368_v29 = vmul.f32 0.03125, %v2356_v56  ;;  %v2378_v53 = vmul.f32 %v7253_v49, %v7253_v49 }
 0xad6   :  { %v7260_v42 = vsub.f32 %v7230_v51, %v2369_v60  ;;  %v2387_v52 = vsel %vm364_vm1, %v2379_v7, 0.0 }
 0xad7   :  { %v7264_v59 = vsub.f32 %v7233_v22, %v2368_v29  ;;  %2388 = vadd.xlane.f32.xlu1 %v2387_v52  ;;  %v2365_v2 = vpop.xlane.xlu1 %2364  ;;  %v2384_v9 = vsel %vm364_vm1, %v2378_v53, 0.0 }
 0xad8   :  { %v2371_v0 = vmul.f32 0.03125, %v2365_v2  ;;  %2385 = vadd.xlane.f32.xlu0 %v2384_v9  ;;  %v2362_v10 = vpop.xlane.xlu0 %2361  ;;  %v2381_v46 = vmul.f32 %v7260_v42, %v7260_v42  ;;  %v4623_v9 = vld [vmem:[%s7937_s3] ss:$0 sm:$0xff] }
 0xad9   :  { %v2370_v48 = vmul.f32 0.03125, %v2362_v10  ;;  %v2380_v17 = vmul.f32 %v7264_v59, %v7264_v59 }
 0xada   :  { %v7272_v25 = vsub.f32 %v7240_v47, %v2371_v0  ;;  %v2393_v40 = vsel %vm364_vm1, %v2381_v46, 0.0 }
 0xadb   :  { %v7276_v23 = vsub.f32 %v7243_v32, %v2370_v48  ;;  %2394 = vadd.xlane.f32.xlu1 %v2393_v40  ;;  %v2390_v43 = vsel %vm364_vm1, %v2380_v17, 0.0  ;;  %v4624_v48 = vld [vmem:[%s7938_s8] ss:$0 sm:$0xff] }
 0xadc   :  { %2391 = vadd.xlane.f32.xlu0 %v2390_v43  ;;  %v2383_v57 = vmul.f32 %v7272_v25, %v7272_v25 }
 0xadd   :  { %v2382_v33 = vmul.f32 %v7276_v23, %v7276_v23 }
 0xade   :  { %v2399_v30 = vsel %vm364_vm1, %v2383_v57, 0.0  ;;  %v2313_v57 = vld [vmem:[%s7936_s29 + $0x10] sm:$0xff] }
 0xadf   :  { %2400 = vadd.xlane.f32.xlu1 %v2399_v30  ;;  %v2396_v55 = vsel %vm364_vm1, %v2382_v33, 0.0  ;;  %v2314_v33 = vld [vmem:[%s7936_s29 + $0x18] sm:$0xff] }
 0xae0   :  { %2397 = vadd.xlane.f32.xlu0 %v2396_v55  ;;  %v5768_v19 = vpack.c.bf16 %v2314_v33, %v2313_v57 }
 0xb64   :  { %v2389_v13 = vpop.xlane.xlu1 %2388 }
 0xb65   :  { %v2403_v34 = vmul.f32 0.03125, %v2389_v13  ;;  %v2386_v35 = vpop.xlane.xlu0 %2385 }
 0xb66   :  { %v2402_v41 = vmul.f32 0.03125, %v2386_v35 }
 0xb67   :  { %v2409_v18 = vadd.f32 1e-05, %v2403_v34 }
 0xb68   :  { %v2408_v21 = vadd.f32 1e-05, %v2402_v41  ;;  %v2395_v54 = vpop.xlane.xlu1 %2394 }
 0xb69   :  { %6116 = vrsqrt.f32 %v2409_v18  ;;  %v2405_v1 = vmul.f32 0.03125, %v2395_v54  ;;  %v2392_v63 = vpop.xlane.xlu0 %2391 }
 0xb6a   :  { %6118 = vrsqrt.f32 %v2408_v21  ;;  %v2404_v5 = vmul.f32 0.03125, %v2392_v63 }
 0xb6b   :  { %v2411_v39 = vadd.f32 1e-05, %v2405_v1 }
 0xb6c   :  { %v2410_v26 = vadd.f32 1e-05, %v2404_v5  ;;  %v2401_v60 = vpop.xlane.xlu1 %2400 }
 0xb6d   :  { %6120 = vrsqrt.f32 %v2411_v39  ;;  %v2407_v56 = vmul.f32 0.03125, %v2401_v60  ;;  %v2398_v7 = vpop.xlane.xlu0 %2397 }
 0xb6e   :  { %6122 = vrsqrt.f32 %v2410_v26  ;;  %v2406_v29 = vmul.f32 0.03125, %v2398_v7 }
 0xb6f   :  { %v2413_v53 = vadd.f32 1e-05, %v2407_v56 }
 0xb70   :  { %v2412_v52 = vadd.f32 1e-05, %v2406_v29 }
 0xb71   :  { %6124 = vrsqrt.f32 %v2413_v53 }
 0xb72   :  { %6126 = vrsqrt.f32 %v2412_v52 }
 0xb73   :  { %v6117_v2 = vpop.eup %6116 }
 0xb74   :  { %v6119_v0 = vpop.eup %6118  ;;  %v2421_v10 = vmul.f32 %v6117_v2, %v7250_v8 }
 0xb75   :  { %v2420_v46 = vmul.f32 %v6119_v0, %v7253_v49 }
 0xb76   :  { %v2433_v17 = vmul.f32 %v4623_v9, %v2421_v10 }
 0xb77   :  { %v6121_v40 = vpop.eup %6120  ;;  %v2432_v43 = vmul.f32 %v4623_v9, %v2420_v46 }
 0xb78   :  { %v6123_v30 = vpop.eup %6122  ;;  %v2423_v55 = vmul.f32 %v6121_v40, %v7260_v42  ;;  %v2445_v50 = vadd.f32 %v4624_v48, %v2433_v17 }
 0xb79   :  { %v2444_v6 = vadd.f32 %v4624_v48, %v2432_v43  ;;  %v2422_v44 = vmul.f32 %v6123_v30, %v7264_v59 }
 0xb7a   :  { %v2435_v20 = vmul.f32 %v4623_v9, %v2423_v55 }
 0xb7b   :  { %v6125_v4 = vpop.eup %6124  ;;  %5330 = vmatprep.mubr.msk.f32.mxu1 %vm364_vm1, %v2444_v6  ;;  %5364 = vmatprep.mubr.msk.f32.mxu0 %vm364_vm1, %v2444_v6  ;;  %v2434_v8 = vmul.f32 %v4623_v9, %v2422_v44 }
 0xb7c   :  { %v6127_v49 = vpop.eup %6126  ;;  %5331 = vmatmul.mubr.msk.f32.vlgmr.msra.gmra.mrb[48].mxu1 %vm364_vm1, %v2445_v50  ;;  %5365 = vmatmul.mubr.msk.f32.vlgmr.msra.gmra.mrb[24].mxu0 %vm364_vm1, %v2445_v50  ;;  %v2425_v31 = vmul.f32 %v6125_v4, %v7272_v25  ;;  %v2447_v62 = vadd.f32 %v4624_v48, %v2435_v20 }
 0xb7d   :  { %5767 = vmatpush3.bf16.msra.mxu1 %v5764_v16  ;;  %v2446_v42 = vadd.f32 %v4624_v48, %v2434_v8  ;;  %v2424_v59 = vmul.f32 %v6127_v49, %v7276_v23 }
 0xb7e   :  { %5769 = vmatprep.subr.bf16.mxu1 %v5768_v19  ;;  %v2437_v27 = vmul.f32 %v4623_v9, %v2425_v31 }
 0xb7f   :  { %5333 = vmatprep.mubr.msk.f32.mxu1 %vm364_vm1, %v2446_v42  ;;  %5367 = vmatprep.mubr.msk.f32.mxu0 %vm364_vm1, %v2446_v42  ;;  %v2436_v61 = vmul.f32 %v4623_v9, %v2424_v59 }
 0xb80   :  { %5334 = vmatmul.mubr.msk.f32.gmra.mrb[50].mxu1 %vm364_vm1, %v2447_v62  ;;  %5368 = vmatmul.mubr.msk.f32.gmra.mrb[26].mxu0 %vm364_vm1, %v2447_v62  ;;  %v2449_v45 = vadd.f32 %v4624_v48, %v2437_v27 }
 0xb81   :  { %v2448_v3 = vadd.f32 %v4624_v48, %v2436_v61  ;;  %5771 = vmatpush3.bf16.msra.mxu1 %v5768_v19 }
 0xb83   :  { %5336 = vmatprep.mubr.msk.f32.mxu1 %vm364_vm1, %v2448_v3  ;;  %5370 = vmatprep.mubr.msk.f32.mxu0 %vm364_vm1, %v2448_v3 }
 0xb84   :  { %5337 = vmatmul.mubr.msk.f32.gmra.mrb[52].mxu1 %vm364_vm1, %v2449_v45  ;;  %5371 = vmatmul.mubr.msk.f32.gmra.mrb[28].mxu0 %vm364_vm1, %v2449_v45 }
 0xb85   :  { %5347 = vmatprep.mubr.msk.f32.mxu1 %vm364_vm1, %v2444_v6 }
 0xb88   :  { %5348 = vmatmul.mubr.msk.f32.vlgmr.msra.gmra.mrb[54].mxu1 %vm364_vm1, %v2445_v50 }
 0xb89   :  { %5350 = vmatprep.mubr.msk.f32.mxu1 %vm364_vm1, %v2446_v42 }
 0xb8c   :  { %5351 = vmatmul.mubr.msk.f32.gmra.mrb[56].mxu1 %vm364_vm1, %v2447_v62 }
 0xb8d   :  { %5353 = vmatprep.mubr.msk.f32.mxu1 %vm364_vm1, %v2448_v3 }
 0xb90   :  { %5354 = vmatmul.mubr.msk.f32.gmra.mrb[58].mxu1 %vm364_vm1, %v2449_v45 }
 0xc4f   :  { %v7323_v25 = vpop.f32.mrb[48].mxu1  ;;  %v5366_v23 = vpop.f32.mrb[24].mxu0 }
 0xc50   :  { %v7325_v14 = vpop.f32.mrb[49].mxu1  ;;  %v2724_v58 = vpop.f32.mrb[25].mxu0  ;;  %v3323_v35 = vmul.f32 %v5366_v23, %v6675_v36  ;;  %v3317_v54 = vmul.f32 %v5366_v23, %v6645_v12  ;;  %v3555_v1 = vmul.f32 %v5366_v23, %v6678_v37  ;;  %v3680_v63 = vmul.f32 %v5366_v23, %v6681_v38 }
 0xc51   :  { %v2753_v16 = vmul.f32 %v7325_v14, %v6645_v12  ;;  %v3322_v41 = vmul.f32 %v2724_v58, %v6675_v36  ;;  %v3316_v5 = vmul.f32 %v2724_v58, %v6645_v12  ;;  %v3554_v39 = vmul.f32 %v2724_v58, %v6678_v37 }
 0xc52   :  { %v3679_v0 = vmul.f32 %v2724_v58, %v6681_v38 }
 0xc53   :  { %v7329_v13 = vpop.f32.mrb[50].mxu1  ;;  %v5369_v34 = vpop.f32.mrb[26].mxu0  ;;  %5385 = vmatprep.mubr.msk.f32.mxu1 %vm364_vm1, %v2753_v16  ;;  %v5798_v52 = vpack.c.bf16 %v3323_v35, %v3322_v41  ;;  %v7362_v4 = vpack.c.bf16 %v3317_v54, %v3316_v5  ;;  %v7368_v59 = vpack.c.bf16 %v3555_v1, %v3554_v39  ;;  %v2759_v5 = vmul.f32 %v7325_v14, %v6675_v36 }
 0xc54   :  { %v7334_v18 = vpop.f32.mrb[51].mxu1  ;;  %v2734_v21 = vpop.f32.mrb[27].mxu0  ;;  %v3319_v26 = vmul.f32 %v5369_v34, %v6645_v12  ;;  %v3325_v7 = vmul.f32 %v5369_v34, %v6675_v36  ;;  %v3557_v10 = vmul.f32 %v5369_v34, %v6678_v37  ;;  %v3682_v17 = vmul.f32 %v5369_v34, %v6681_v38 }
 0xc55   :  { %v3318_v29 = vmul.f32 %v2734_v21, %v6645_v12  ;;  %v3324_v53 = vmul.f32 %v2734_v21, %v6675_v36  ;;  %v3556_v40 = vmul.f32 %v2734_v21, %v6678_v37  ;;  %v3681_v43 = vmul.f32 %v2734_v21, %v6681_v38  ;;  %5799 = vmatprep.subr.bf16.mxu0 %v5798_v52 }
 0xc56   :  { %5801 = vmatpush3.bf16.msra.mxu0 %v5798_v52  ;;  %v7374_v61 = vpack.c.bf16 %v3680_v63, %v3679_v0  ;;  %v2754_v21 = vmul.f32 %v7323_v25, %v6645_v12  ;;  %v2755_v54 = vmul.f32 %v7334_v18, %v6645_v12  ;;  %v2756_v1 = vmul.f32 %v7329_v13, %v6645_v12 }
 0xc57   :  { %v7342_v60 = vpop.f32.mrb[52].mxu1  ;;  %v5372_v56 = vpop.f32.mrb[28].mxu0  ;;  %v5802_v20 = vpack.c.bf16 %v3325_v7, %v3324_v53  ;;  %v7364_v8 = vpack.c.bf16 %v3319_v26, %v3318_v29  ;;  %v7370_v62 = vpack.c.bf16 %v3557_v10, %v3556_v40  ;;  %v7376_v3 = vpack.c.bf16 %v3682_v17, %v3681_v43 }
 0xc58   :  { %v7347_v2 = vpop.f32.mrb[53].mxu1  ;;  %v2744_v9 = vpop.f32.mrb[29].mxu0  ;;  %v3321_v46 = vmul.f32 %v5372_v56, %v6645_v12  ;;  %v3327_v48 = vmul.f32 %v5372_v56, %v6675_v36  ;;  %v3559_v57 = vmul.f32 %v5372_v56, %v6678_v37  ;;  %v3684_v33 = vmul.f32 %v5372_v56, %v6681_v38 }
 0xc59   :  { %v3320_v30 = vmul.f32 %v2744_v9, %v6645_v12  ;;  %v3326_v55 = vmul.f32 %v2744_v9, %v6675_v36  ;;  %v3558_v6 = vmul.f32 %v2744_v9, %v6678_v37  ;;  %v3683_v50 = vmul.f32 %v2744_v9, %v6681_v38  ;;  %5803 = vmatprep.subr.bf16.mxu0 %v5802_v20 }
 0xc5a   :  { %5805 = vmatpush3.bf16.msra.mxu0 %v5802_v20  ;;  %v2757_v63 = vmul.f32 %v7347_v2, %v6645_v12  ;;  %v2758_v24 = vmul.f32 %v7342_v60, %v6645_v12  ;;  %v2760_v39 = vmul.f32 %v7323_v25, %v6675_v36  ;;  %v2761_v26 = vmul.f32 %v7334_v18, %v6675_v36  ;;  %v6252_v20 = vld [vmem:[%s6360_s17 + $0x48] sm:$0xff] }
 0xc5b   :  { %v5349_v44 = vpop.f32.mrb[54].mxu1  ;;  %v5806_v31 = vpack.c.bf16 %v3327_v48, %v3326_v55  ;;  %v7366_v42 = vpack.c.bf16 %v3321_v46, %v3320_v30  ;;  %v7372_v27 = vpack.c.bf16 %v3559_v57, %v3558_v6  ;;  %v7380_v23 = vpack.c.bf16 %v3684_v33, %v3683_v50  ;;  %v6250_v30 = vld [vmem:[%s6360_s17 + $0x38] sm:$0xff]  ;;  %v6251_v6 = vld [vmem:[%s6360_s17 + $0x30] sm:$0xff] }
 0xc5c   :  { %v2629_v19 = vpop.f32.mrb[55].mxu1  ;;  %v2762_v12 = vmul.f32 %v7329_v13, %v6675_v36  ;;  %v2763_v56 = vmul.f32 %v7347_v2, %v6675_v36  ;;  %v2764_v7 = vmul.f32 %v7342_v60, %v6675_v36  ;;  %v2765_v29 = vmul.f32 %v7325_v14, %v6678_v37 }
 0xc5d   :  { %v5780_v49 = vpack.c.bf16 %v5349_v44, %v2629_v19  ;;  %5807 = vmatprep.subr.bf16.mxu0 %v5806_v31  ;;  %v2766_v53 = vmul.f32 %v7323_v25, %v6678_v37  ;;  %v2767_v52 = vmul.f32 %v7334_v18, %v6678_v37  ;;  %v2768_v36 = vmul.f32 %v7329_v13, %v6678_v37 }
 0xc5e   :  { %5809 = vmatpush3.bf16.msra.mxu0 %v5806_v31  ;;  %v2769_v9 = vmul.f32 %v7347_v2, %v6678_v37  ;;  %v2770_v0 = vmul.f32 %v7342_v60, %v6678_v37  ;;  %v2771_v10 = vmul.f32 %v7325_v14, %v6681_v38  ;;  %v2772_v46 = vmul.f32 %v7323_v25, %v6681_v38  ;;  %v6253_v31 = vld [vmem:[%s6360_s17 + $0x40] sm:$0xff] }
 0xc5f   :  { %v5352_v45 = vpop.f32.mrb[56].mxu1  ;;  %5782 = vmatprep.subr.msk.bf16.mxu1 %vm6664_vm3, %v5780_v49  ;;  %5811 = vmatprep.subr.bf16.mxu0 %v7362_v4  ;;  %v2773_v48 = vmul.f32 %v7334_v18, %v6681_v38  ;;  %v2774_v37 = vmul.f32 %v7329_v13, %v6681_v38  ;;  %v2775_v14 = vmul.f32 %v7347_v2, %v6681_v38 }
 0xc60   :  { %v2639_v58 = vpop.f32.mrb[57].mxu1  ;;  %5785 = vmatpush3.bf16.xpose.msk.msra.mxu1 %vm6664_vm3, %v5780_v49  ;;  %v2776_v25 = vmul.f32 %v7342_v60, %v6681_v38 }
 0xc61   :  { %v5786_v16 = vpack.c.bf16 %v5352_v45, %v2639_v58 }
 0xc63   :  { %v5355_v34 = vpop.f32.mrb[58].mxu1  ;;  %5788 = vmatprep.subr.msk.bf16.mxu1 %vm6664_vm3, %v5786_v16 }
 0xc64   :  { %v2649_v35 = vpop.f32.mrb[59].mxu1 }
 0xc65   :  { %v5792_v41 = vpack.c.bf16 %v5355_v34, %v2649_v35  ;;  %v6254_v35 = vld [vmem:[%s6360_s17 + $0x58] sm:$0xff] }
 0xc68   :  { %5791 = vmatpush3.bf16.xpose.msk.msra.mxu1 %vm6664_vm3, %v5786_v16 }
 0xc69   :  { %5794 = vmatprep.subr.msk.bf16.mxu1 %vm6664_vm3, %v5792_v41 }
 0xc70   :  { %5797 = vmatpush3.bf16.xpose.msk.msra.mxu1 %vm6664_vm3, %v5792_v41 }
 0xc77   :  { %5386 = vmatmul.mubr.msk.f32.vlgmr.msra.gmra.mrb[60].mxu1 %vm364_vm1, %v2754_v21 }
 0xc78   :  { %5388 = vmatprep.mubr.msk.f32.mxu1 %vm364_vm1, %v2755_v54  ;;  %v6255_v54 = vld [vmem:[%s6360_s17 + $0x50] sm:$0xff] }
 0xc7b   :  { %5389 = vmatmul.mubr.msk.f32.gmra.mrb[62].mxu1 %vm364_vm1, %v2756_v1 }
 0xc7c   :  { %5391 = vmatprep.mubr.msk.f32.mxu1 %vm364_vm1, %v2757_v63  ;;  %v6256_v63 = vld [vmem:[%s6360_s17 + $0x8] sm:$0xff] }
 0xc7f   :  { %5392 = vmatmul.mubr.msk.f32.gmra.mrb[64].mxu1 %vm364_vm1, %v2758_v24 }
 0xc80   :  { %5394 = vmatprep.mubr.msk.f32.mxu1 %vm364_vm1, %v2759_v5 }
 0xc83   :  { %5395 = vmatmul.mubr.msk.f32.gmra.mrb[66].mxu1 %vm364_vm1, %v2760_v39  ;;  %v6257_v39 = vld [vmem:[%s6360_s17] sm:$0xff] }
 0xc84   :  { %5397 = vmatprep.mubr.msk.f32.mxu1 %vm364_vm1, %v2761_v26 }
 0xc87   :  { %5398 = vmatmul.mubr.msk.f32.gmra.mrb[68].mxu1 %vm364_vm1, %v2762_v12 }
 0xc88   :  { %5400 = vmatprep.mubr.msk.f32.mxu1 %vm364_vm1, %v2763_v56 }
 0xc8b   :  { %5401 = vmatmul.mubr.msk.f32.gmra.mrb[70].mxu1 %vm364_vm1, %v2764_v7 }
 0xc8c   :  { %5403 = vmatprep.mubr.msk.f32.mxu1 %vm364_vm1, %v2765_v29  ;;  %v6258_v29 = vld [vmem:[%s6360_s17 + $0x18] sm:$0xff] }
 0xc8f   :  { %5404 = vmatmul.mubr.msk.f32.gmra.mrb[72].mxu1 %vm364_vm1, %v2766_v53 }
 0xc90   :  { %5406 = vmatprep.mubr.msk.f32.mxu1 %vm364_vm1, %v2767_v52 }
 0xc93   :  { %5407 = vmatmul.mubr.msk.f32.gmra.mrb[74].mxu1 %vm364_vm1, %v2768_v36  ;;  %v6259_v36 = vld [vmem:[%s6360_s17 + $0x10] sm:$0xff] }
 0xc94   :  { %5409 = vmatprep.mubr.msk.f32.mxu1 %vm364_vm1, %v2769_v9 }
 0xc97   :  { %5410 = vmatmul.mubr.msk.f32.gmra.mrb[76].mxu1 %vm364_vm1, %v2770_v0 }
 0xc98   :  { %5412 = vmatprep.mubr.msk.f32.mxu1 %vm364_vm1, %v2771_v10 }
 0xc9b   :  { %5413 = vmatmul.mubr.msk.f32.gmra.mrb[78].mxu1 %vm364_vm1, %v2772_v46 }
 0xc9c   :  { %5415 = vmatprep.mubr.msk.f32.mxu1 %vm364_vm1, %v2773_v48  ;;  %v6260_v48 = vld [vmem:[%s6360_s17 + $0x28] sm:$0xff] }
 0xc9f   :  { %5416 = vmatmul.mubr.msk.f32.gmra.mrb[80].mxu1 %vm364_vm1, %v2774_v37 }
 0xca0   :  { %5418 = vmatprep.mubr.msk.f32.mxu1 %vm364_vm1, %v2775_v14 }
 0xca3   :  { %5419 = vmatmul.mubr.msk.f32.gmra.mrb[82].mxu1 %vm364_vm1, %v2776_v25  ;;  %v6261_v25 = vld [vmem:[%s6360_s17 + $0x20] sm:$0xff] }
 0xd4a   :  { %v5387_v18 = vpop.f32.mrb[60].mxu1 }
 0xd4b   :  { %v2933_v17 = vpop.f32.mrb[61].mxu1  ;;  %v7489_v24 = vadd.f32 %v6256_v63, %v5387_v18 }
 0xd4c   :  { %v7494_v26 = vadd.f32 %v6257_v39, %v2933_v17 }
 0xd4d   :  { %v3055_v52 = vsel %vm165_vm0, %v7489_v24, -inf }
 0xd4e   :  { %v5390_v40 = vpop.f32.mrb[62].mxu1  ;;  %v3052_v10 = vsel %vm165_vm0, %v7494_v26, -inf }
 0xd4f   :  { %v2943_v43 = vpop.f32.mrb[63].mxu1  ;;  %v7499_v53 = vadd.f32 %v6258_v29, %v5390_v40  ;;  %v6268_v29 = vld [vmem:[%s6360_s17 + $0x98] sm:$0xff] }
 0xd50   :  { %v7504_v9 = vadd.f32 %v6259_v36, %v2943_v43 }
 0xd51   :  { %v3061_v14 = vsel %vm165_vm0, %v7499_v53, -inf }
 0xd52   :  { %v5393_v57 = vpop.f32.mrb[64].mxu1  ;;  %v3058_v40 = vsel %vm165_vm0, %v7504_v9, -inf }
 0xd53   :  { %v2953_v13 = vpop.f32.mrb[65].mxu1  ;;  %v7509_v37 = vadd.f32 %v6260_v48, %v5393_v57  ;;  %v6270_v48 = vld [vmem:[%s6360_s17 + $0xa8] sm:$0xff] }
 0xd54   :  { %v7514_v18 = vadd.f32 %v6261_v25, %v2953_v13 }
 0xd55   :  { %v3067_v57 = vsel %vm165_vm0, %v7509_v37, -inf }
 0xd56   :  { %v5396_v33 = vpop.f32.mrb[66].mxu1 }
 0xd57   :  { %v7463_v2 = vadd.f32 %v6250_v30, %v5396_v33  ;;  %v2963_v55 = vpop.f32.mrb[67].mxu1  ;;  %v6262_v33 = vld [vmem:[%s6360_s17 + $0x68] sm:$0xff] }
 0xd58   :  { %v7466_v44 = vadd.f32 %v6251_v6, %v2963_v55  ;;  %v6263_v55 = vld [vmem:[%s6360_s17 + $0x60] sm:$0xff] }
 0xd59   :  { %v3073_v38 = vsel %vm165_vm0, %v7463_v2, -inf }
 0xd5a   :  { %3074 = vmax.xlane.f32.xlu1 %v3073_v38  ;;  %v5399_v60 = vpop.f32.mrb[68].mxu1  ;;  %v3070_v50 = vsel %vm165_vm0, %v7466_v44, -inf  ;;  %v3064_v38 = vsel %vm165_vm0, %v7514_v18, -inf }
 0xd5b   :  { %v7473_v19 = vadd.f32 %v6252_v20, %v5399_v60  ;;  %v2973_v49 = vpop.f32.mrb[69].mxu1  ;;  %3071 = vmax.xlane.f32.xlu0 %v3070_v50  ;;  %v6264_v50 = vld [vmem:[%s6360_s17 + $0x78] sm:$0xff] }
 0xd5c   :  { %v7476_v45 = vadd.f32 %v6253_v31, %v2973_v49  ;;  %v6265_v31 = vld [vmem:[%s6360_s17 + $0x70] sm:$0xff] }
 0xd5d   :  { %v3079_v58 = vsel %vm165_vm0, %v7473_v19, -inf }
 0xd5e   :  { %3080 = vmax.xlane.f32.xlu1 %v3079_v58  ;;  %v5402_v16 = vpop.f32.mrb[70].mxu1  ;;  %v3076_v34 = vsel %vm165_vm0, %v7476_v45, -inf }
 0xd5f   :  { %v7483_v41 = vadd.f32 %v6254_v35, %v5402_v16  ;;  %v2983_v21 = vpop.f32.mrb[71].mxu1  ;;  %3077 = vmax.xlane.f32.xlu0 %v3076_v34 }
 0xd60   :  { %v7486_v1 = vadd.f32 %v6255_v54, %v2983_v21  ;;  %v6266_v21 = vld [vmem:[%s6360_s17 + $0x88] sm:$0xff] }
 0xd61   :  { %v3085_v5 = vsel %vm165_vm0, %v7483_v41, -inf }
 0xd62   :  { %3086 = vmax.xlane.f32.xlu1 %v3085_v5  ;;  %v5405_v12 = vpop.f32.mrb[72].mxu1  ;;  %v3082_v56 = vsel %vm165_vm0, %v7486_v1, -inf  ;;  %v6267_v5 = vld [vmem:[%s6360_s17 + $0x80] sm:$0xff] }
 0xd63   :  { %v2993_v7 = vpop.f32.mrb[73].mxu1  ;;  %3083 = vmax.xlane.f32.xlu0 %v3082_v56  ;;  %v7519_v30 = vadd.f32 %v6262_v33, %v5405_v12  ;;  %v6272_v33 = vld [vmem:[%s6360_s17 + $0xb8] sm:$0xff] }
 0xd64   :  { %v7524_v6 = vadd.f32 %v6263_v55, %v2993_v7 }
 0xd65   :  { %v3091_v49 = vsel %vm165_vm0, %v7519_v30, -inf }
 0xd66   :  { %3056 = vmax.xlane.f32.xlu1 %v3055_v52  ;;  %v5408_v0 = vpop.f32.mrb[74].mxu1  ;;  %v3088_v34 = vsel %vm165_vm0, %v7524_v6, -inf }
 0xd67   :  { %v3003_v46 = vpop.f32.mrb[75].mxu1  ;;  %3053 = vmax.xlane.f32.xlu0 %v3052_v10  ;;  %v7529_v20 = vadd.f32 %v6264_v50, %v5408_v0  ;;  %v6269_v0 = vld [vmem:[%s6360_s17 + $0x90] sm:$0xff] }
 0xd68   :  { %v7534_v58 = vadd.f32 %v6265_v31, %v3003_v46 }
 0xd69   :  { %v3097_v63 = vsel %vm165_vm0, %v7529_v20, -inf }
 0xd6a   :  { %3062 = vmax.xlane.f32.xlu1 %v3061_v14  ;;  %v5411_v17 = vpop.f32.mrb[76].mxu1  ;;  %v3094_v56 = vsel %vm165_vm0, %v7534_v58, -inf }
 0xd6b   :  { %v3013_v43 = vpop.f32.mrb[77].mxu1  ;;  %3059 = vmax.xlane.f32.xlu0 %v3058_v40  ;;  %v7539_v54 = vadd.f32 %v6266_v21, %v5411_v17  ;;  %v6271_v17 = vld [vmem:[%s6360_s17 + $0xa0] sm:$0xff] }
 0xd6c   :  { %v7544_v39 = vadd.f32 %v6267_v5, %v3013_v43 }
 0xd6d   :  { %v3103_v36 = vsel %vm165_vm0, %v7539_v54, -inf }
 0xd6e   :  { %3068 = vmax.xlane.f32.xlu1 %v3067_v57  ;;  %v5414_v13 = vpop.f32.mrb[78].mxu1  ;;  %v3100_v46 = vsel %vm165_vm0, %v7544_v39, -inf }
 0xd6f   :  { %v3023_v60 = vpop.f32.mrb[79].mxu1  ;;  %3065 = vmax.xlane.f32.xlu0 %v3064_v38  ;;  %v7549_v52 = vadd.f32 %v6268_v29, %v5414_v13  ;;  %v6273_v13 = vld [vmem:[%s6360_s17 + $0xb0] sm:$0xff]  ;;  %s7939_s17 = sld [smem:[#allocation14_spill]] }
 0xd70   :  { %v7554_v10 = vadd.f32 %v6269_v0, %v3023_v60 }
 0xd71   :  { %v3109_v25 = vsel %vm165_vm0, %v7549_v52, -inf }
 0xd72   :  { %3092 = vmax.xlane.f32.xlu1 %v3091_v49  ;;  %v5417_v16 = vpop.f32.mrb[80].mxu1  ;;  %v3106_v43 = vsel %vm165_vm0, %v7554_v10, -inf }
 0xd73   :  { %v3033_v35 = vpop.f32.mrb[81].mxu1  ;;  %3089 = vmax.xlane.f32.xlu0 %v3088_v34  ;;  %v7559_v14 = vadd.f32 %v6270_v48, %v5417_v16 }
 0xd74   :  { %v7564_v40 = vadd.f32 %v6271_v17, %v3033_v35 }
 0xd75   :  { %v3115_v55 = vsel %vm165_vm0, %v7559_v14, -inf }
 0xd76   :  { %3098 = vmax.xlane.f32.xlu1 %v3097_v63  ;;  %v5420_v12 = vpop.f32.mrb[82].mxu1  ;;  %v3112_v60 = vsel %vm165_vm0, %v7564_v40, -inf }
 0xd77   :  { %v3043_v7 = vpop.f32.mrb[83].mxu1  ;;  %3095 = vmax.xlane.f32.xlu0 %v3094_v56  ;;  %v7569_v57 = vadd.f32 %v6272_v33, %v5420_v12 }
 0xd78   :  { %v7574_v38 = vadd.f32 %v6273_v13, %v3043_v7 }
 0xd79   :  { %v3121_v50 = vsel %vm165_vm0, %v7569_v57, -inf }
 0xd7a   :  { %3104 = vmax.xlane.f32.xlu1 %v3103_v36  ;;  %v3118_v49 = vsel %vm165_vm0, %v7574_v38, -inf }
 0xd7b   :  { %3101 = vmax.xlane.f32.xlu0 %v3100_v46 }
 0xd7e   :  { %3110 = vmax.xlane.f32.xlu1 %v3109_v25 }
 0xd7f   :  { %3107 = vmax.xlane.f32.xlu0 %v3106_v43 }
 0xd82   :  { %3116 = vmax.xlane.f32.xlu1 %v3115_v55 }
 0xd83   :  { %3113 = vmax.xlane.f32.xlu0 %v3112_v60 }
 0xd86   :  { %3122 = vmax.xlane.f32.xlu1 %v3121_v50 }
 0xd87   :  { %3119 = vmax.xlane.f32.xlu0 %v3118_v49 }
 0xde7   :  { %v3075_v31 = vpop.xlane.xlu1 %3074 }
 0xde8   :  { %v3131_v16 = vsub.f32 %v7463_v2, %v3075_v31  ;;  %v3072_v34 = vpop.xlane.xlu0 %3071 }
 0xde9   :  { %v3130_v35 = vsub.f32 %v7466_v44, %v3072_v34 }
 0xdea   :  { %v3162_v21 = vmul.f32 1.442695, %v3131_v16 }
 0xdeb   :  { %v3160_v63 = vmul.f32 1.442695, %v3130_v35  ;;  %v3081_v5 = vpop.xlane.xlu1 %3080 }
 0xdec   :  { %6128 = vpow2.f32 %v3162_v21  ;;  %v3133_v12 = vsub.f32 %v7473_v19, %v3081_v5  ;;  %v3078_v56 = vpop.xlane.xlu0 %3077 }
 0xded   :  { %6130 = vpow2.f32 %v3160_v63  ;;  %v3132_v7 = vsub.f32 %v7476_v45, %v3078_v56 }
 0xdee   :  { %v3166_v29 = vmul.f32 1.442695, %v3133_v12 }
 0xdef   :  { %v3164_v36 = vmul.f32 1.442695, %v3132_v7  ;;  %v3087_v0 = vpop.xlane.xlu1 %3086 }
 0xdf0   :  { %6132 = vpow2.f32 %v3166_v29  ;;  %v3135_v46 = vsub.f32 %v7483_v41, %v3087_v0  ;;  %v3084_v2 = vpop.xlane.xlu0 %3083 }
 0xdf1   :  { %6134 = vpow2.f32 %v3164_v36  ;;  %v3134_v44 = vsub.f32 %v7486_v1, %v3084_v2 }
 0xdf2   :  { %v3170_v48 = vmul.f32 1.442695, %v3135_v46 }
 0xdf3   :  { %v3168_v25 = vmul.f32 1.442695, %v3134_v44  ;;  %v3057_v17 = vpop.xlane.xlu1 %3056 }
 0xdf4   :  { %6136 = vpow2.f32 %v3170_v48  ;;  %v3125_v19 = vsub.f32 %v7489_v24, %v3057_v17  ;;  %v3054_v43 = vpop.xlane.xlu0 %3053 }
 0xdf5   :  { %6138 = vpow2.f32 %v3168_v25  ;;  %v3124_v45 = vsub.f32 %v7494_v26, %v3054_v43 }
 0xdf6   :  { %v7590_v33 = vpop.eup %6128  ;;  %v3150_v55 = vmul.f32 1.442695, %v3125_v19 }
 0xdf7   :  { %v7592_v13 = vpop.eup %6130  ;;  %v3148_v41 = vmul.f32 1.442695, %v3124_v45  ;;  %v3063_v60 = vpop.xlane.xlu1 %3062  ;;  %v3217_v1 = vsel %vm165_vm0, %v7590_v33, 0.0 }
 0xdf8   :  { %6140 = vpow2.f32 %v3150_v55  ;;  %v3127_v50 = vsub.f32 %v7499_v53, %v3063_v60  ;;  %3218 = vadd.xlane.f32.xlu1 %v3217_v1  ;;  %v3060_v49 = vpop.xlane.xlu0 %3059  ;;  %v3214_v24 = vsel %vm165_vm0, %v7592_v13, 0.0 }
 0xdf9   :  { %6142 = vpow2.f32 %v3148_v41  ;;  %v3126_v26 = vsub.f32 %v7504_v9, %v3060_v49  ;;  %3215 = vadd.xlane.f32.xlu0 %v3214_v24 }
 0xdfa   :  { %v7600_v31 = vpop.eup %6132  ;;  %v3154_v16 = vmul.f32 1.442695, %v3127_v50 }
 0xdfb   :  { %v7602_v34 = vpop.eup %6134  ;;  %v3152_v35 = vmul.f32 1.442695, %v3126_v26  ;;  %v3069_v21 = vpop.xlane.xlu1 %3068  ;;  %v3223_v63 = vsel %vm165_vm0, %v7600_v31, 0.0 }
 0xdfc   :  { %6144 = vpow2.f32 %v3154_v16  ;;  %v3129_v53 = vsub.f32 %v7509_v37, %v3069_v21  ;;  %3224 = vadd.xlane.f32.xlu1 %v3223_v63  ;;  %v3066_v5 = vpop.xlane.xlu0 %3065  ;;  %v3220_v12 = vsel %vm165_vm0, %v7602_v34, 0.0 }
 0xdfd   :  { %6146 = vpow2.f32 %v3152_v35  ;;  %v3128_v9 = vsub.f32 %v7514_v18, %v3066_v5  ;;  %3221 = vadd.xlane.f32.xlu0 %v3220_v12 }
 0xdfe   :  { %v7610_v56 = vpop.eup %6136  ;;  %v3158_v7 = vmul.f32 1.442695, %v3129_v53 }
 0xdff   :  { %v7612_v29 = vpop.eup %6138  ;;  %v3156_v36 = vmul.f32 1.442695, %v3128_v9  ;;  %v3093_v0 = vpop.xlane.xlu1 %3092  ;;  %v3229_v46 = vsel %vm165_vm0, %v7610_v56, 0.0 }
 0xe00   :  { %6148 = vpow2.f32 %v3158_v7  ;;  %v3137_v37 = vsub.f32 %v7519_v30, %v3093_v0  ;;  %3230 = vadd.xlane.f32.xlu1 %v3229_v46  ;;  %v3090_v2 = vpop.xlane.xlu0 %3089  ;;  %v3226_v44 = vsel %vm165_vm0, %v7612_v29, 0.0 }
 0xe01   :  { %6150 = vpow2.f32 %v3156_v36  ;;  %v3136_v18 = vsub.f32 %v7524_v6, %v3090_v2  ;;  %3227 = vadd.xlane.f32.xlu0 %v3226_v44 }
 0xe02   :  { %v7620_v48 = vpop.eup %6140  ;;  %v3174_v25 = vmul.f32 1.442695, %v3137_v37 }
 0xe03   :  { %v7622_v17 = vpop.eup %6142  ;;  %v3172_v19 = vmul.f32 1.442695, %v3136_v18  ;;  %v3099_v43 = vpop.xlane.xlu1 %3098  ;;  %v3199_v45 = vsel %vm165_vm0, %v7620_v48, 0.0 }
 0xe04   :  { %6152 = vpow2.f32 %v3174_v25  ;;  %v3139_v30 = vsub.f32 %v7529_v20, %v3099_v43  ;;  %3200 = vadd.xlane.f32.xlu1 %v3199_v45  ;;  %v3096_v55 = vpop.xlane.xlu0 %3095  ;;  %v3196_v41 = vsel %vm165_vm0, %v7622_v17, 0.0 }
 0xe05   :  { %6154 = vpow2.f32 %v3172_v19  ;;  %v3138_v6 = vsub.f32 %v7534_v58, %v3096_v55  ;;  %3197 = vadd.xlane.f32.xlu0 %v3196_v41 }
 0xe06   :  { %v7630_v60 = vpop.eup %6144  ;;  %v3178_v1 = vmul.f32 1.442695, %v3139_v30 }
 0xe07   :  { %v7632_v50 = vpop.eup %6146  ;;  %v3176_v49 = vmul.f32 1.442695, %v3138_v6  ;;  %v3105_v24 = vpop.xlane.xlu1 %3104  ;;  %v3205_v26 = vsel %vm165_vm0, %v7630_v60, 0.0 }
 0xe08   :  { %6156 = vpow2.f32 %v3178_v1  ;;  %v3141_v20 = vsub.f32 %v7539_v54, %v3105_v24  ;;  %3206 = vadd.xlane.f32.xlu1 %v3205_v26  ;;  %v3102_v16 = vpop.xlane.xlu0 %3101  ;;  %v3202_v35 = vsel %vm165_vm0, %v7632_v50, 0.0 }
 0xe09   :  { %6158 = vpow2.f32 %v3176_v49  ;;  %v3140_v58 = vsub.f32 %v7544_v39, %v3102_v16  ;;  %3203 = vadd.xlane.f32.xlu0 %v3202_v35 }
 0xe0a   :  { %v7640_v21 = vpop.eup %6148  ;;  %v3182_v63 = vmul.f32 1.442695, %v3141_v20 }
 0xe0b   :  { %v7642_v53 = vpop.eup %6150  ;;  %v3180_v5 = vmul.f32 1.442695, %v3140_v58  ;;  %v3111_v12 = vpop.xlane.xlu1 %3110  ;;  %v3211_v9 = vsel %vm165_vm0, %v7640_v21, 0.0 }
 0xe0c   :  { %6160 = vpow2.f32 %v3182_v63  ;;  %v3143_v54 = vsub.f32 %v7549_v52, %v3111_v12  ;;  %3212 = vadd.xlane.f32.xlu1 %v3211_v9  ;;  %v3108_v7 = vpop.xlane.xlu0 %3107  ;;  %v3208_v36 = vsel %vm165_vm0, %v7642_v53, 0.0 }
 0xe0d   :  { %6162 = vpow2.f32 %v3180_v5  ;;  %v3142_v39 = vsub.f32 %v7554_v10, %v3108_v7  ;;  %3209 = vadd.xlane.f32.xlu0 %v3208_v36 }
 0xe0e   :  { %v7650_v0 = vpop.eup %6152  ;;  %v3186_v46 = vmul.f32 1.442695, %v3143_v54 }
 0xe0f   :  { %v7652_v37 = vpop.eup %6154  ;;  %v3184_v2 = vmul.f32 1.442695, %v3142_v39  ;;  %v3117_v44 = vpop.xlane.xlu1 %3116  ;;  %v3235_v18 = vsel %vm165_vm0, %v7650_v0, 0.0 }
 0xe10   :  { %6164 = vpow2.f32 %v3186_v46  ;;  %v3145_v52 = vsub.f32 %v7559_v14, %v3117_v44  ;;  %3236 = vadd.xlane.f32.xlu1 %v3235_v18  ;;  %v3114_v25 = vpop.xlane.xlu0 %3113  ;;  %v3232_v19 = vsel %vm165_vm0, %v7652_v37, 0.0 }
 0xe11   :  { %6166 = vpow2.f32 %v3184_v2  ;;  %v3144_v10 = vsub.f32 %v7564_v40, %v3114_v25  ;;  %3233 = vadd.xlane.f32.xlu0 %v3232_v19 }
 0xe12   :  { %v7660_v43 = vpop.eup %6156  ;;  %v3190_v45 = vmul.f32 1.442695, %v3145_v52 }
 0xe13   :  { %v7662_v30 = vpop.eup %6158  ;;  %v3188_v55 = vmul.f32 1.442695, %v3144_v10  ;;  %v3123_v41 = vpop.xlane.xlu1 %3122  ;;  %v3241_v6 = vsel %vm165_vm0, %v7660_v43, 0.0 }
 0xe14   :  { %6168 = vpow2.f32 %v3190_v45  ;;  %v3147_v14 = vsub.f32 %v7569_v57, %v3123_v41  ;;  %3242 = vadd.xlane.f32.xlu1 %v3241_v6  ;;  %v3120_v1 = vpop.xlane.xlu0 %3119  ;;  %v3238_v49 = vsel %vm165_vm0, %v7662_v30, 0.0 }
 0xe15   :  { %6170 = vpow2.f32 %v3188_v55  ;;  %v3146_v40 = vsub.f32 %v7574_v38, %v3120_v1  ;;  %3239 = vadd.xlane.f32.xlu0 %v3238_v49 }
 0xe16   :  { %v7670_v24 = vpop.eup %6160  ;;  %v3194_v26 = vmul.f32 1.442695, %v3147_v14 }
 0xe17   :  { %v7672_v20 = vpop.eup %6162  ;;  %v3192_v16 = vmul.f32 1.442695, %v3146_v40  ;;  %v3247_v35 = vsel %vm165_vm0, %v7670_v24, 0.0 }
 0xe18   :  { %6172 = vpow2.f32 %v3194_v26  ;;  %3248 = vadd.xlane.f32.xlu1 %v3247_v35  ;;  %v3244_v57 = vsel %vm165_vm0, %v7672_v20, 0.0 }
 0xe19   :  { %6174 = vpow2.f32 %v3192_v16  ;;  %3245 = vadd.xlane.f32.xlu0 %v3244_v57 }
 0xe1a   :  { %v7678_v58 = vpop.eup %6164 }
 0xe1b   :  { %v7680_v38 = vpop.eup %6166  ;;  %v3253_v63 = vsel %vm165_vm0, %v7678_v58, 0.0 }
 0xe1c   :  { %3254 = vadd.xlane.f32.xlu1 %v3253_v63  ;;  %v3250_v5 = vsel %vm165_vm0, %v7680_v38, 0.0 }
 0xe1d   :  { %3251 = vadd.xlane.f32.xlu0 %v3250_v5 }
 0xe1e   :  { %v7686_v12 = vpop.eup %6168 }
 0xe1f   :  { %v7688_v9 = vpop.eup %6170  ;;  %v3259_v54 = vsel %vm165_vm0, %v7686_v12, 0.0 }
 0xe20   :  { %3260 = vadd.xlane.f32.xlu1 %v3259_v54  ;;  %v3256_v7 = vsel %vm165_vm0, %v7688_v9, 0.0 }
 0xe21   :  { %3257 = vadd.xlane.f32.xlu0 %v3256_v7 }
 0xe22   :  { %v7694_v36 = vpop.eup %6172 }
 0xe23   :  { %v7696_v39 = vpop.eup %6174  ;;  %v3265_v46 = vsel %vm165_vm0, %v7694_v36, 0.0 }
 0xe24   :  { %3266 = vadd.xlane.f32.xlu1 %v3265_v46  ;;  %v3262_v2 = vsel %vm165_vm0, %v7696_v39, 0.0 }
 0xe25   :  { %3263 = vadd.xlane.f32.xlu0 %v3262_v2 }
 0xe85   :  { %v3219_v44 = vpop.xlane.xlu1 %3218 }
 0xe86   :  { %6176 = vrcp.f32 %v3219_v44  ;;  %v3216_v18 = vpop.xlane.xlu0 %3215 }
 0xe87   :  { %6178 = vrcp.f32 %v3216_v18 }
 0xe89   :  { %v3225_v52 = vpop.xlane.xlu1 %3224 }
 0xe8a   :  { %6180 = vrcp.f32 %v3225_v52  ;;  %v3222_v25 = vpop.xlane.xlu0 %3221 }
 0xe8b   :  { %6182 = vrcp.f32 %v3222_v25 }
 0xe8d   :  { %v3231_v19 = vpop.xlane.xlu1 %3230 }
 0xe8e   :  { %6184 = vrcp.f32 %v3231_v19  ;;  %v3228_v10 = vpop.xlane.xlu0 %3227 }
 0xe8f   :  { %6186 = vrcp.f32 %v3228_v10 }
 0xe90   :  { %v6177_v45 = vpop.eup %6176 }
 0xe91   :  { %v6179_v55 = vpop.eup %6178  ;;  %v3201_v41 = vpop.xlane.xlu1 %3200  ;;  %v3299_v1 = vmul.f32 %v6177_v45, %v7590_v33 }
 0xe92   :  { %6188 = vrcp.f32 %v3201_v41  ;;  %v3198_v6 = vpop.xlane.xlu0 %3197  ;;  %v3298_v14 = vmul.f32 %v6179_v55, %v7592_v13 }
 0xe93   :  { %6190 = vrcp.f32 %v3198_v6 }
 0xe94   :  { %v6181_v49 = vpop.eup %6180  ;;  %5433 = vmatprep.mubr.msk.f32.mxu0 %vm165_vm0, %v3298_v14 }
 0xe95   :  { %v6183_v40 = vpop.eup %6182  ;;  %v3207_v26 = vpop.xlane.xlu1 %3206  ;;  %5434 = vmatmul.mubr.msk.f32.vlgmr.msra.gmra.mrb[30].mxu0 %vm165_vm0, %v3299_v1  ;;  %v3301_v13 = vmul.f32 %v6181_v49, %v7600_v31  ;;  %v2319_v1 = vld [vmem:[%s7939_s17] sm:$0xff]  ;;  %v2320_v49 = vld [vmem:[%s7939_s17 + $0x8] sm:$0xff] }
 0xe96   :  { %6192 = vrcp.f32 %v3207_v26  ;;  %5813 = vmatpush3.bf16.msra.mxu0 %v7362_v4  ;;  %v3204_v16 = vpop.xlane.xlu0 %3203  ;;  %v3300_v35 = vmul.f32 %v6183_v40, %v7602_v34 }
 0xe97   :  { %5815 = vmatprep.subr.bf16.mxu0 %v7364_v8  ;;  %6194 = vrcp.f32 %v3204_v16  ;;  %v5846_v16 = vpack.c.bf16 %v2320_v49, %v2319_v1 }
 0xe98   :  { %v6185_v33 = vpop.eup %6184  ;;  %5436 = vmatprep.mubr.msk.f32.mxu0 %vm165_vm0, %v3300_v35 }
 0xe99   :  { %v6187_v57 = vpop.eup %6186  ;;  %v3213_v63 = vpop.xlane.xlu1 %3212  ;;  %5437 = vmatmul.mubr.msk.f32.gmra.mrb[32].mxu0 %vm165_vm0, %v3301_v13  ;;  %v3303_v34 = vmul.f32 %v6185_v33, %v7610_v56  ;;  %v2321_v13 = vld [vmem:[%s7939_s17 + $0x10] sm:$0xff]  ;;  %v2322_v33 = vld [vmem:[%s7939_s17 + $0x18] sm:$0xff] }
 0xe9a   :  { %6196 = vrcp.f32 %v3213_v63  ;;  %5817 = vmatpush3.bf16.msra.mxu0 %v7364_v8  ;;  %v3210_v5 = vpop.xlane.xlu0 %3209  ;;  %v3302_v4 = vmul.f32 %v6187_v57, %v7612_v29  ;;  %v5850_v63 = vpack.c.bf16 %v2322_v33, %v2321_v13 }
 0xe9b   :  { %5819 = vmatprep.subr.bf16.mxu0 %v7366_v42  ;;  %6198 = vrcp.f32 %v3210_v5 }
 0xe9c   :  { %v6189_v54 = vpop.eup %6188  ;;  %5439 = vmatprep.mubr.msk.f32.mxu0 %vm165_vm0, %v3302_v4 }
 0xe9d   :  { %v6191_v31 = vpop.eup %6190  ;;  %v3237_v7 = vpop.xlane.xlu1 %3236  ;;  %5440 = vmatmul.mubr.msk.f32.gmra.mrb[34].mxu0 %vm165_vm0, %v3303_v34  ;;  %v3293_v29 = vmul.f32 %v6189_v54, %v7620_v48 }
 0xe9e   :  { %6200 = vrcp.f32 %v3237_v7  ;;  %5821 = vmatpush3.bf16.msra.mxu0 %v7366_v42  ;;  %v3234_v46 = vpop.xlane.xlu0 %3233  ;;  %v3292_v8 = vmul.f32 %v6191_v31, %v7622_v17 }
 0xe9f   :  { %5823 = vmatprep.subr.bf16.mxu0 %v7368_v59  ;;  %6202 = vrcp.f32 %v3234_v46 }
 0xea0   :  { %v6193_v2 = vpop.eup %6192  ;;  %5454 = vmatprep.mubr.msk.f32.mxu0 %vm165_vm0, %v3292_v8 }
 0xea1   :  { %v6195_v56 = vpop.eup %6194  ;;  %v3243_v44 = vpop.xlane.xlu1 %3242  ;;  %5455 = vmatmul.mubr.msk.f32.vlgmr.msra.gmra.mrb[30].mxu0 %vm165_vm0, %v3293_v29  ;;  %v3295_v48 = vmul.f32 %v6193_v2, %v7630_v60 }
 0xea2   :  { %6204 = vrcp.f32 %v3243_v44  ;;  %5825 = vmatpush3.bf16.msra.mxu0 %v7368_v59  ;;  %v3240_v18 = vpop.xlane.xlu0 %3239  ;;  %v3294_v42 = vmul.f32 %v6195_v56, %v7632_v50 }
 0xea3   :  { %5827 = vmatprep.subr.bf16.mxu0 %v7370_v62  ;;  %6206 = vrcp.f32 %v3240_v18 }
 0xea4   :  { %v6197_v17 = vpop.eup %6196  ;;  %5457 = vmatprep.mubr.msk.f32.mxu0 %vm165_vm0, %v3294_v42 }
 0xea5   :  { %v6199_v52 = vpop.eup %6198  ;;  %v3249_v25 = vpop.xlane.xlu1 %3248  ;;  %5458 = vmatmul.mubr.msk.f32.gmra.mrb[32].mxu0 %vm165_vm0, %v3295_v48  ;;  %v3297_v50 = vmul.f32 %v6197_v17, %v7640_v21 }
 0xea6   :  { %6208 = vrcp.f32 %v3249_v25  ;;  %5829 = vmatpush3.bf16.msra.mxu0 %v7370_v62  ;;  %v3246_v19 = vpop.xlane.xlu0 %3245  ;;  %v3296_v59 = vmul.f32 %v6199_v52, %v7642_v53 }
 0xea7   :  { %5831 = vmatprep.subr.bf16.mxu0 %v7372_v27  ;;  %6210 = vrcp.f32 %v3246_v19 }
 0xea8   :  { %v6201_v10 = vpop.eup %6200  ;;  %5460 = vmatprep.mubr.msk.f32.mxu0 %vm165_vm0, %v3296_v59 }
 0xea9   :  { %v6203_v60 = vpop.eup %6202  ;;  %v3255_v45 = vpop.xlane.xlu1 %3254  ;;  %5461 = vmatmul.mubr.msk.f32.gmra.mrb[34].mxu0 %vm165_vm0, %v3297_v50  ;;  %v3305_v53 = vmul.f32 %v6201_v10, %v7650_v0 }
 0xeaa   :  { %6212 = vrcp.f32 %v3255_v45  ;;  %5833 = vmatpush3.bf16.msra.mxu0 %v7372_v27  ;;  %v3252_v55 = vpop.xlane.xlu0 %3251  ;;  %v3304_v62 = vmul.f32 %v6203_v60, %v7652_v37 }
 0xeab   :  { %5835 = vmatprep.subr.bf16.mxu0 %v7374_v61  ;;  %6214 = vrcp.f32 %v3252_v55 }
 0xeac   :  { %v6205_v21 = vpop.eup %6204  ;;  %5475 = vmatprep.mubr.msk.f32.mxu0 %vm165_vm0, %v3304_v62 }
 0xead   :  { %v6207_v41 = vpop.eup %6206  ;;  %v3261_v6 = vpop.xlane.xlu1 %3260  ;;  %5476 = vmatmul.mubr.msk.f32.vlgmr.msra.gmra.mrb[30].mxu0 %vm165_vm0, %v3305_v53  ;;  %v3307_v0 = vmul.f32 %v6205_v21, %v7660_v43  ;;  %v2326_v21 = vld [vmem:[%s7941_s19] sm:$0xff] }
 0xeae   :  { %6216 = vrcp.f32 %v3261_v6  ;;  %5837 = vmatpush3.bf16.msra.mxu0 %v7374_v61  ;;  %v3258_v27 = vpop.xlane.xlu0 %3257  ;;  %v3306_v37 = vmul.f32 %v6207_v41, %v7662_v30  ;;  %v2327_v41 = vld [vmem:[%s7941_s19 + $0x8] sm:$0xff]  ;;  %v2328_v6 = vld [vmem:[%s7941_s19 + $0x10] sm:$0xff] }
 0xeaf   :  { %5839 = vmatprep.subr.bf16.mxu0 %v7376_v3  ;;  %6218 = vrcp.f32 %v3258_v27  ;;  %v5854_v27 = vpack.c.bf16 %v2327_v41, %v2326_v21 }
 0xeb0   :  { %v6209_v14 = vpop.eup %6208  ;;  %5478 = vmatprep.mubr.msk.f32.mxu0 %vm165_vm0, %v3306_v37  ;;  %v2329_v37 = vld [vmem:[%s7941_s19 + $0x18] sm:$0xff] }
 0xeb1   :  { %v6211_v40 = vpop.eup %6210  ;;  %v3267_v26 = vpop.xlane.xlu1 %3266  ;;  %5479 = vmatmul.mubr.msk.f32.gmra.mrb[32].mxu0 %vm165_vm0, %v3307_v0  ;;  %v3309_v43 = vmul.f32 %v6209_v14, %v7670_v24  ;;  %v5858_v0 = vpack.c.bf16 %v2329_v37, %v2328_v6  ;;  %5855 = vmatprep.subr.bf16.mxu1 %v5854_v27 }
 0xeb2   :  { %6220 = vrcp.f32 %v3267_v26  ;;  %5841 = vmatpush3.bf16.msra.mxu0 %v7376_v3  ;;  %v3264_v61 = vpop.xlane.xlu0 %3263  ;;  %v3308_v30 = vmul.f32 %v6211_v40, %v7672_v20  ;;  %5857 = vmatpush3.bf16.msra.mxu1 %v5854_v27 }
 0xeb3   :  { %5843 = vmatprep.subr.bf16.mxu0 %v7380_v23  ;;  %6222 = vrcp.f32 %v3264_v61  ;;  %5859 = vmatprep.subr.bf16.mxu1 %v5858_v0 }
 0xeb4   :  { %v6213_v35 = vpop.eup %6212  ;;  %5481 = vmatprep.mubr.msk.f32.mxu0 %vm165_vm0, %v3308_v30 }
 0xeb5   :  { %v6215_v57 = vpop.eup %6214  ;;  %5482 = vmatmul.mubr.msk.f32.gmra.mrb[34].mxu0 %vm165_vm0, %v3309_v43  ;;  %v3311_v20 = vmul.f32 %v6213_v35, %v7678_v58 }
 0xeb6   :  { %5845 = vmatpush3.bf16.msra.mxu0 %v7380_v23  ;;  %v3310_v3 = vmul.f32 %v6215_v57, %v7680_v38  ;;  %5861 = vmatpush3.bf16.msra.mxu1 %v5858_v0 }
 0xeb7   :  { %5847 = vmatprep.subr.bf16.mxu0 %v5846_v16 }
 0xeb8   :  { %v6217_v5 = vpop.eup %6216  ;;  %5496 = vmatprep.mubr.msk.f32.mxu0 %vm165_vm0, %v3310_v3 }
 0xeb9   :  { %v6219_v24 = vpop.eup %6218  ;;  %5497 = vmatmul.mubr.msk.f32.vlgmr.msra.gmra.mrb[30].mxu0 %vm165_vm0, %v3311_v20  ;;  %v3313_v34 = vmul.f32 %v6217_v5, %v7686_v12 }
 0xeba   :  { %v3312_v4 = vmul.f32 %v6219_v24, %v7688_v9  ;;  %5849 = vmatpush3.bf16.msra.mxu0 %v5846_v16 }
 0xebb   :  { %5851 = vmatprep.subr.bf16.mxu0 %v5850_v63 }
 0xebc   :  { %v6221_v54 = vpop.eup %6220  ;;  %5499 = vmatprep.mubr.msk.f32.mxu0 %vm165_vm0, %v3312_v4 }
 0xebd   :  { %v6223_v23 = vpop.eup %6222  ;;  %5500 = vmatmul.mubr.msk.f32.gmra.mrb[32].mxu0 %vm165_vm0, %v3313_v34  ;;  %v3315_v38 = vmul.f32 %v6221_v54, %v7694_v36  ;;  %v4697_v36 = vld [vmem:[%s7940_s14] ss:$0 sm:$0xff] }
 0xebe   :  { %v3314_v58 = vmul.f32 %v6223_v23, %v7696_v39  ;;  %5853 = vmatpush3.bf16.msra.mxu0 %v5850_v63 }
 0xec0   :  { %5502 = vmatprep.mubr.msk.f32.mxu0 %vm165_vm0, %v3314_v58 }
 0xec1   :  { %5503 = vmatmul.mubr.msk.f32.gmra.mrb[34].mxu0 %vm165_vm0, %v3315_v38 }
 0xf8c   :  { %v5498_v9 = vpop.f32.mrb[30].mxu0 }
 0xf8d   :  { %v3769_v31 = vpop.f32.mrb[31].mxu0 }
 0xf8e   :  { %5513 = vmatprep.mubr.msk.f32.mxu0 %vm364_vm1, %v3769_v31 }
 0xf8f   :  { %5514 = vmatmul.mubr.msk.f32.vlgmr.msra.gmra.mrb[36].mxu0 %vm364_vm1, %v5498_v9 }
 0xf90   :  { %v5501_v12 = vpop.f32.mrb[32].mxu0 }
 0xf91   :  { %v3779_v7 = vpop.f32.mrb[33].mxu0 }
 0xf92   :  { %5516 = vmatprep.mubr.msk.f32.mxu0 %vm364_vm1, %v3779_v7 }
 0xf93   :  { %5517 = vmatmul.mubr.msk.f32.gmra.mrb[38].mxu0 %vm364_vm1, %v5501_v12 }
 0xf94   :  { %v5504_v39 = vpop.f32.mrb[34].mxu0 }
 0xf95   :  { %v3789_v46 = vpop.f32.mrb[35].mxu0 }
 0xf96   :  { %5519 = vmatprep.mubr.msk.f32.mxu0 %vm364_vm1, %v3789_v46  ;;  %v2332_v46 = vld [vmem:[%s7942_s24 + $0x8] sm:$0xff] }
 0xf97   :  { %5520 = vmatmul.mubr.msk.f32.gmra.mrb[40].mxu0 %vm364_vm1, %v5504_v39  ;;  %v2331_v39 = vld [vmem:[%s7942_s24] sm:$0xff] }
0x1062   :  { %v5515_v8 = vpop.f32.mrb[36].mxu0 }
0x1063   :  { %v3900_v29 = vadd.f32 %v5515_v8, %v4697_v36  ;;  %v3894_v2 = vpop.f32.mrb[37].mxu0  ;;  %v5862_v8 = vpack.c.bf16 %v2332_v46, %v2331_v39  ;;  %v2340_v39 = vld [vmem:[%s7942_s24 + $0x48] sm:$0xff] }
0x1064   :  { %v3895_v56 = vadd.f32 %v4697_v36, %v3894_v2 }
0x1065   :  { %v7779_v44 = vadd.f32 %v3900_v29, %v7220_v15  ;;  %v2334_v29 = vld [vmem:[%s7942_s24 + $0x18] sm:$0xff]  ;;  %5863 = vmatprep.subr.bf16.mxu0 %v5862_v8 }
0x1066   :  { %v7782_v18 = vadd.f32 %v3895_v56, %v7223_v28  ;;  %v5518_v42 = vpop.f32.mrb[38].mxu0  ;;  %v2335_v56 = vld [vmem:[%s7942_s24 + $0x20] sm:$0xff]  ;;  %5865 = vmatpush3.bf16.msra.mxu0 %v5862_v8  ;;  %v2342_v8 = vld [vmem:[%s7942_s24 + $0x58] sm:$0xff] }
0x1067   :  { %v3910_v48 = vadd.f32 %v5518_v42, %v4697_v36  ;;  %v3904_v17 = vpop.f32.mrb[39].mxu0  ;;  %v3932_v52 = vsel %vm364_vm1, %v7779_v44, 0.0  ;;  %v2336_v42 = vld [vmem:[%s7942_s24 + $0x28] sm:$0xff] }
0x1068   :  { %v3905_v25 = vadd.f32 %v4697_v36, %v3904_v17  ;;  %3933 = vadd.xlane.f32.xlu1 %v3932_v52  ;;  %v3929_v19 = vsel %vm364_vm1, %v7782_v18, 0.0 }
0x1069   :  { %v7789_v59 = vadd.f32 %v3910_v48, %v7230_v51  ;;  %3930 = vadd.xlane.f32.xlu0 %v3929_v19  ;;  %v5870_v48 = vpack.c.bf16 %v2336_v42, %v2335_v56  ;;  %v2344_v56 = vld [vmem:[%s7942_s24 + $0x68] sm:$0xff] }
0x106a   :  { %v7792_v15 = vadd.f32 %v3905_v25, %v7233_v22  ;;  %v5521_v28 = vpop.f32.mrb[40].mxu0 }
0x106b   :  { %v3920_v50 = vadd.f32 %v5521_v28, %v4697_v36  ;;  %v3914_v10 = vpop.f32.mrb[41].mxu0  ;;  %v3938_v60 = vsel %vm364_vm1, %v7789_v59, 0.0 }
0x106c   :  { %v3915_v45 = vadd.f32 %v4697_v36, %v3914_v10  ;;  %3939 = vadd.xlane.f32.xlu1 %v3938_v60  ;;  %v3935_v51 = vsel %vm364_vm1, %v7792_v15, 0.0  ;;  %v2333_v36 = vld [vmem:[%s7942_s24 + $0x10] sm:$0xff] }
0x106d   :  { %v7799_v55 = vadd.f32 %v3920_v50, %v7240_v47  ;;  %3936 = vadd.xlane.f32.xlu0 %v3935_v51  ;;  %v5866_v2 = vpack.c.bf16 %v2334_v29, %v2333_v36  ;;  %v2341_v36 = vld [vmem:[%s7942_s24 + $0x50] sm:$0xff] }
0x106e   :  { %v7802_v22 = vadd.f32 %v3915_v45, %v7243_v32  ;;  %v5882_v29 = vpack.c.bf16 %v2342_v8, %v2341_v36 }
0x106f   :  { %v3944_v62 = vsel %vm364_vm1, %v7799_v55, 0.0  ;;  %5867 = vmatprep.subr.bf16.mxu0 %v5866_v2 }
0x1070   :  { %3945 = vadd.xlane.f32.xlu1 %v3944_v62  ;;  %v3941_v53 = vsel %vm364_vm1, %v7802_v22, 0.0  ;;  %5869 = vmatpush3.bf16.msra.mxu0 %v5866_v2  ;;  %v2343_v2 = vld [vmem:[%s7942_s24 + $0x60] sm:$0xff] }
0x1071   :  { %3942 = vadd.xlane.f32.xlu0 %v3941_v53  ;;  %5871 = vmatprep.subr.bf16.mxu0 %v5870_v48  ;;  %v5886_v42 = vpack.c.bf16 %v2344_v56, %v2343_v2 }
0x1074   :  { %5873 = vmatpush3.bf16.msra.mxu0 %v5870_v48  ;;  %v2345_v48 = vld [vmem:[%s7942_s24 + $0x70] sm:$0xff] }
0x10f5   :  { %v3934_v47 = vpop.xlane.xlu1 %3933 }
0x10f6   :  { %v3948_v32 = vmul.f32 0.03125, %v3934_v47  ;;  %v3931_v14 = vpop.xlane.xlu0 %3930 }
0x10f7   :  { %v3947_v1 = vmul.f32 0.03125, %v3931_v14 }
0x10f8   :  { %v7813_v49 = vsub.f32 %v7779_v44, %v3948_v32  ;;  %v4704_v32 = vld [vmem:[%s7943_s30] ss:$0 sm:$0xff] }
0x10f9   :  { %v7816_v40 = vsub.f32 %v7782_v18, %v3947_v1  ;;  %v3940_v26 = vpop.xlane.xlu1 %3939 }
0x10fa   :  { %v3950_v61 = vmul.f32 0.03125, %v3940_v26  ;;  %v3937_v30 = vpop.xlane.xlu0 %3936  ;;  %v3960_v43 = vmul.f32 %v7813_v49, %v7813_v49 }
0x10fb   :  { %v3949_v16 = vmul.f32 0.03125, %v3937_v30  ;;  %v3959_v35 = vmul.f32 %v7816_v40, %v7816_v40 }
0x10fc   :  { %v7823_v13 = vsub.f32 %v7789_v59, %v3950_v61  ;;  %v3968_v33 = vsel %vm364_vm1, %v3960_v43, 0.0  ;;  %v4705_v61 = vld [vmem:[%s7944_s12] ss:$0 sm:$0xff] }
0x10fd   :  { %v7827_v57 = vsub.f32 %v7792_v15, %v3949_v16  ;;  %3969 = vadd.xlane.f32.xlu1 %v3968_v33  ;;  %v3946_v3 = vpop.xlane.xlu1 %3945  ;;  %v3965_v20 = vsel %vm364_vm1, %v3959_v35, 0.0 }
0x10fe   :  { %v3952_v63 = vmul.f32 0.03125, %v3946_v3  ;;  %3966 = vadd.xlane.f32.xlu0 %v3965_v20  ;;  %v3943_v5 = vpop.xlane.xlu0 %3942  ;;  %v3962_v24 = vmul.f32 %v7823_v13, %v7823_v13 }
0x10ff   :  { %v3951_v4 = vmul.f32 0.03125, %v3943_v5  ;;  %v3961_v34 = vmul.f32 %v7827_v57, %v7827_v57 }
0x1100   :  { %v7835_v54 = vsub.f32 %v7799_v55, %v3952_v63  ;;  %v3974_v23 = vsel %vm364_vm1, %v3962_v24, 0.0 }
0x1101   :  { %v7839_v58 = vsub.f32 %v7802_v22, %v3951_v4  ;;  %3975 = vadd.xlane.f32.xlu1 %v3974_v23  ;;  %v3971_v38 = vsel %vm364_vm1, %v3961_v34, 0.0 }
0x1102   :  { %3972 = vadd.xlane.f32.xlu0 %v3971_v38  ;;  %v3964_v9 = vmul.f32 %v7835_v54, %v7835_v54 }
0x1103   :  { %v3963_v31 = vmul.f32 %v7839_v58, %v7839_v58 }
0x1104   :  { %v3980_v12 = vsel %vm364_vm1, %v3964_v9, 0.0 }
0x1105   :  { %3981 = vadd.xlane.f32.xlu1 %v3980_v12  ;;  %v3977_v7 = vsel %vm364_vm1, %v3963_v31, 0.0 }
0x1106   :  { %3978 = vadd.xlane.f32.xlu0 %v3977_v7  ;;  %v2339_v7 = vld [vmem:[%s7942_s24 + $0x40] sm:$0xff] }
0x1107   :  { %v5878_v46 = vpack.c.bf16 %v2340_v39, %v2339_v7 }
0x118a   :  { %v3970_v17 = vpop.xlane.xlu1 %3969 }
0x118b   :  { %v3984_v52 = vmul.f32 0.03125, %v3970_v17  ;;  %v3967_v25 = vpop.xlane.xlu0 %3966  ;;  %v2346_v17 = vld [vmem:[%s7942_s24 + $0x78] sm:$0xff] }
0x118c   :  { %v3983_v19 = vmul.f32 0.03125, %v3967_v25  ;;  %v4706_v25 = vld [vmem:[%s7945_s27] ss:$0 sm:$0xff] }
0x118d   :  { %v3990_v28 = vadd.f32 1e-05, %v3984_v52  ;;  %v5890_v52 = vpack.c.bf16 %v2346_v17, %v2345_v48 }
0x118e   :  { %v3989_v50 = vadd.f32 1e-05, %v3983_v19  ;;  %v3976_v10 = vpop.xlane.xlu1 %3975 }
0x118f   :  { %6224 = vrsqrt.f32 %v3990_v28  ;;  %v3986_v60 = vmul.f32 0.03125, %v3976_v10  ;;  %v3973_v45 = vpop.xlane.xlu0 %3972 }
0x1190   :  { %6226 = vrsqrt.f32 %v3989_v50  ;;  %v3985_v51 = vmul.f32 0.03125, %v3973_v45 }
0x1191   :  { %v3992_v62 = vadd.f32 1e-05, %v3986_v60 }
0x1192   :  { %v3991_v53 = vadd.f32 1e-05, %v3985_v51  ;;  %v3982_v21 = vpop.xlane.xlu1 %3981 }
0x1193   :  { %6228 = vrsqrt.f32 %v3992_v62  ;;  %v3988_v41 = vmul.f32 0.03125, %v3982_v21  ;;  %v3979_v6 = vpop.xlane.xlu0 %3978 }
0x1194   :  { %6230 = vrsqrt.f32 %v3991_v53  ;;  %v3987_v27 = vmul.f32 0.03125, %v3979_v6 }
0x1195   :  { %v3994_v37 = vadd.f32 1e-05, %v3988_v41 }
0x1196   :  { %v3993_v0 = vadd.f32 1e-05, %v3987_v27 }
0x1197   :  { %6232 = vrsqrt.f32 %v3994_v37 }
0x1198   :  { %6234 = vrsqrt.f32 %v3993_v0 }
0x1199   :  { %v6225_v47 = vpop.eup %6224 }
0x119a   :  { %v6227_v14 = vpop.eup %6226  ;;  %v4002_v1 = vmul.f32 %v6225_v47, %v7813_v49 }
0x119b   :  { %v4001_v26 = vmul.f32 %v6227_v14, %v7816_v40 }
0x119c   :  { %v4014_v30 = vmul.f32 %v4704_v32, %v4002_v1 }
0x119d   :  { %v6229_v43 = vpop.eup %6228  ;;  %v4013_v16 = vmul.f32 %v4704_v32, %v4001_v26 }
0x119e   :  { %v6231_v35 = vpop.eup %6230  ;;  %v4004_v33 = vmul.f32 %v6229_v43, %v7823_v13  ;;  %v4026_v63 = vadd.f32 %v4705_v61, %v4014_v30 }
0x119f   :  { %v4025_v3 = vadd.f32 %v4705_v61, %v4013_v16  ;;  %v4003_v20 = vmul.f32 %v6231_v35, %v7827_v57 }
0x11a0   :  { %v4016_v5 = vmul.f32 %v4704_v32, %v4004_v33 }
0x11a1   :  { %v6233_v24 = vpop.eup %6232  ;;  %5530 = vmatprep.mubr.msk.f32.mxu1 %vm364_vm1, %v4025_v3  ;;  %v4015_v4 = vmul.f32 %v4704_v32, %v4003_v20 }
0x11a2   :  { %v6235_v49 = vpop.eup %6234  ;;  %5531 = vmatmul.mubr.msk.f32.vlgmr.msra.gmra.mrb[84].mxu1 %vm364_vm1, %v4026_v63  ;;  %v4006_v40 = vmul.f32 %v6233_v24, %v7835_v54  ;;  %v4028_v23 = vadd.f32 %v4705_v61, %v4016_v5  ;;  %v2337_v54 = vld [vmem:[%s7942_s24 + $0x30] sm:$0xff] }
0x11a3   :  { %v4027_v34 = vadd.f32 %v4705_v61, %v4015_v4  ;;  %v4005_v13 = vmul.f32 %v6235_v49, %v7839_v58  ;;  %v2338_v58 = vld [vmem:[%s7942_s24 + $0x38] sm:$0xff] }
0x11a4   :  { %v4018_v57 = vmul.f32 %v4704_v32, %v4006_v40  ;;  %v5874_v12 = vpack.c.bf16 %v2338_v58, %v2337_v54  ;;  %v6334_v58 = vmov 0.0|0.0  }
0x11a5   :  { %5533 = vmatprep.mubr.msk.f32.mxu1 %vm364_vm1, %v4027_v34  ;;  %v4017_v38 = vmul.f32 %v4704_v32, %v4005_v13  ;;  %5894 = vmatprep.subr.bf16.mxu1 %v6334_v58 }
0x11a6   :  { %5534 = vmatmul.mubr.msk.f32.gmra.mrb[86].mxu1 %vm364_vm1, %v4028_v23  ;;  %v4030_v31 = vadd.f32 %v4705_v61, %v4018_v57  ;;  %5875 = vmatprep.subr.bf16.mxu0 %v5874_v12 }
0x11a7   :  { %v4029_v9 = vadd.f32 %v4705_v61, %v4017_v38  ;;  %5877 = vmatpush3.bf16.msra.mxu0 %v5874_v12  ;;  %v4713_v12 = vld [vmem:[%s7946_s22] ss:$0 sm:$0xff] }
0x11a8   :  { %5879 = vmatprep.subr.bf16.mxu0 %v5878_v46 }
0x11a9   :  { %5536 = vmatprep.mubr.msk.f32.mxu1 %vm364_vm1, %v4029_v9 }
0x11aa   :  { %5537 = vmatmul.mubr.msk.f32.gmra.mrb[88].mxu1 %vm364_vm1, %v4030_v31 }
0x11ab   :  { %5881 = vmatpush3.bf16.msra.mxu0 %v5878_v46  ;;  %5592 = vmatprep.mubr.msk.f32.mxu1 %vm6335_vm13, %v6333_v11 }
0x11ac   :  { %5883 = vmatprep.subr.bf16.mxu0 %v5882_v29 }
0x11af   :  { %5885 = vmatpush3.bf16.msra.mxu0 %v5882_v29 }
0x11b0   :  { %5887 = vmatprep.subr.bf16.mxu0 %v5886_v42 }
0x11b3   :  { %5889 = vmatpush3.bf16.msra.mxu0 %v5886_v42 }
0x11b4   :  { %5891 = vmatprep.subr.bf16.mxu0 %v5890_v52 }
0x11b7   :  { %5893 = vmatpush3.bf16.msra.mxu0 %v5890_v52 }
0x1275   :  { %v5532_v19 = vpop.f32.mrb[84].mxu1 }
0x1276   :  { %v4127_v28 = vadd.f32 %v5532_v19, %v4706_v25  ;;  %v4121_v50 = vpop.f32.mrb[85].mxu1 }
0x1277   :  { %v4122_v10 = vadd.f32 %v4706_v25, %v4121_v50 }
0x1278   :  { %v4157_v60 = vmul.f32 0.70710677, %v4127_v28  ;;  %v4151_v16 = vmul.f32 0.5, %v4127_v28 }
0x1279   :  { %v4156_v45 = vmul.f32 0.70710677, %v4122_v10  ;;  %v5535_v51 = vpop.f32.mrb[86].mxu1  ;;  %v4150_v30 = vmul.f32 0.5, %v4122_v10 }
0x127a   :  { %6236 = verf.f32 %v4157_v60  ;;  %v4137_v62 = vadd.f32 %v5535_v51, %v4706_v25  ;;  %v4131_v53 = vpop.f32.mrb[87].mxu1  ;;  %v4287_v51 = vld [vmem:[%s7947_s23] sm:$0x3] }
0x127b   :  { %6238 = verf.f32 %v4156_v45  ;;  %v4132_v21 = vadd.f32 %v4706_v25, %v4131_v53 }
0x127c   :  { %v4159_v41 = vmul.f32 0.70710677, %v4137_v62  ;;  %v4153_v4 = vmul.f32 0.5, %v4137_v62 }
0x127d   :  { %v4158_v6 = vmul.f32 0.70710677, %v4132_v21  ;;  %v5538_v27 = vpop.f32.mrb[88].mxu1  ;;  %v4152_v5 = vmul.f32 0.5, %v4132_v21 }
0x127e   :  { %6240 = verf.f32 %v4159_v41  ;;  %v4147_v37 = vadd.f32 %v5538_v27, %v4706_v25  ;;  %v4141_v0 = vpop.f32.mrb[89].mxu1  ;;  %v4392_v27 = vld [vmem:[%s6510_s4 + $0x8] sm:$0xff] }
0x127f   :  { %6242 = verf.f32 %v4158_v6  ;;  %v4142_v47 = vadd.f32 %v4706_v25, %v4141_v0  ;;  %v4391_v6 = vld [vmem:[%s6510_s4] sm:$0xff] }
0x1280   :  { %v4161_v32 = vmul.f32 0.70710677, %v4147_v37  ;;  %v4155_v9 = vmul.f32 0.5, %v4147_v37  ;;  %v4393_v37 = vld [vmem:[%s6510_s4 + $0x10] sm:$0xff]  ;;  %v5904_v0 = vpack.c.bf16 %v4392_v27, %v4391_v6 }
0x1281   :  { %v4160_v14 = vmul.f32 0.70710677, %v4142_v47  ;;  %v4154_v57 = vmul.f32 0.5, %v4142_v47  ;;  %v4394_v47 = vld [vmem:[%s6510_s4 + $0x18] sm:$0xff]  ;;  %s4483_s4 = sshll.u32 %s6336_s28, 4  ;;  %s4484_s4 = int_to_ptr.vmem [resolvable:$true] %s4483_s4 }
0x1282   :  { %6244 = verf.f32 %v4161_v32  ;;  %s6274_s1 = scalar_lea.vmem %s4484_s4, 32  ;;  %p6279_p1 = scmp.lt.s32.totalorder %s4484_s4, %s4484_s4 }
0x1283   :  { %6246 = verf.f32 %v4160_v14  ;;  %p6275_p0 = scmp.ne.s32.totalorder %s4484_s4, %s6274_s1  ;;  %p6280_p2 = scmp.lt.s32.totalorder %s6274_s1, %s6274_s1 }
0x1284   :  { %v6237_v1 = vpop.eup %6236 }
0x1285   :  { %v6239_v26 = vpop.eup %6238  ;;  %v4169_v61 = vadd.f32 1.0, %v6237_v1  ;;  %p6281_p3 = por %p6280_p2, %p6279_p1 }
0x1286   :  { %v4168_v43 = vadd.f32 1.0, %v6239_v26 }
0x1287   :  { %v4175_v20 = vmul.f32 %v4169_v61, %v4151_v16  ;;  %v4715_v61 = vld [vmem:[%s7948_s26] ss:$0 sm:$0xff]  ;;  %p6282_p4 = pnand %p6281_p3, %p6275_p0 }
0x1288   :  { %v6241_v35 = vpop.eup %6240  ;;  %v4174_v33 = vmul.f32 %v4168_v43, %v4150_v30  ;;  %v4716_v43 = vld [vmem:[%s6505_s6] ss:$0 sm:$0xff] }
0x1289   :  { %v6243_v3 = vpop.eup %6242  ;;  %v4171_v63 = vadd.f32 1.0, %v6241_v35 }
0x128a   :  { %v4170_v24 = vadd.f32 1.0, %v6243_v3  ;;  %5571 = vmatprep.mubr.f32.mxu0 %v4174_v33  ;;  %v4717_v33 = vld [vmem:[%s6515_s21] ss:$0 sm:$0xff] }
0x128b   :  { %5572 = vmatmul.mubr.f32.vlgmr.msra.gmra.mrb[42].mxu0 %v4175_v20  ;;  %v4177_v23 = vmul.f32 %v4171_v63, %v4153_v4 }
0x128c   :  { %v6245_v49 = vpop.eup %6244  ;;  %v4176_v40 = vmul.f32 %v4170_v24, %v4152_v5 }
0x128d   :  { %v6247_v34 = vpop.eup %6246  ;;  %v4173_v13 = vadd.f32 1.0, %v6245_v49 }
0x128e   :  { %v4172_v38 = vadd.f32 1.0, %v6247_v34  ;;  %5574 = vmatprep.mubr.f32.mxu0 %v4176_v40 }
0x128f   :  { %5575 = vmatmul.mubr.f32.gmra.mrb[44].mxu0 %v4177_v23  ;;  %v4179_v54 = vmul.f32 %v4173_v13, %v4155_v9 }
0x1290   :  { %v4178_v31 = vmul.f32 %v4172_v38, %v4154_v57 }
0x1292   :  { %5577 = vmatprep.mubr.f32.mxu0 %v4178_v31 }
0x1293   :  { %5578 = vmatmul.mubr.f32.gmra.mrb[46].mxu0 %v4179_v54 }
0x135e   :  { %v5573_v7 = vpop.f32.mrb[42].mxu0 }
0x135f   :  { %v4258_v39 = vadd.f32 %v5573_v7, %v4713_v12  ;;  %v4252_v46 = vpop.f32.mrb[43].mxu0 }
0x1360   :  { %v4253_v36 = vadd.f32 %v4713_v12, %v4252_v46 }
0x1361   :  { %v4282_v8 = vadd.f32 %v4258_v39, %v7779_v44 }
0x1362   :  { %v4281_v29 = vadd.f32 %v4253_v36, %v7782_v18  ;;  %v5576_v2 = vpop.f32.mrb[44].mxu0 }
0x1363   :  { %v4268_v56 = vadd.f32 %v5576_v2, %v4713_v12  ;;  %v4262_v42 = vpop.f32.mrb[45].mxu0 }
0x1364   :  { %v5895_v48 = vpack.c.bf16 %v4282_v8, %v4281_v29  ;;  %v4263_v17 = vadd.f32 %v4713_v12, %v4262_v42 }
0x1365   :  { %v4284_v52 = vadd.f32 %v4268_v56, %v7789_v59 }
0x1366   :  { %v4283_v25 = vadd.f32 %v4263_v17, %v7792_v15  ;;  %v5579_v19 = vpop.f32.mrb[46].mxu0  ;;  %5896 = vmatpush3.bf16.msra.mxu1 %v5895_v48 }
0x1367   :  { %v4278_v28 = vadd.f32 %v5579_v19, %v4713_v12  ;;  %v4272_v50 = vpop.f32.mrb[47].mxu0  ;;  %5897 = vmatprep.subr.bf16.mxu1 %v6334_v58 }
0x1368   :  { %v5898_v10 = vpack.c.bf16 %v4284_v52, %v4283_v25  ;;  %v4273_v60 = vadd.f32 %v4713_v12, %v4272_v50 }
0x1369   :  { %v4286_v44 = vadd.f32 %v4278_v28, %v7799_v55 }
0x136a   :  { %v4285_v18 = vadd.f32 %v4273_v60, %v7802_v22  ;;  %5899 = vmatpush3.bf16.msra.mxu1 %v5898_v10 }
0x136b   :  { %5900 = vmatprep.subr.bf16.mxu1 %v6334_v58 }
0x136c   :  { %v5901_v45 = vpack.c.bf16 %v4286_v44, %v4285_v18 }
0x136e   :  { %5902 = vmatpush3.bf16.msra.mxu1 %v5901_v45 }
0x136f   :  { %5903 = vmatprep.subr.bf16.mxu1 %v6334_v58 }
0x1371   :  { %5593 = vmatmul.mubr.msk.f32.vlgmr.msra.gmra.mrb[90].mxu1 %vm165_vm0, %v4287_v51 }
0x1372   :  { %5603 = vmatprep.mubr.msk.f32.mxu1 %vm6335_vm13, %v6333_v11  ;;  %5905 = vmatpush3.bf16.msra.mxu1 %v5904_v0  ;;  %v5907_v11 = vpack.c.bf16 %v4394_v47, %v4393_v37 }
0x1373   :  { %5906 = vmatprep.subr.bf16.mxu1 %v6334_v58 }
0x1376   :  { %5908 = vmatpush3.bf16.msra.mxu1 %v5907_v11 }
0x1444   :  { %v4357_v59 = vpop.f32.mrb[90].mxu1 }
0x1445   :  { %v5594_v15 = vpop.f32.mrb[91].mxu1  ;;  %v4364_v55 = vsel %vm4363_vm14, %v4357_v59, 0.0 }
0x1446   :  { %4365 = vadd.xlane.f32.xlu0 %v4364_v55 }
0x14d3   :  { %v4366_v22 = vpop.xlane.xlu0 %4365 }
0x14d4   :  { %v4367_v62 = vmul.f32 0.03125, %v4366_v22 }
0x14d6   :  { %v4368_v53 = vsub.f32 %v4357_v59, %v4367_v62 }
0x14d8   :  { %v4369_v21 = vmul.f32 %v4368_v53, %v4368_v53 }
0x14da   :  { %v4370_v41 = vsel %vm4363_vm14, %v4369_v21, 0.0 }
0x14db   :  { %4371 = vadd.xlane.f32.xlu1 %v4370_v41 }
0x1568   :  { %v4372_v32 = vpop.xlane.xlu1 %4371 }
0x1569   :  { %v4373_v14 = vmul.f32 0.03125, %v4372_v32 }
0x156b   :  { %v4374_v1 = vadd.f32 1e-05, %v4373_v14 }
0x156d   :  { %6248 = vrsqrt.f32 %v4374_v1 }
0x1577   :  { %v6249_v26 = vpop.eup %6248 }
0x1578   :  { %v4376_v30 = vmul.f32 %v6249_v26, %v4368_v53 }
0x157a   :  { %v4383_v16 = vmul.f32 %v4715_v61, %v4376_v30 }
0x157c   :  { %v4390_v35 = vadd.f32 %v4716_v43, %v4383_v16 }
0x157e   :  { %5604 = vmatmul.mubr.msk.f32.vlgmr.msra.gmra.mrb[92].mxu1 %vm364_vm1, %v4390_v35 }
0x1651   :  { %v4471_v3 = vpop.f32.mrb[92].mxu1 }
0x1652   :  { %v4472_v20 = vadd.f32 %v4717_v33, %v4471_v3  ;;  %v5605_v63 = vpop.f32.mrb[93].mxu1 }
0x1654   :  { %4476 = vst.msk [vmem:[#allocation2] sm:$0x3] %vm4475_vm15, %v4472_v20 }
0x1655   :  { %6285 = shalt.err (!%p6282_p4)
}
0x1656   :  { %s6286_s6 = scalar_lea.hbm %s6520_s20, 32 }
0x1657   :  { %p6287_p5 = scmp.ne.s32.totalorder %s6520_s20, %s6286_s6  ;;  %p6290_p6 = scmp.lt.u32.totalorder %s6286_s6, %s6520_s20 }
0x1659   :  { %p6292_p7 = pnand %p6290_p6, %p6287_p5 }
0x165b   :  { %6295 = shalt.err (!%p6292_p7)
}
0x165c   :  { %4486 = dma.vmem_to_hbm [thread:$0]  %s4484_s4, 32, %s6520_s20, [#allocation3]  }
0x165d   :  { %6296 = dma.done.wait [#allocation3], 32  }
0x165e   :  { %6297 = vsyncadd [#allocation3], 4294967264 }
0x165f   :  { %4490 = vsyncpa [#allocation3], 1 }

</bundles_post_ra>
